<compile_context>
chip_gen: v7x
topology: tpu7x:2x2x1
jax: 0.10.0
libtpu: 0.0.40
codegen_flags: <defaults>
</compile_context>

<pallas_src>
import functools

import jax
import jax.numpy as jnp
import numpy as np
from jax.experimental import pallas as pl
from jax.experimental.pallas import tpu as pltpu


def _round_up(v, m):
    return (v + m - 1) // m * m


# ----------------------------- Pallas kernel --------------------------------
def _bayescap_fwd_kernel(
    x_ref,                         # (TB, D)   f32
    w1_ref, w2_ref, w3_ref,        # bf16: (D,Hp), (Hp,Hp), (Hp,D)   (mod, sampled Bayes W)
    b12_ref,                       # (2, Hp)   f32  rows = [b1, b2]
    b3_ref,                        # (1, D)    f32
    wh1_ref,                       # (D, 3D)   bf16  [wm1 | wa1 | wb1]
    bh1_ref,                       # (1, 3D)   f32   [bm1 | ba1 | bb1]
    wh2_ref,                       # (3, D, D) bf16  stacked [wm2, wa2, wb2]
    bh2_ref,                       # (3, D)    f32   rows  = [bm2, ba2, bb2]
    mu_ref, alpha_ref, beta_ref,   # (TB, D)   f32 each
):
    f32 = jnp.float32
    bf16 = jnp.bfloat16
    D = mu_ref.shape[-1]

    x = x_ref[...]

    # ---- mod: BayesLinear -> ReLU -> BayesLinear -> ReLU -> BayesLinear ----
    h = jnp.dot(x.astype(bf16), w1_ref[...], preferred_element_type=f32)
    h = jnp.maximum(h + b12_ref[0:1, :], 0.0)
    h = jnp.dot(h.astype(bf16), w2_ref[...], preferred_element_type=f32)
    h = jnp.maximum(h + b12_ref[1:2, :], 0.0)
    x_intr = jnp.dot(h.astype(bf16), w3_ref[...], preferred_element_type=f32)

    # ---- residual ----
    x_intr = x_intr + b3_ref[...] + x

    # ---- fused first layer of the three heads: one (TB, D) @ (D, 3D) pass ----
    hh = jnp.dot(x_intr.astype(bf16), wh1_ref[...], preferred_element_type=f32)
    hh = jnp.maximum(hh + bh1_ref[...], 0.0).astype(bf16)

    # ---- second layer per head (independent inputs -> 3 narrow dots) ----
    m = jnp.dot(hh[:, 0 * D:1 * D], wh2_ref[0], preferred_element_type=f32) + bh2_ref[0:1, :]
    a = jnp.dot(hh[:, 1 * D:2 * D], wh2_ref[1], preferred_element_type=f32) + bh2_ref[1:2, :]
    b = jnp.dot(hh[:, 2 * D:3 * D], wh2_ref[2], preferred_element_type=f32) + bh2_ref[2:3, :]

    mu_ref[...] = m                          # block_mu ends without ReLU
    alpha_ref[...] = jnp.maximum(a, 0.0)     # block_alpha ends with ReLU
    beta_ref[...] = jnp.maximum(b, 0.0)      # block_beta ends with ReLU


# ------------------------------- wrapper -------------------------------------
@functools.partial(jax.jit, static_argnames=("block_b",))
def bayescap_forward(x, packed, *, block_b=256):
    """x: (B, D) f32. packed: dict produced by pack_params()."""
    B, D = x.shape
    Hp = packed["w1"].shape[1]

    TB = min(block_b, _round_up(B, 8))
    Bp = _round_up(B, TB)
    if Bp != B:
        x = jnp.pad(x, ((0, Bp - B), (0, 0)))

    grid = (Bp // TB,)

    row = lambda i: (i, 0)
    const2 = lambda i: (0, 0)
    const3 = lambda i: (0, 0, 0)

    in_specs = [
        pl.BlockSpec((TB, D), row),          # x            (pipelined per batch tile)
        pl.BlockSpec((D, Hp), const2),       # w1           (VMEM-resident across grid)
        pl.BlockSpec((Hp, Hp), const2),      # w2
        pl.BlockSpec((Hp, D), const2),       # w3
        pl.BlockSpec((2, Hp), const2),       # b12
        pl.BlockSpec((1, D), const2),        # b3
        pl.BlockSpec((D, 3 * D), const2),    # wh1 (fused head layer-1 weights)
        pl.BlockSpec((1, 3 * D), const2),    # bh1
        pl.BlockSpec((3, D, D), const3),     # wh2 (stacked head layer-2 weights)
        pl.BlockSpec((3, D), const2),        # bh2
    ]
    out_specs = (
        pl.BlockSpec((TB, D), row),
        pl.BlockSpec((TB, D), row),
        pl.BlockSpec((TB, D), row),
    )
    out_shape = tuple(jax.ShapeDtypeStruct((Bp, D), jnp.float32) for _ in range(3))

    flops = 2 * Bp * (2 * D * Hp + Hp * Hp + 6 * D * D)
    bytes_w = sum(
        int(np.prod(packed[k].shape)) * packed[k].dtype.itemsize
        for k in ("w1", "w2", "w3", "b12", "b3", "wh1", "bh1", "wh2", "bh2")
    )
    bytes_accessed = bytes_w + Bp * D * 4 + 3 * Bp * D * 4

    mu, alpha, beta = pl.pallas_call(
        _bayescap_fwd_kernel,
        out_shape=out_shape,
        grid=grid,
        in_specs=in_specs,
        out_specs=out_specs,
        compiler_params=pltpu.CompilerParams(
            dimension_semantics=("parallel",),      # batch tiles are independent (v7x: 2 TCs)
            vmem_limit_bytes=64 * 1024 * 1024,      # explicit; safe on v5e/v6e/v7x
        ),
        cost_estimate=pl.CostEstimate(
            flops=flops, transcendentals=0, bytes_accessed=bytes_accessed
        ),
    )(
        x,
        packed["w1"], packed["w2"], packed["w3"],
        packed["b12"], packed["b3"],
        packed["wh1"], packed["bh1"], packed["wh2"], packed["bh2"],
    )

    if Bp != B:
        mu, alpha, beta = mu[:B], alpha[:B], beta[:B]
    return mu, alpha, beta


# ----------------------- deterministic parameter setup -----------------------
def make_params(key, inp_dim, out_dim, hid_dim, prior_mu=0.5, prior_sigma=0.1):
    """Deterministic synthetic params. BayesLinear weights sampled once:
    W = W_mu + exp(W_log_sigma) * eps (fixed seed)."""
    keys = iter(jax.random.split(key, 64))

    def linear(in_f, out_f, scale=0.05):
        w = scale * jax.random.normal(next(keys), (in_f, out_f), jnp.float32)
        b = scale * jax.random.normal(next(keys), (1, out_f), jnp.float32)
        return w, b

    def bayes_linear(in_f, out_f):
        w_mu = prior_mu * 0.02 * jax.random.normal(next(keys), (in_f, out_f), jnp.float32)
        w_log_sigma = jnp.log(prior_sigma) + 0.01 * jax.random.normal(
            next(keys), (in_f, out_f), jnp.float32
        )
        b_mu = prior_mu * 0.02 * jax.random.normal(next(keys), (1, out_f), jnp.float32)
        b_log_sigma = jnp.log(prior_sigma) + 0.01 * jax.random.normal(
            next(keys), (1, out_f), jnp.float32
        )
        w_eps = jax.random.normal(next(keys), (in_f, out_f), jnp.float32)
        b_eps = jax.random.normal(next(keys), (1, out_f), jnp.float32)
        w = w_mu + jnp.exp(w_log_sigma) * w_eps * 0.05
        b = b_mu + jnp.exp(b_log_sigma) * b_eps * 0.05
        return w, b

    p = {}
    p["w1"], p["b1"] = bayes_linear(inp_dim, hid_dim)
    p["w2"], p["b2"] = bayes_linear(hid_dim, hid_dim)
    p["w3"], p["b3"] = bayes_linear(hid_dim, out_dim)
    p["wm1"], p["bm1"] = linear(out_dim, out_dim)
    p["wm2"], p["bm2"] = linear(out_dim, out_dim)
    p["wa1"], p["ba1"] = linear(out_dim, out_dim)
    p["wa2"], p["ba2"] = linear(out_dim, out_dim)
    p["wb1"], p["bb1"] = linear(out_dim, out_dim)
    p["wb2"], p["bb2"] = linear(out_dim, out_dim)
    return p


def pack_params(p, D, H):
    """Pad hidden dim to a lane-friendly multiple of 128, fuse/stack head weights,
    pack biases, and cast weights to bf16 (biases stay f32)."""
    f32, bf16 = jnp.float32, jnp.bfloat16
    Hp = _round_up(H, 128)

    def pad_to(w, rows, cols):
        out = jnp.zeros((rows, cols), f32)
        return out.at[: w.shape[0], : w.shape[1]].set(w)

    packed = {}
    packed["w1"] = pad_to(p["w1"], D, Hp).astype(bf16)
    packed["w2"] = pad_to(p["w2"], Hp, Hp).astype(bf16)
    packed["w3"] = pad_to(p["w3"], Hp, D).astype(bf16)
    packed["b12"] = jnp.concatenate(
        [pad_to(p["b1"], 1, Hp), pad_to(p["b2"], 1, Hp)], axis=0
    )                                                                     # (2, Hp) f32
    packed["b3"] = p["b3"]                                                # (1, D)  f32
    packed["wh1"] = jnp.concatenate(
        [p["wm1"], p["wa1"], p["wb1"]], axis=1
    ).astype(bf16)                                                        # (D, 3D) bf16
    packed["bh1"] = jnp.concatenate([p["bm1"], p["ba1"], p["bb1"]], axis=1)  # (1, 3D)
    packed["wh2"] = jnp.stack([p["wm2"], p["wa2"], p["wb2"]], axis=0).astype(bf16)  # (3,D,D)
    packed["bh2"] = jnp.concatenate([p["bm2"], p["ba2"], p["bb2"]], axis=0)  # (3, D)
    return packed


# ------------------------------ pure-JAX reference ---------------------------
def reference_forward(x, packed):
    """f32 reference using the same (bf16-quantized, padded) weights; differences vs the
    kernel come only from bf16 activation rounding on the MXU path."""
    f32 = jnp.float32
    relu = lambda v: jnp.maximum(v, 0.0)
    D = x.shape[1]
    w1, w2, w3 = (packed[k].astype(f32) for k in ("w1", "w2", "w3"))
    b1, b2 = packed["b12"][0:1, :], packed["b12"][1:2, :]
    b3 = packed["b3"]
    wh1, bh1 = packed["wh1"].astype(f32), packed["bh1"]
    wh2, bh2 = packed["wh2"].astype(f32), packed["bh2"]

    h = relu(x @ w1 + b1)
    h = relu(h @ w2 + b2)
    x_intr = h @ w3 + b3 + x
    hh = relu(x_intr @ wh1 + bh1)
    mu = hh[:, 0:D] @ wh2[0] + bh2[0:1, :]
    alpha = relu(hh[:, D:2 * D] @ wh2[1] + bh2[1:2, :])
    beta = relu(hh[:, 2 * D:3 * D] @ wh2[2] + bh2[2:3, :])
    return mu, alpha, beta


if __name__ == "__main__":
    # Small but pipeline-exercising demo: B=512 -> 2 batch tiles of TB=256.
    B, D, H = 512, 128, 64   # batch, inp_dim == out_dim, hid_dim (num_layers = 3)

    key = jax.random.PRNGKey(0)
    kx, kp = jax.random.split(key)
    x = jax.random.normal(kx, (B, D), jnp.float32)
    raw_params = make_params(kp, inp_dim=D, out_dim=D, hid_dim=H)
    packed = pack_params(raw_params, D=D, H=H)

    mu, alpha, beta = bayescap_forward(x, packed, block_b=256)
    jax.block_until_ready((mu, alpha, beta))

    mu_r, alpha_r, beta_r = reference_forward(x, packed)
    np.testing.assert_allclose(np.asarray(mu), np.asarray(mu_r), rtol=2e-2, atol=2e-2)
    np.testing.assert_allclose(np.asarray(alpha), np.asarray(alpha_r), rtol=2e-2, atol=2e-2)
    np.testing.assert_allclose(np.asarray(beta), np.asarray(beta_r), rtol=2e-2, atol=2e-2)

    print("KERNEL_OK")
</pallas_src>

<mosaic_0001>
module attributes {stable_mosaic.version = 11 : i64} {
  func.func @_bayescap_fwd_kernel(%arg0: i32, %arg1: memref<256x128xf32, #tpu.memory_space<vmem>>, %arg2: memref<128x128xbf16, #tpu.memory_space<vmem>>, %arg3: memref<128x128xbf16, #tpu.memory_space<vmem>>, %arg4: memref<128x128xbf16, #tpu.memory_space<vmem>>, %arg5: memref<2x128xf32, #tpu.memory_space<vmem>>, %arg6: memref<1x128xf32, #tpu.memory_space<vmem>>, %arg7: memref<128x384xbf16, #tpu.memory_space<vmem>>, %arg8: memref<1x384xf32, #tpu.memory_space<vmem>>, %arg9: memref<3x128x128xbf16, #tpu.memory_space<vmem>>, %arg10: memref<3x128xf32, #tpu.memory_space<vmem>>, %arg11: memref<256x128xf32, #tpu.memory_space<vmem>>, %arg12: memref<256x128xf32, #tpu.memory_space<vmem>>, %arg13: memref<256x128xf32, #tpu.memory_space<vmem>>) attributes {dimension_semantics = [#tpu.dimension_semantics<parallel>], iteration_bounds = array<i64: 2>, scalar_prefetch = 0 : i64, scratch_operands = 0 : i64, tpu.core_type = #tpu.core_type<tc>, window_params = [{transform_indices = @transform_0, window_bounds = array<i64: 256, 128>}, {pipeline_mode = #tpu.pipeline_mode<synchronous>, transform_indices = @transform_1, window_bounds = array<i64: 128, 128>}, {pipeline_mode = #tpu.pipeline_mode<synchronous>, transform_indices = @transform_2, window_bounds = array<i64: 128, 128>}, {pipeline_mode = #tpu.pipeline_mode<synchronous>, transform_indices = @transform_3, window_bounds = array<i64: 128, 128>}, {pipeline_mode = #tpu.pipeline_mode<synchronous>, transform_indices = @transform_4, window_bounds = array<i64: 2, 128>}, {pipeline_mode = #tpu.pipeline_mode<synchronous>, transform_indices = @transform_5, window_bounds = array<i64: 1, 128>}, {pipeline_mode = #tpu.pipeline_mode<synchronous>, transform_indices = @transform_6, window_bounds = array<i64: 128, 384>}, {pipeline_mode = #tpu.pipeline_mode<synchronous>, transform_indices = @transform_7, window_bounds = array<i64: 1, 384>}, {pipeline_mode = #tpu.pipeline_mode<synchronous>, transform_indices = @transform_8, window_bounds = array<i64: 3, 128, 128>}, {pipeline_mode = #tpu.pipeline_mode<synchronous>, transform_indices = @transform_9, window_bounds = array<i64: 3, 128>}, {transform_indices = @transform_10, window_bounds = array<i64: 256, 128>}, {transform_indices = @transform_11, window_bounds = array<i64: 256, 128>}, {transform_indices = @transform_12, window_bounds = array<i64: 256, 128>}]} {
    %c0 = arith.constant 0 : index
    %c0_0 = arith.constant 0 : index
    %0 = vector.load %arg1[%c0, %c0_0] : memref<256x128xf32, #tpu.memory_space<vmem>>, vector<256x128xf32>
    %1 = arith.truncf %0 : vector<256x128xf32> to vector<256x128xbf16>
    %c0_1 = arith.constant 0 : index
    %c0_2 = arith.constant 0 : index
    %2 = vector.load %arg2[%c0_1, %c0_2] : memref<128x128xbf16, #tpu.memory_space<vmem>>, vector<128x128xbf16>
    %cst = arith.constant dense<0.000000e+00> : vector<256x128xf32>
    %3 = tpu.matmul %1, %2, %cst {dimension_numbers = #tpu.dot_dimension_numbers<[1], [0], [0], [1], [0, 0, 1, 1], [], []>} : vector<256x128xbf16>, vector<128x128xbf16>, vector<256x128xf32> -> vector<256x128xf32>
    %c0_3 = arith.constant 0 : index
    %c0_4 = arith.constant 0 : index
    %4 = vector.load %arg5[%c0_3, %c0_4] : memref<2x128xf32, #tpu.memory_space<vmem>>, vector<1x128xf32>
    %5 = vector.broadcast %4 : vector<1x128xf32> to vector<256x128xf32>
    %6 = arith.addf %3, %5 : vector<256x128xf32>
    %cst_5 = arith.constant 0.000000e+00 : f32
    %7 = vector.broadcast %cst_5 : f32 to vector<256x128xf32>
    %8 = arith.maximumf %6, %7 : vector<256x128xf32>
    %9 = arith.truncf %8 : vector<256x128xf32> to vector<256x128xbf16>
    %c0_6 = arith.constant 0 : index
    %c0_7 = arith.constant 0 : index
    %10 = vector.load %arg3[%c0_6, %c0_7] : memref<128x128xbf16, #tpu.memory_space<vmem>>, vector<128x128xbf16>
    %cst_8 = arith.constant dense<0.000000e+00> : vector<256x128xf32>
    %11 = tpu.matmul %9, %10, %cst_8 {dimension_numbers = #tpu.dot_dimension_numbers<[1], [0], [0], [1], [0, 0, 1, 1], [], []>} : vector<256x128xbf16>, vector<128x128xbf16>, vector<256x128xf32> -> vector<256x128xf32>
    %c1 = arith.constant 1 : index
    %c0_9 = arith.constant 0 : index
    %12 = vector.load %arg5[%c1, %c0_9] : memref<2x128xf32, #tpu.memory_space<vmem>>, vector<1x128xf32>
    %13 = vector.broadcast %12 : vector<1x128xf32> to vector<256x128xf32>
    %14 = arith.addf %11, %13 : vector<256x128xf32>
    %cst_10 = arith.constant 0.000000e+00 : f32
    %15 = vector.broadcast %cst_10 : f32 to vector<256x128xf32>
    %16 = arith.maximumf %14, %15 : vector<256x128xf32>
    %17 = arith.truncf %16 : vector<256x128xf32> to vector<256x128xbf16>
    %c0_11 = arith.constant 0 : index
    %c0_12 = arith.constant 0 : index
    %18 = vector.load %arg4[%c0_11, %c0_12] : memref<128x128xbf16, #tpu.memory_space<vmem>>, vector<128x128xbf16>
    %cst_13 = arith.constant dense<0.000000e+00> : vector<256x128xf32>
    %19 = tpu.matmul %17, %18, %cst_13 {dimension_numbers = #tpu.dot_dimension_numbers<[1], [0], [0], [1], [0, 0, 1, 1], [], []>} : vector<256x128xbf16>, vector<128x128xbf16>, vector<256x128xf32> -> vector<256x128xf32>
    %c0_14 = arith.constant 0 : index
    %c0_15 = arith.constant 0 : index
    %20 = vector.load %arg6[%c0_14, %c0_15] : memref<1x128xf32, #tpu.memory_space<vmem>>, vector<1x128xf32>
    %21 = vector.broadcast %20 : vector<1x128xf32> to vector<256x128xf32>
    %22 = arith.addf %19, %21 : vector<256x128xf32>
    %23 = arith.addf %22, %0 : vector<256x128xf32>
    %24 = arith.truncf %23 : vector<256x128xf32> to vector<256x128xbf16>
    %c0_16 = arith.constant 0 : index
    %c0_17 = arith.constant 0 : index
    %25 = vector.load %arg7[%c0_16, %c0_17] : memref<128x384xbf16, #tpu.memory_space<vmem>>, vector<128x384xbf16>
    %cst_18 = arith.constant dense<0.000000e+00> : vector<256x384xf32>
    %26 = tpu.matmul %24, %25, %cst_18 {dimension_numbers = #tpu.dot_dimension_numbers<[1], [0], [0], [1], [0, 0, 1, 1], [], []>} : vector<256x128xbf16>, vector<128x384xbf16>, vector<256x384xf32> -> vector<256x384xf32>
    %c0_19 = arith.constant 0 : index
    %c0_20 = arith.constant 0 : index
    %27 = vector.load %arg8[%c0_19, %c0_20] : memref<1x384xf32, #tpu.memory_space<vmem>>, vector<1x384xf32>
    %28 = vector.broadcast %27 : vector<1x384xf32> to vector<256x384xf32>
    %29 = arith.addf %26, %28 : vector<256x384xf32>
    %cst_21 = arith.constant 0.000000e+00 : f32
    %30 = vector.broadcast %cst_21 : f32 to vector<256x384xf32>
    %31 = arith.maximumf %29, %30 : vector<256x384xf32>
    %32 = arith.truncf %31 : vector<256x384xf32> to vector<256x384xbf16>
    %33 = vector.extract_strided_slice %32 {offsets = [0, 0], sizes = [256, 128], strides = [1, 1]} : vector<256x384xbf16> to vector<256x128xbf16>
    %c0_22 = arith.constant 0 : index
    %c0_23 = arith.constant 0 : index
    %c0_24 = arith.constant 0 : index
    %34 = vector.load %arg9[%c0_22, %c0_23, %c0_24] : memref<3x128x128xbf16, #tpu.memory_space<vmem>>, vector<1x128x128xbf16>
    %35 = vector.shape_cast %34 : vector<1x128x128xbf16> to vector<128x128xbf16>
    %cst_25 = arith.constant dense<0.000000e+00> : vector<256x128xf32>
    %36 = tpu.matmul %33, %35, %cst_25 {dimension_numbers = #tpu.dot_dimension_numbers<[1], [0], [0], [1], [0, 0, 1, 1], [], []>} : vector<256x128xbf16>, vector<128x128xbf16>, vector<256x128xf32> -> vector<256x128xf32>
    %c0_26 = arith.constant 0 : index
    %c0_27 = arith.constant 0 : index
    %37 = vector.load %arg10[%c0_26, %c0_27] : memref<3x128xf32, #tpu.memory_space<vmem>>, vector<1x128xf32>
    %38 = vector.broadcast %37 : vector<1x128xf32> to vector<256x128xf32>
    %39 = arith.addf %36, %38 : vector<256x128xf32>
    %40 = vector.extract_strided_slice %32 {offsets = [0, 128], sizes = [256, 128], strides = [1, 1]} : vector<256x384xbf16> to vector<256x128xbf16>
    %c1_28 = arith.constant 1 : index
    %c0_29 = arith.constant 0 : index
    %c0_30 = arith.constant 0 : index
    %41 = vector.load %arg9[%c1_28, %c0_29, %c0_30] : memref<3x128x128xbf16, #tpu.memory_space<vmem>>, vector<1x128x128xbf16>
    %42 = vector.shape_cast %41 : vector<1x128x128xbf16> to vector<128x128xbf16>
    %cst_31 = arith.constant dense<0.000000e+00> : vector<256x128xf32>
    %43 = tpu.matmul %40, %42, %cst_31 {dimension_numbers = #tpu.dot_dimension_numbers<[1], [0], [0], [1], [0, 0, 1, 1], [], []>} : vector<256x128xbf16>, vector<128x128xbf16>, vector<256x128xf32> -> vector<256x128xf32>
    %c1_32 = arith.constant 1 : index
    %c0_33 = arith.constant 0 : index
    %44 = vector.load %arg10[%c1_32, %c0_33] : memref<3x128xf32, #tpu.memory_space<vmem>>, vector<1x128xf32>
    %45 = vector.broadcast %44 : vector<1x128xf32> to vector<256x128xf32>
    %46 = arith.addf %43, %45 : vector<256x128xf32>
    %47 = vector.extract_strided_slice %32 {offsets = [0, 256], sizes = [256, 128], strides = [1, 1]} : vector<256x384xbf16> to vector<256x128xbf16>
    %c2 = arith.constant 2 : index
    %c0_34 = arith.constant 0 : index
    %c0_35 = arith.constant 0 : index
    %48 = vector.load %arg9[%c2, %c0_34, %c0_35] : memref<3x128x128xbf16, #tpu.memory_space<vmem>>, vector<1x128x128xbf16>
    %49 = vector.shape_cast %48 : vector<1x128x128xbf16> to vector<128x128xbf16>
    %cst_36 = arith.constant dense<0.000000e+00> : vector<256x128xf32>
    %50 = tpu.matmul %47, %49, %cst_36 {dimension_numbers = #tpu.dot_dimension_numbers<[1], [0], [0], [1], [0, 0, 1, 1], [], []>} : vector<256x128xbf16>, vector<128x128xbf16>, vector<256x128xf32> -> vector<256x128xf32>
    %c2_37 = arith.constant 2 : index
    %c0_38 = arith.constant 0 : index
    %51 = vector.load %arg10[%c2_37, %c0_38] : memref<3x128xf32, #tpu.memory_space<vmem>>, vector<1x128xf32>
    %52 = vector.broadcast %51 : vector<1x128xf32> to vector<256x128xf32>
    %53 = arith.addf %50, %52 : vector<256x128xf32>
    %c0_39 = arith.constant 0 : index
    %c0_40 = arith.constant 0 : index
    %54 = vector.load %arg11[%c0_39, %c0_40] : memref<256x128xf32, #tpu.memory_space<vmem>>, vector<256x128xf32>
    tpu.vector_store %arg11[%c0_39, %c0_40], %39 {strides = array<i32>} : memref<256x128xf32, #tpu.memory_space<vmem>>, vector<256x128xf32>,
    %cst_41 = arith.constant 0.000000e+00 : f32
    %55 = vector.broadcast %cst_41 : f32 to vector<256x128xf32>
    %56 = arith.maximumf %46, %55 : vector<256x128xf32>
    %c0_42 = arith.constant 0 : index
    %c0_43 = arith.constant 0 : index
    %57 = vector.load %arg12[%c0_42, %c0_43] : memref<256x128xf32, #tpu.memory_space<vmem>>, vector<256x128xf32>
    tpu.vector_store %arg12[%c0_42, %c0_43], %56 {strides = array<i32>} : memref<256x128xf32, #tpu.memory_space<vmem>>, vector<256x128xf32>,
    %cst_44 = arith.constant 0.000000e+00 : f32
    %58 = vector.broadcast %cst_44 : f32 to vector<256x128xf32>
    %59 = arith.maximumf %53, %58 : vector<256x128xf32>
    %c0_45 = arith.constant 0 : index
    %c0_46 = arith.constant 0 : index
    %60 = vector.load %arg13[%c0_45, %c0_46] : memref<256x128xf32, #tpu.memory_space<vmem>>, vector<256x128xf32>
    tpu.vector_store %arg13[%c0_45, %c0_46], %59 {strides = array<i32>} : memref<256x128xf32, #tpu.memory_space<vmem>>, vector<256x128xf32>,
    return
  }
  func.func @transform_0(%arg0: i32) -> (i32, i32) {
    %c0_i32 = arith.constant 0 : i32
    %c0_i32_0 = arith.constant 0 : i32
    return %arg0, %c0_i32 : i32, i32
  }
  func.func @transform_1(%arg0: i32) -> (i32, i32) {
    %c0_i32 = arith.constant 0 : i32
    %c0_i32_0 = arith.constant 0 : i32
    %c0_i32_1 = arith.constant 0 : i32
    return %c0_i32, %c0_i32_0 : i32, i32
  }
  func.func @transform_2(%arg0: i32) -> (i32, i32) {
    %c0_i32 = arith.constant 0 : i32
    %c0_i32_0 = arith.constant 0 : i32
    %c0_i32_1 = arith.constant 0 : i32
    return %c0_i32, %c0_i32_0 : i32, i32
  }
  func.func @transform_3(%arg0: i32) -> (i32, i32) {
    %c0_i32 = arith.constant 0 : i32
    %c0_i32_0 = arith.constant 0 : i32
    %c0_i32_1 = arith.constant 0 : i32
    return %c0_i32, %c0_i32_0 : i32, i32
  }
  func.func @transform_4(%arg0: i32) -> (i32, i32) {
    %c0_i32 = arith.constant 0 : i32
    %c0_i32_0 = arith.constant 0 : i32
    %c0_i32_1 = arith.constant 0 : i32
    return %c0_i32, %c0_i32_0 : i32, i32
  }
  func.func @transform_5(%arg0: i32) -> (i32, i32) {
    %c0_i32 = arith.constant 0 : i32
    %c0_i32_0 = arith.constant 0 : i32
    %c0_i32_1 = arith.constant 0 : i32
    return %c0_i32, %c0_i32_0 : i32, i32
  }
  func.func @transform_6(%arg0: i32) -> (i32, i32) {
    %c0_i32 = arith.constant 0 : i32
    %c0_i32_0 = arith.constant 0 : i32
    %c0_i32_1 = arith.constant 0 : i32
    return %c0_i32, %c0_i32_0 : i32, i32
  }
  func.func @transform_7(%arg0: i32) -> (i32, i32) {
    %c0_i32 = arith.constant 0 : i32
    %c0_i32_0 = arith.constant 0 : i32
    %c0_i32_1 = arith.constant 0 : i32
    return %c0_i32, %c0_i32_0 : i32, i32
  }
  func.func @transform_8(%arg0: i32) -> (i32, i32, i32) {
    %c0_i32 = arith.constant 0 : i32
    %c0_i32_0 = arith.constant 0 : i32
    %c0_i32_1 = arith.constant 0 : i32
    %c0_i32_2 = arith.constant 0 : i32
    return %c0_i32, %c0_i32_0, %c0_i32_1 : i32, i32, i32
  }
  func.func @transform_9(%arg0: i32) -> (i32, i32) {
    %c0_i32 = arith.constant 0 : i32
    %c0_i32_0 = arith.constant 0 : i32
    %c0_i32_1 = arith.constant 0 : i32
    return %c0_i32, %c0_i32_0 : i32, i32
  }
  func.func @transform_10(%arg0: i32) -> (i32, i32) {
    %c0_i32 = arith.constant 0 : i32
    %c0_i32_0 = arith.constant 0 : i32
    return %arg0, %c0_i32 : i32, i32
  }
  func.func @transform_11(%arg0: i32) -> (i32, i32) {
    %c0_i32 = arith.constant 0 : i32
    %c0_i32_0 = arith.constant 0 : i32
    return %arg0, %c0_i32 : i32, i32
  }
  func.func @transform_12(%arg0: i32) -> (i32, i32) {
    %c0_i32 = arith.constant 0 : i32
    %c0_i32_0 = arith.constant 0 : i32
    return %arg0, %c0_i32 : i32, i32
  }
}

</mosaic_0001>

<bundles_post_ra>
// kernel: bayescap_forward.1
= control target key start
LH: loop header
LB: loop body
LE: loop exit
PB: predicated region body
PF: predicated region fallthrough
CT: control target
= control target key end

     0   :  { %s5759_s0 = inlined_call_operand.hbm [shape: f32[512,128], index: 0, kind: input, shape index: {}]   ;;  %s5760_s1 = inlined_call_operand.hbm [shape: bf16[128,128], index: 1, kind: input, shape index: {}]   ;;  %s5761_s2 = inlined_call_operand.hbm [shape: bf16[128,128], index: 2, kind: input, shape index: {}]   ;;  %s5762_s3 = inlined_call_operand.hbm [shape: bf16[128,128], index: 3, kind: input, shape index: {}]   ;;  %s5763_s4 = inlined_call_operand.hbm [shape: f32[2,128], index: 4, kind: input, shape index: {}]   ;;  %s5764_s5 = inlined_call_operand.hbm [shape: f32[1,128], index: 5, kind: input, shape index: {}]   ;;  %s5765_s6 = inlined_call_operand.hbm [shape: bf16[128,384], index: 6, kind: input, shape index: {}]   ;;  %s5766_s7 = inlined_call_operand.hbm [shape: f32[1,384], index: 7, kind: input, shape index: {}]   ;;  %s5767_s8 = inlined_call_operand.hbm [shape: bf16[3,128,128], index: 8, kind: input, shape index: {}]   ;;  %s5768_s9 = inlined_call_operand.hbm [shape: f32[3,128], index: 9, kind: input, shape index: {}]   ;;  %s5769_s10 = inlined_call_operand.hbm [shape: f32[512,128], index: 10, kind: output, shape index: {0}]   ;;  %s5770_s11 = inlined_call_operand.hbm [shape: f32[512,128], index: 11, kind: output, shape index: {1}]   ;;  %s5771_s12 = inlined_call_operand.hbm [shape: f32[512,128], index: 12, kind: output, shape index: {2}]  }
   0x1   :  { %5783 = sst [smem:[#allocation32_spill]] %s5759_s0 }
   0x2   :  { %5784 = sst [smem:[#allocation33_spill]] %s5760_s1 }
   0x3   :  { %5785 = sst [smem:[#allocation34_spill]] %s5761_s2 }
   0x4   :  { %5786 = sst [smem:[#allocation35_spill]] %s5762_s3 }
   0x5   :  { %5787 = sst [smem:[#allocation36_spill]] %s5763_s4 }
   0x6   :  { %5788 = sst [smem:[#allocation37_spill]] %s5764_s5 }
   0x7   :  { %5789 = sst [smem:[#allocation38_spill]] %s5769_s10 }
   0x8   :  { %5790 = sst [smem:[#allocation39_spill]] %s5770_s11 }
   0x9   :  { %5791 = sst [smem:[#allocation40_spill]] %s5771_s12 }
   0xa   :  { %18 = vsyncpa [#allocation3], 0 }
   0xb   :  { %20 = vsyncpa [#allocation3 + $0x1], 0 }
   0xc   :  { %21 = vsyncpa [#allocation6], 0 }
   0xd   :  { %22 = vsyncpa [#allocation9], 0 }
   0xe   :  { %23 = vsyncpa [#allocation12], 0 }
   0xf   :  { %24 = vsyncpa [#allocation15], 0 }
  0x10   :  { %25 = vsyncpa [#allocation18], 0 }
  0x11   :  { %26 = vsyncpa [#allocation4], 0 }
  0x12   :  { %28 = vsyncpa [#allocation4 + $0x1], 0 }
  0x13   :  { %29 = vsyncpa [#allocation21], 0 }
  0x14   :  { %31 = vsyncpa [#allocation21 + $0x1], 0  ;;  %s4688_s21 = smov 0   ;;  %s4690_s22 = smov 0  }
  0x15   :  { %s4692_s23 = smov 0   ;;  %s4694_s24 = smov 0  }
  0x16 LB: > { %s4601_s25 = smov [#allocation5]   ;;  %s4709_s27 = sadd.s32 4294967295, %s4599_s24   ;;  %s4599_s24 = sphi %s4694_s24, %s5833_s24   ;;  %s4595_s23 = sphi %s4692_s23, %s5832_s23   ;;  %s4591_s22 = sphi %s4690_s22, %s5831_s22   ;;  %s4587_s21 = sphi %s4688_s21, %s5830_s21  }
  0x17   : > { %s347_s26 = sshll.u32 %s4601_s25, 4  ;;  %p3266_p0 = scmp.ge.s32.totalorder %s4599_s24, 1  ;;  %s4714_s26 = int_to_ptr.vmem [resolvable:$true] %s347_s26 }
  0x18   : > { %p5778_p1 = scmp.eq.s32.totalorder %s4709_s27, 0  ;;  %p335_p2 = scmp.lt.s32.totalorder %s4599_s24, 3 }
  0x19   : > { %s4602_s29 = smov [#allocation8]   ;;  %s4603_s14 = smov [#allocation11]  }
  0x1a   : > { %p4716_p3 = pnand %p3266_p0, %p335_p2  ;;  %s373_s30 = sshll.u32 %s4602_s29, 4  ;;  %s4729_s30 = int_to_ptr.vmem [resolvable:$true] %s373_s30 }
  0x1b   : > { %s398_s15 = sshll.u32 %s4603_s14, 4  ;;  %s5795_s1 = sld [smem:[#allocation33_spill]]  ;;  %s4731_s15 = int_to_ptr.vmem [resolvable:$true] %s398_s15 }
  0x1c   : > { %s5792_s28 = scalar_select %p4716_p3, 1, 0 }
  0x1d   : > { %p3951_p5 = pneg %p4716_p3 }
  0x1e   : > { %5793 = sst [smem:[#allocation31_spill]] %s5792_s28 }
  0x1f   : > { %p4725_p6 = pnand %p3951_p5, %p5778_p1 }
  0x21   : > { %s4171_s18 = scalar_lea.hbm %s5795_s1, 1024  ;;  %p4741_p8 = pneg %p4725_p6 }
  0x22   : > { %p4172_p7 = scmp.ne.s32.totalorder %s5795_s1, %s4171_s18  ;;  %p4178_p11 = scmp.lt.u32.totalorder %s4171_s18, %s5795_s1 }
  0x24   : > { %p4174_p9 = pnand %p4741_p8, %p4172_p7 }
  0x26   : > { %p4175_p10 = pneg %p4174_p9 }
  0x28   : > { %p4180_p12 = pnand %p4178_p11, %p4175_p10 }
  0x2a   : > { %4183 = shalt.err (!%p4180_p12)
}
  0x2b   : > { %s4184_s16 = scalar_lea.vmem %s4714_s26, 1024  ;;  %p4192_p5 = scmp.lt.s32.totalorder %s4714_s26, %s4714_s26 }
  0x2c   : > { %p4185_p13 = scmp.ne.s32.totalorder %s4714_s26, %s4184_s16  ;;  %p4193_p4 = scmp.lt.s32.totalorder %s4184_s16, %s4184_s16 }
  0x2e   : > { %p4187_p0 = pnand %p4185_p13, %p4741_p8  ;;  %p4194_p7 = por %p4193_p4, %p4192_p5 }
  0x30   : > { %p4188_p2 = pneg %p4187_p0 }
  0x32   : > { %p4195_p9 = pnand %p4194_p7, %p4188_p2 }
  0x34   : > { %4198 = shalt.err (!%p4195_p9)
}
  0x35   : > { %s5776_s17 = smov 64   ;;  %s5780_s18 = smov 4  }
  0x36   : > { %3954 = dma.hbm_to_vmem [thread:$0]  (!%p4725_p6), %s5795_s1, 1024, %s4714_s26, [#allocation6], %s5776_s17, %s5776_s17, %s5780_s18  }
  0x37   : > { %s5797_s3 = sld [smem:[#allocation35_spill]] }
  0x3d   : > { %s4199_s16 = scalar_lea.hbm %s5797_s3, 1024 }
  0x3e   : > { %p4200_p4 = scmp.ne.s32.totalorder %s5797_s3, %s4199_s16  ;;  %p4206_p12 = scmp.lt.u32.totalorder %s4199_s16, %s5797_s3 }
  0x40   : > { %p4202_p10 = pnand %p4200_p4, %p4741_p8 }
  0x42   : > { %p4203_p11 = pneg %p4202_p10 }
  0x44   : > { %p4208_p13 = pnand %p4206_p12, %p4203_p11 }
  0x46   : > { %4211 = shalt.err (!%p4208_p13)
}
  0x47   : > { %s4212_s26 = scalar_lea.vmem %s4729_s30, 1024  ;;  %p4220_p7 = scmp.lt.s32.totalorder %s4729_s30, %s4729_s30 }
  0x48   : > { %p4213_p0 = scmp.ne.s32.totalorder %s4729_s30, %s4212_s26  ;;  %p4221_p9 = scmp.lt.s32.totalorder %s4212_s26, %s4212_s26 }
  0x4a   : > { %p4215_p2 = pnand %p4213_p0, %p4741_p8  ;;  %p4222_p4 = por %p4221_p9, %p4220_p7 }
  0x4c   : > { %p4216_p5 = pneg %p4215_p2 }
  0x4e   : > { %p4223_p10 = pnand %p4222_p4, %p4216_p5 }
  0x50   : > { %4226 = shalt.err (!%p4223_p10)
}
  0x51   : > { %3960 = dma.hbm_to_vmem [thread:$0]  (!%p4725_p6), %s5797_s3, 1024, %s4729_s30, [#allocation9], %s5776_s17, %s5776_s17, %s5780_s18  }
  0x52   : > { %s5798_s5 = sld [smem:[#allocation37_spill]] }
  0x58   : > { %s4227_s19 = scalar_lea.hbm %s5798_s5, 16 }
  0x59   : > { %p4228_p11 = scmp.ne.s32.totalorder %s5798_s5, %s4227_s19  ;;  %p4234_p0 = scmp.lt.u32.totalorder %s4227_s19, %s5798_s5 }
  0x5b   : > { %p4230_p12 = pnand %p4228_p11, %p4741_p8 }
  0x5d   : > { %p4231_p13 = pneg %p4230_p12 }
  0x5f   : > { %p4236_p2 = pnand %p4234_p0, %p4231_p13 }
  0x61   : > { %4239 = shalt.err (!%p4236_p2)
}
  0x62   : > { %s4240_s30 = scalar_lea.vmem %s4731_s15, 16  ;;  %s4247_s26 = scalar_lea.vmem %s4731_s15, 32 }
  0x63   : > { %p4241_p5 = scmp.ne.s32.totalorder %s4731_s15, %s4240_s30  ;;  %p4248_p4 = scmp.lt.s32.totalorder %s4731_s15, %s4731_s15 }
  0x64   : > { %p4249_p10 = scmp.lt.s32.totalorder %s4247_s26, %s4240_s30 }
  0x65   : > { %p4243_p7 = pnand %p4241_p5, %p4741_p8 }
  0x66   : > { %p4250_p11 = por %p4249_p10, %p4248_p4 }
  0x67   : > { %p4244_p9 = pneg %p4243_p7 }
  0x69   : > { %p4251_p12 = pnand %p4250_p11, %p4244_p9 }
  0x6b   : > { %4254 = shalt.err (!%p4251_p12)
}
  0x6c   : > { %3966 = dma.hbm_to_vmem [thread:$0]  (!%p4725_p6), %s5798_s5, 16, %s4731_s15, [#allocation12]  }
  0x6d   : > { %s4606_s12 = smov [#allocation14]   ;;  %s4607_s19 = smov [#allocation7]  }
  0x6e   : > { %s422_s28 = sshll.u32 %s4606_s12, 4  ;;  %s360_s20 = sshll.u32 %s4607_s19, 4  ;;  %s423_s28 = int_to_ptr.vmem [resolvable:$true] %s422_s28  ;;  %s361_s20 = int_to_ptr.vmem [resolvable:$true] %s360_s20 }
  0x6f   : > { %s4255_s16 = scalar_lea.hbm %s5766_s7, 48 }
  0x70   : > { %p4256_p13 = scmp.ne.s32.totalorder %s5766_s7, %s4255_s16  ;;  %p4262_p5 = scmp.lt.u32.totalorder %s4255_s16, %s5766_s7 }
  0x72   : > { %p4258_p0 = pnand %p4256_p13, %p4741_p8 }
  0x74   : > { %p4259_p2 = pneg %p4258_p0 }
  0x76   : > { %p4264_p7 = pnand %p4262_p5, %p4259_p2 }
  0x78   : > { %4267 = shalt.err (!%p4264_p7)
}
  0x79   : > { %s4268_s15 = scalar_lea.vmem %s423_s28, 48  ;;  %s4275_s11 = scalar_lea.vmem %s423_s28, 64 }
  0x7a   : > { %p4269_p9 = scmp.ne.s32.totalorder %s423_s28, %s4268_s15  ;;  %p4276_p11 = scmp.lt.s32.totalorder %s423_s28, %s423_s28 }
  0x7b   : > { %p4277_p12 = scmp.lt.s32.totalorder %s4275_s11, %s4268_s15 }
  0x7c   : > { %p4271_p4 = pnand %p4269_p9, %p4741_p8 }
  0x7d   : > { %p4278_p1 = por %p4277_p12, %p4276_p11 }
  0x7e   : > { %p4272_p10 = pneg %p4271_p4 }
  0x80   : > { %p4279_p3 = pnand %p4278_p1, %p4272_p10 }
  0x82   : > { %4282 = shalt.err (!%p4279_p3)
}
  0x83   : > { %3972 = dma.hbm_to_vmem [thread:$0]  (!%p4725_p6), %s5766_s7, 48, %s423_s28, [#allocation15]  }
  0x84   : > { %s5799_s2 = sld [smem:[#allocation34_spill]] }
  0x8a   : > { %s4283_s14 = scalar_lea.hbm %s5799_s2, 1024 }
  0x8b   : > { %p4284_p13 = scmp.ne.s32.totalorder %s5799_s2, %s4283_s14  ;;  %p4290_p3 = scmp.lt.u32.totalorder %s4283_s14, %s5799_s2 }
  0x8d   : > { %p4286_p0 = pnand %p4284_p13, %p4741_p8 }
  0x8f   : > { %p4287_p1 = pneg %p4286_p0 }
  0x91   : > { %p4292_p2 = pnand %p4290_p3, %p4287_p1 }
  0x93   : > { %4295 = shalt.err (!%p4292_p2)
}
  0x94   : > { %s4296_s15 = scalar_lea.vmem %s361_s20, 1024  ;;  %p4304_p4 = scmp.lt.s32.totalorder %s361_s20, %s361_s20 }
  0x95   : > { %p4297_p5 = scmp.ne.s32.totalorder %s361_s20, %s4296_s15  ;;  %p4305_p10 = scmp.lt.s32.totalorder %s4296_s15, %s4296_s15 }
  0x97   : > { %p4299_p7 = pnand %p4297_p5, %p4741_p8  ;;  %p4306_p11 = por %p4305_p10, %p4304_p4 }
  0x99   : > { %p4300_p9 = pneg %p4299_p7 }
  0x9b   : > { %p4307_p12 = pnand %p4306_p11, %p4300_p9 }
  0x9d   : > { %4310 = shalt.err (!%p4307_p12)
}
  0x9e   : > { %s5800_s28 = smov 64   ;;  %s4608_s19 = smov [#allocation10]  }
  0x9f   : > { %3957 = dma.hbm_to_vmem [thread:$0]  (!%p4725_p6), %s5799_s2, 1024, %s361_s20, [#allocation6], %s5800_s28, %s5800_s28, %s5780_s18  }
  0xa0   : > { %s387_s17 = sshll.u32 %s4608_s19, 4  ;;  %s4609_s29 = smov [#allocation13]   ;;  %s388_s17 = int_to_ptr.vmem [resolvable:$true] %s387_s17 }
  0xa1   : > { %s408_s14 = sshll.u32 %s4609_s29, 4  ;;  %s5801_s4 = sld [smem:[#allocation36_spill]]  ;;  %s409_s14 = int_to_ptr.vmem [resolvable:$true] %s408_s14 }
  0xa7   : > { %s4311_s26 = scalar_lea.hbm %s5801_s4, 32 }
  0xa8   : > { %p4312_p13 = scmp.ne.s32.totalorder %s5801_s4, %s4311_s26  ;;  %p4318_p3 = scmp.lt.u32.totalorder %s4311_s26, %s5801_s4 }
  0xaa   : > { %p4314_p0 = pnand %p4312_p13, %p4741_p8 }
  0xac   : > { %p4315_p1 = pneg %p4314_p0 }
  0xae   : > { %p4320_p2 = pnand %p4318_p3, %p4315_p1 }
  0xb0   : > { %4323 = shalt.err (!%p4320_p2)
}
  0xb1   : > { %s4324_s20 = scalar_lea.vmem %s388_s17, 32  ;;  %p4332_p4 = scmp.lt.s32.totalorder %s388_s17, %s388_s17 }
  0xb2   : > { %p4325_p5 = scmp.ne.s32.totalorder %s388_s17, %s4324_s20  ;;  %p4333_p10 = scmp.lt.s32.totalorder %s4324_s20, %s4324_s20 }
  0xb4   : > { %p4327_p7 = pnand %p4325_p5, %p4741_p8  ;;  %p4334_p11 = por %p4333_p10, %p4332_p4 }
  0xb6   : > { %p4328_p9 = pneg %p4327_p7 }
  0xb8   : > { %p4335_p12 = pnand %p4334_p11, %p4328_p9 }
  0xba   : > { %4338 = shalt.err (!%p4335_p12)
}
  0xbb   : > { %3963 = dma.hbm_to_vmem [thread:$0]  (!%p4725_p6), %s5801_s4, 32, %s388_s17, [#allocation9]  }
  0xbc   : > { %s4339_s16 = scalar_lea.hbm %s5765_s6, 3072 }
  0xbd   : > { %p4340_p13 = scmp.ne.s32.totalorder %s5765_s6, %s4339_s16  ;;  %p4346_p3 = scmp.lt.u32.totalorder %s4339_s16, %s5765_s6 }
  0xbf   : > { %p4342_p0 = pnand %p4340_p13, %p4741_p8 }
  0xc1   : > { %p4343_p1 = pneg %p4342_p0 }
  0xc3   : > { %p4348_p2 = pnand %p4346_p3, %p4343_p1 }
  0xc5   : > { %4351 = shalt.err (!%p4348_p2)
}
  0xc6   : > { %s4352_s11 = scalar_lea.vmem %s409_s14, 3072  ;;  %p4360_p4 = scmp.lt.s32.totalorder %s409_s14, %s409_s14 }
  0xc7   : > { %p4353_p5 = scmp.ne.s32.totalorder %s409_s14, %s4352_s11  ;;  %p4361_p10 = scmp.lt.s32.totalorder %s4352_s11, %s4352_s11 }
  0xc9   : > { %p4355_p7 = pnand %p4353_p5, %p4741_p8  ;;  %p4362_p11 = por %p4361_p10, %p4360_p4 }
  0xcb   : > { %p4356_p9 = pneg %p4355_p7 }
  0xcd   : > { %p4363_p12 = pnand %p4362_p11, %p4356_p9 }
  0xcf   : > { %4366 = shalt.err (!%p4363_p12)
}
  0xd0   : > { %s4610_s17 = smov 192   ;;  %s4611_s20 = smov 12  }
  0xd1   : > { %3969 = dma.hbm_to_vmem [thread:$0]  (!%p4725_p6), %s5765_s6, 3072, %s409_s14, [#allocation12], %s4610_s17, %s4610_s17, %s4611_s20  }
  0xd2   : > { %s4612_s1 = smov [#allocation16]   ;;  %s4613_s16 = smov [#allocation17]  }
  0xd3   : > { %s432_s29 = sshll.u32 %s4612_s1, 4  ;;  %s446_s30 = sshll.u32 %s4613_s16, 4  ;;  %s433_s29 = int_to_ptr.vmem [resolvable:$true] %s432_s29  ;;  %s447_s30 = int_to_ptr.vmem [resolvable:$true] %s446_s30 }
  0xd4   : > { %s4367_s15 = scalar_lea.hbm %s5767_s8, 3072 }
  0xd5   : > { %p4368_p13 = scmp.ne.s32.totalorder %s5767_s8, %s4367_s15  ;;  %p4374_p3 = scmp.lt.u32.totalorder %s4367_s15, %s5767_s8 }
  0xd7   : > { %p4370_p0 = pnand %p4368_p13, %p4741_p8 }
  0xd9   : > { %p4371_p1 = pneg %p4370_p0 }
  0xdb   : > { %p4376_p2 = pnand %p4374_p3, %p4371_p1 }
  0xdd   : > { %4379 = shalt.err (!%p4376_p2)
}
  0xde   : > { %s4380_s14 = scalar_lea.vmem %s433_s29, 3072  ;;  %p4388_p4 = scmp.lt.s32.totalorder %s433_s29, %s433_s29 }
  0xdf   : > { %p4381_p5 = scmp.ne.s32.totalorder %s433_s29, %s4380_s14  ;;  %p4389_p10 = scmp.lt.s32.totalorder %s4380_s14, %s4380_s14 }
  0xe1   : > { %p4383_p7 = pnand %p4381_p5, %p4741_p8  ;;  %p4390_p11 = por %p4389_p10, %p4388_p4 }
  0xe3   : > { %p4384_p9 = pneg %p4383_p7 }
  0xe5   : > { %p4391_p12 = pnand %p4390_p11, %p4384_p9 }
  0xe7   : > { %4394 = shalt.err (!%p4391_p12)
}
  0xe8   : > { %s5802_s18 = smov 4   ;;  %s4395_s12 = scalar_lea.hbm %s5768_s9, 64 }
  0xe9   : > { %3975 = dma.hbm_to_vmem [thread:$0]  (!%p4725_p6), %s5767_s8, 3072, %s433_s29, [#allocation15], %s5800_s28, %s5800_s28, %s5802_s18  }
  0xea   : > { %p4396_p13 = scmp.ne.s32.totalorder %s5768_s9, %s4395_s12  ;;  %p4402_p3 = scmp.lt.u32.totalorder %s4395_s12, %s5768_s9 }
  0xec   : > { %p4398_p0 = pnand %p4396_p13, %p4741_p8 }
  0xee   : > { %p4399_p1 = pneg %p4398_p0 }
  0xf0   : > { %p4404_p2 = pnand %p4402_p3, %p4399_p1 }
  0xf2   : > { %4407 = shalt.err (!%p4404_p2)
}
  0xf3   : > { %s4408_s10 = scalar_lea.vmem %s447_s30, 64  ;;  %p4416_p4 = scmp.lt.s32.totalorder %s447_s30, %s447_s30 }
  0xf4   : > { %p4409_p5 = scmp.ne.s32.totalorder %s447_s30, %s4408_s10  ;;  %p4417_p10 = scmp.lt.s32.totalorder %s4408_s10, %s4408_s10 }
  0xf6   : > { %p4411_p7 = pnand %p4409_p5, %p4741_p8  ;;  %p4418_p11 = por %p4417_p10, %p4416_p4 }
  0xf8   : > { %p4412_p9 = pneg %p4411_p7 }
  0xfa   : > { %p4419_p12 = pnand %p4418_p11, %p4412_p9 }
  0xfc   : > { %4422 = shalt.err (!%p4419_p12)
}
  0xfd   : > { %3978 = dma.hbm_to_vmem [thread:$0]  (!%p4725_p6), %s5768_s9, 64, %s447_s30, [#allocation18]  }
  0xfe   : > { %s5782_s13 = sadd.s32 4294967294, %s4599_s24   ;;  %s4931_s25 = sadd.s32 1, %s4599_s24  }
  0xff   : > { %s44_s15 = sadd.s32 1, %s4595_s23  ;;  %s41_s11 = ssub.s32 %s4599_s24, %s4931_s25 }
 0x100   : > { %p51_p8 = scmp.ne.s32.totalorder %s4595_s23, %s4591_s22  ;;  %p42_p13 = scmp.eq.s32.totalorder %s41_s11, 0 }
 0x101   : > { %p52_p0 = scmp.eq.s32.totalorder %s4599_s24, 0  ;;  %p57_p1 = scmp.ne.s32.totalorder %s4591_s22, %s4587_s21 }
 0x102   : > { %p270_p3 = scmp.eq.s32.totalorder %s4709_s27, 1  ;;  %p5803_p5 = scmp.eq.s32.totalorder %s4709_s27, 0 }
 0x103   : > { %s4943_s14 = scalar_select %p42_p13, %s4595_s23, %s44_s15  }
 0x104   : > { %p53_p2 = por %p52_p0, %p51_p8  ;;  %p4947_p7 = por %p5803_p5, %p57_p1 }
 0x105   : > { %p4951_p6 = por %p270_p3, %p51_p8  ;;  %p276_p9 = scmp.eq.s32.totalorder %s5782_s13, 1 }
 0x106   : > { %p4002_p4 = scmp.lt.s32.totalorder %s4599_s24, 2  ;;  %s457_s2 = sand.u32 1, %s4595_s23  }
 0x107   : > { %s5805_s30 = scalar_select %p4951_p6, 1, 0 }
 0x108   : > { %p4959_p10 = por %p276_p9, %p57_p1  ;;  %s3277_s17 = sshll.u32 %s457_s2, 8 }
 0x109   : > { %s3383_s20 = sshll.u32 %s4599_s24, 12  ;;  %s5807_s0 = sld [smem:[#allocation32_spill]] }
 0x10a   : > { %s5806_s3 = scalar_select %p4959_p10, 1, 0 }
 0x10b   : > { %s461_s16 = scalar_lea.vmem [#allocation2], %s3277_s17  ;;  %p4969_p11 = pnand %p4002_p4, %p53_p2 }
 0x10c   : > { %s468_s26 = sshll.u32 %s461_s16, 4  ;;  %s4975_s28 = scalar_lea.sflag [#allocation3], %s457_s2  ;;  %s4973_s26 = int_to_ptr.vmem [resolvable:$true] %s468_s26 }
 0x10d   : > { %p4425_p8 = pneg %p4969_p11 }
 0x10f   : > { %s4967_s1 = scalar_lea.hbm %s5807_s0, %s3383_s20  ;;  %s4428_s17 = scalar_lea.hbm %s5807_s0, 8192 }
 0x110   : > { %s4423_s29 = scalar_lea.hbm %s4967_s1, 4096  ;;  %p4429_p1 = scmp.lt.u32.totalorder %s4967_s1, %s5807_s0 }
 0x111   : > { %p4424_p12 = scmp.ne.s32.totalorder %s4967_s1, %s4423_s29  ;;  %p4430_p3 = scmp.lt.u32.totalorder %s4428_s17, %s4423_s29 }
 0x112   : > { %p4432_p5 = scmp.lt.u32.totalorder %s4423_s29, %s4967_s1 }
 0x113   : > { %p4426_p13 = pnand %p4425_p8, %p4424_p12  ;;  %p4431_p2 = por %p4430_p3, %p4429_p1 }
 0x115   : > { %p4427_p0 = pneg %p4426_p13  ;;  %p4433_p9 = por %p4432_p5, %p4431_p2 }
 0x117   : > { %p4434_p4 = pnand %p4433_p9, %p4427_p0 }
 0x119   : > { %4437 = shalt.err (!%p4434_p4)
}
 0x11a   : > { %s4438_s2 = scalar_lea.vmem %s4973_s26, 4096  ;;  %s4614_s19 = smov [#allocation2]  }
 0x11b   : > { %p4439_p12 = scmp.ne.s32.totalorder %s4973_s26, %s4438_s2  ;;  %s4443_s16 = sshll.u32 %s4614_s19, 4  ;;  %s4444_s16 = int_to_ptr.vmem [resolvable:$false] %s4443_s16 }
 0x11c   : > { %s4445_s15 = scalar_lea.vmem %s4444_s16, 8192  ;;  %p4446_p6 = scmp.lt.s32.totalorder %s4973_s26, %s4444_s16 }
 0x11d   : > { %p4441_p13 = pnand %p4439_p12, %p4425_p8  ;;  %p4447_p1 = scmp.lt.s32.totalorder %s4445_s15, %s4438_s2 }
 0x11f   : > { %p4442_p10 = pneg %p4441_p13  ;;  %p4448_p3 = por %p4447_p1, %p4446_p6 }
 0x121   : > { %p4449_p2 = pnand %p4448_p3, %p4442_p10 }
 0x123   : > { %4452 = shalt.err (!%p4449_p2)
}
 0x124   : > { %s4615_s29 = smov 128   ;;  %s4616_s11 = smov 8  }
 0x125   : > { %3982 = dma.hbm_to_vmem [thread:$0]  (!%p4969_p11), %s4967_s1, 4096, %s4973_s26, %s4975_s28, %s4615_s29, %s4615_s29, %s4616_s11  }
 0x126   : > { %s5809_s17 = sld [smem:[#allocation31_spill]] }
 0x12c   : > { %p5810_p8 = scmp.ne.s32.totalorder %s5809_s17, 0 }
 0x12d   : > { %s5006_s20 = sand.u32 (!%p5810_p8), 1, %s4591_s22  }
 0x12e   : > { %480 = sbr.rel (%p5810_p8) target bundleno = 1674 (0x68a), region = 60  ;;  %s5009_s12 = sshll.u32 (!%p5810_p8), %s5006_s20, 8 }
 0x12f   : > { %s483_s2 = scalar_lea.sflag (!%p5810_p8), [#allocation3], %s5006_s20  ;;  %s5013_s19 = scalar_lea.vmem (!%p5810_p8), [#allocation2], %s5009_s12 }
 0x135   : > { %4554 = dma.done.wait (%p4947_p7), %s483_s2, 4096  }
 0x136   : > { %4556 = vsyncadd (%p4947_p7), %s483_s2, 4294963200  ;;  %p5811_p6 = scmp.eq.s32.totalorder %s4709_s27, 0 }
 0x138   : > { %4558 = dma.done.wait (%p5811_p6), [#allocation6], 2048   ;;  %p5812_p10 = pmov %p5811_p6 }
 0x139   : > { %p5813_p11 = pmov %p5811_p6 }
 0x13a   : > { %4560 = vsyncadd (%p5812_p10), [#allocation6], 4294965248 }
 0x13b   : > { %4562 = dma.done.wait (%p5813_p11), [#allocation9], 1056   ;;  %p5814_p0 = pmov %p5811_p6 }
 0x13d   : > { %4564 = vsyncadd (%p5814_p0), [#allocation9], 4294966240  ;;  %p5815_p5 = pmov %p5814_p0 }
 0x13e   : > { %p5816_p9 = pmov %p5814_p0 }
 0x13f   : > { %4566 = dma.done.wait (%p5815_p5), [#allocation12], 3088  }
 0x140   : > { %4568 = vsyncadd (%p5816_p9), [#allocation12], 4294964208  ;;  %p5817_p7 = pmov %p5814_p0 }
 0x141   : > { %p5818_p4 = pmov %p5814_p0 }
 0x142   : > { %4570 = dma.done.wait (%p5817_p7), [#allocation15], 3120  }
 0x143   : > { %4572 = vsyncadd (%p5818_p4), [#allocation15], 4294964176  ;;  %p5819_p12 = pmov %p5814_p0 }
 0x144   : > { %p5820_p13 = pmov %p5814_p0 }
 0x145   : > { %4574 = dma.done.wait (%p5819_p12), [#allocation18], 64  }
 0x146   : > { %4576 = vsyncadd (%p5820_p13), [#allocation18], 4294967232  ;;  %v4063_v0 = vld [vmem:[#allocation5] sm:$0xff]   ;;  %v4064_v1 = vld [vmem:[#allocation5 + $0x8] sm:$0xff]   ;;  %s5428_s18 = scalar_lea.vmem [#allocation19], %s5009_s12  ;;  %s5439_s1 = scalar_lea.vmem [#allocation20], %s5009_s12 }
 0x147   : > { %3555 = vmatprep.subr.bf16.mxu0 %v4063_v0  ;;  %3891 = vmatprep.subr.bf16.mxu1 %v4063_v0  ;;  %v4065_v2 = vld [vmem:[#allocation5 + $0x10] sm:$0xff]   ;;  %v4066_v3 = vld [vmem:[#allocation5 + $0x18] sm:$0xff]   ;;  %v578_v4 = vld [vmem:[%s5013_s19] sm:$0xff]  ;;  %s5545_s10 = sshll.u32 %s4709_s27, 12  ;;  %s3013_s28 = sshll.u32 %s5428_s18, 4  ;;  %s5563_s28 = int_to_ptr.vmem [resolvable:$true] %s3013_s28 }
 0x148   : > { %3556 = vmatpush3.bf16.msra.mxu0 %v4063_v0  ;;  %3899 = vmatpush3.bf16.msra.mxu1 %v4063_v0  ;;  %v579_v5 = vld [vmem:[%s5013_s19 + $0x8] sm:$0xff]  ;;  %v4067_v7 = vld [vmem:[#allocation5 + $0x20] sm:$0xff]   ;;  %v4069_v12 = vld [vmem:[#allocation5 + $0x30] sm:$0xff]   ;;  %s3029_s16 = sshll.u32 %s5439_s1, 4  ;;  %s5821_s11 = sld [smem:[#allocation38_spill]]  ;;  %s5577_s16 = int_to_ptr.vmem [resolvable:$true] %s3029_s16 }
 0x149   : > { %3557 = vmatprep.subr.bf16.mxu0 %v4064_v1  ;;  %3892 = vmatprep.subr.bf16.mxu1 %v4064_v1  ;;  %v610_v6 = vpack.c.bf16 %v579_v5, %v578_v4  ;;  %v594_v8 = vld [vmem:[%s5013_s19 + $0x80] sm:$0xff]  ;;  %v595_v9 = vld [vmem:[%s5013_s19 + $0x88] sm:$0xff]  ;;  %v4070_v13 = vld [vmem:[#allocation5 + $0x38] sm:$0xff]   ;;  %s5822_s15 = sld [smem:[#allocation39_spill]]  ;;  %s4453_s26 = scalar_lea.vmem %s5563_s28, 4096 }
 0x14a   : > { %v618_v10 = vpack.c.bf16 %v595_v9, %v594_v8  ;;  %v4068_v11 = vld [vmem:[#allocation5 + $0x28] sm:$0xff]   ;;  %v580_v14 = vld [vmem:[%s5013_s19 + $0x10] sm:$0xff]  ;;  %v581_v15 = vld [vmem:[%s5013_s19 + $0x18] sm:$0xff]  ;;  %p4454_p1 = scmp.ne.s32.totalorder %s5563_s28, %s4453_s26  ;;  %p5823_p3 = scmp.ne.s32.totalorder %s5805_s30, 0 }
 0x14b   : > { %3571 = vmatprep.mubr.bf16.mxu0 %v610_v6  ;;  %v582_v16 = vld [vmem:[%s5013_s19 + $0x20] sm:$0xff]  ;;  %v583_v17 = vld [vmem:[%s5013_s19 + $0x28] sm:$0xff]  ;;  %v596_v18 = vld [vmem:[%s5013_s19 + $0x90] sm:$0xff]  ;;  %v611_v23 = vpack.c.bf16 %v581_v15, %v580_v14 }
 0x14c   : > { %3558 = vmatpush3.bf16.msra.mxu0 %v4064_v1  ;;  %3900 = vmatpush3.bf16.msra.mxu1 %v4064_v1  ;;  %v597_v19 = vld [vmem:[%s5013_s19 + $0x98] sm:$0xff]  ;;  %v598_v20 = vld [vmem:[%s5013_s19 + $0xa0] sm:$0xff]  ;;  %v599_v21 = vld [vmem:[%s5013_s19 + $0xa8] sm:$0xff]  ;;  %v612_v24 = vpack.c.bf16 %v583_v17, %v582_v16  ;;  %p4455_p2 = pnand %p4454_p1, %p5823_p3 }
 0x14d   : > { %3559 = vmatprep.subr.bf16.mxu0 %v4065_v2  ;;  %3893 = vmatprep.subr.bf16.mxu1 %v4065_v2  ;;  %v4071_v22 = vld [vmem:[#allocation7] sm:$0xff]   ;;  %v619_v25 = vpack.c.bf16 %v597_v19, %v596_v18  ;;  %v4072_v26 = vld [vmem:[#allocation7 + $0x8] sm:$0xff]   ;;  %v620_v27 = vpack.c.bf16 %v599_v21, %v598_v20  ;;  %v584_v28 = vld [vmem:[%s5013_s19 + $0x30] sm:$0xff] }
 0x14e   : > { %3587 = vmatprep.mubr.bf16.mxu1 %v618_v10  ;;  %v585_v29 = vld [vmem:[%s5013_s19 + $0x38] sm:$0xff]  ;;  %v586_v30 = vld [vmem:[%s5013_s19 + $0x40] sm:$0xff]  ;;  %v587_v31 = vld [vmem:[%s5013_s19 + $0x48] sm:$0xff]  ;;  %s5561_s17 = scalar_lea.hbm %s5821_s11, %s5545_s10  ;;  %p4456_p8 = pneg %p4455_p2 }
 0x14f   : > { %v600_v32 = vld [vmem:[%s5013_s19 + $0xb0] sm:$0xff]  ;;  %v601_v33 = vld [vmem:[%s5013_s19 + $0xb8] sm:$0xff]  ;;  %v602_v34 = vld [vmem:[%s5013_s19 + $0xc0] sm:$0xff]  ;;  %v613_v37 = vpack.c.bf16 %v585_v29, %v584_v28  ;;  %v614_v38 = vpack.c.bf16 %v587_v31, %v586_v30  ;;  %s5575_s29 = scalar_lea.hbm %s5822_s15, %s5545_s10 }
 0x150   : > { %3560 = vmatpush3.bf16.msra.mxu0 %v4065_v2  ;;  %3901 = vmatpush3.bf16.msra.mxu1 %v4065_v2  ;;  %v603_v35 = vld [vmem:[%s5013_s19 + $0xc8] sm:$0xff]  ;;  %v4073_v36 = vld [vmem:[#allocation7 + $0x10] sm:$0xff]   ;;  %v621_v39 = vpack.c.bf16 %v601_v33, %v600_v32  ;;  %v4074_v40 = vld [vmem:[#allocation7 + $0x18] sm:$0xff]  }
 0x151   : > { %3561 = vmatprep.subr.bf16.mxu0 %v4066_v3  ;;  %3894 = vmatprep.subr.bf16.mxu1 %v4066_v3  ;;  %v622_v41 = vpack.c.bf16 %v603_v35, %v602_v34  ;;  %v5060_v42 = vld [vmem:[%s5013_s19 + $0x50] sm:$0xff]  ;;  %v5063_v43 = vld [vmem:[%s5013_s19 + $0x58] sm:$0xff]  ;;  %v590_v44 = vld [vmem:[%s5013_s19 + $0x60] sm:$0xff] }
 0x152   : > { %v591_v45 = vld [vmem:[%s5013_s19 + $0x68] sm:$0xff]  ;;  %v604_v46 = vld [vmem:[%s5013_s19 + $0xd0] sm:$0xff]  ;;  %v605_v47 = vld [vmem:[%s5013_s19 + $0xd8] sm:$0xff]  ;;  %v615_v51 = vpack.c.bf16 %v5063_v43, %v5060_v42 }
 0x153   : > { %v606_v48 = vld [vmem:[%s5013_s19 + $0xe0] sm:$0xff]  ;;  %v607_v49 = vld [vmem:[%s5013_s19 + $0xe8] sm:$0xff]  ;;  %v616_v52 = vpack.c.bf16 %v591_v45, %v590_v44  ;;  %v623_v53 = vpack.c.bf16 %v605_v47, %v604_v46  ;;  %v5074_v56 = vld [vmem:[%s5013_s19 + $0x70] sm:$0xff] }
 0x154   : > { %3562 = vmatpush3.bf16.msra.mxu0 %v4066_v3  ;;  %3902 = vmatpush3.bf16.msra.mxu1 %v4066_v3  ;;  %v4075_v50 = vld [vmem:[#allocation7 + $0x20] sm:$0xff]   ;;  %v4076_v54 = vld [vmem:[#allocation7 + $0x28] sm:$0xff]   ;;  %v624_v55 = vpack.c.bf16 %v607_v49, %v606_v48  ;;  %v5077_v57 = vld [vmem:[%s5013_s19 + $0x78] sm:$0xff] }
 0x155   : > { %3563 = vmatprep.subr.bf16.mxu0 %v4067_v7  ;;  %3895 = vmatprep.subr.bf16.mxu1 %v4067_v7  ;;  %v608_v58 = vld [vmem:[%s5013_s19 + $0xf0] sm:$0xff]  ;;  %v609_v59 = vld [vmem:[%s5013_s19 + $0xf8] sm:$0xff]  ;;  %v617_v60 = vpack.c.bf16 %v5077_v57, %v5074_v56  ;;  %v4079_v0 = vld [vmem:[#allocation8] sm:$0xff]  }
 0x156   : > { %v625_v61 = vpack.c.bf16 %v609_v59, %v608_v58  ;;  %v4077_v62 = vld [vmem:[#allocation7 + $0x30] sm:$0xff]   ;;  %v4078_v63 = vld [vmem:[#allocation7 + $0x38] sm:$0xff]   ;;  %v4080_v1 = vld [vmem:[#allocation8 + $0x8] sm:$0xff]  }
 0x157   : > { %v4081_v2 = vld [vmem:[#allocation8 + $0x10] sm:$0xff]   ;;  %v4082_v3 = vld [vmem:[#allocation8 + $0x18] sm:$0xff]   ;;  %v4083_v4 = vld [vmem:[#allocation8 + $0x20] sm:$0xff]  }
 0x158   : > { %3564 = vmatpush3.bf16.msra.mxu0 %v4067_v7  ;;  %3903 = vmatpush3.bf16.msra.mxu1 %v4067_v7  ;;  %v4084_v5 = vld [vmem:[#allocation8 + $0x28] sm:$0xff]   ;;  %v5083_v6 = vld [vmem:[#allocation10] ss:$0 sm:$0xff] }
 0x159   : > { %3565 = vmatprep.subr.bf16.mxu0 %v4068_v11  ;;  %3896 = vmatprep.subr.bf16.mxu1 %v4068_v11 }
 0x15c   : > { %3566 = vmatpush3.bf16.msra.mxu0 %v4068_v11  ;;  %3904 = vmatpush3.bf16.msra.mxu1 %v4068_v11 }
 0x15d   : > { %3567 = vmatprep.subr.bf16.mxu0 %v4069_v12  ;;  %3897 = vmatprep.subr.bf16.mxu1 %v4069_v12 }
 0x160   : > { %3568 = vmatpush3.bf16.msra.mxu0 %v4069_v12  ;;  %3905 = vmatpush3.bf16.msra.mxu1 %v4069_v12 }
 0x161   : > { %3569 = vmatprep.subr.bf16.mxu0 %v4070_v13  ;;  %3898 = vmatprep.subr.bf16.mxu1 %v4070_v13 }
 0x164   : > { %3570 = vmatpush3.bf16.msra.mxu0 %v4070_v13  ;;  %3906 = vmatpush3.bf16.msra.mxu1 %v4070_v13 }
 0x165   : > { %3603 = vmatprep.subr.bf16.mxu1 %v4071_v22  ;;  %3651 = vmatprep.subr.bf16.mxu0 %v4079_v0 }
 0x167   : > { %3572 = vmatmul.mubr.bf16.vlgmr.msra.gmra.mrb[0].mxu0 %v611_v23  ;;  %3588 = vmatmul.mubr.bf16.vlgmr.msra.gmra.mrb[0].mxu1 %v619_v25 }
 0x168   : > { %3575 = vmatprep.mubr.bf16.mxu0 %v612_v24  ;;  %3591 = vmatprep.mubr.bf16.mxu1 %v620_v27 }
 0x169   : > { %3604 = vmatpush3.bf16.msra.mxu1 %v4071_v22  ;;  %3652 = vmatpush3.bf16.msra.mxu0 %v4079_v0 }
 0x16a   : > { %3605 = vmatprep.subr.bf16.mxu1 %v4072_v26  ;;  %3653 = vmatprep.subr.bf16.mxu0 %v4080_v1 }
 0x16d   : > { %3606 = vmatpush3.bf16.msra.mxu1 %v4072_v26  ;;  %3654 = vmatpush3.bf16.msra.mxu0 %v4080_v1 }
 0x16e   : > { %3607 = vmatprep.subr.bf16.mxu1 %v4073_v36  ;;  %3655 = vmatprep.subr.bf16.mxu0 %v4081_v2 }
 0x16f   : > { %3576 = vmatmul.mubr.bf16.gmra.mrb[4].mxu0 %v613_v37  ;;  %3592 = vmatmul.mubr.bf16.gmra.mrb[4].mxu1 %v621_v39 }
 0x170   : > { %3579 = vmatprep.mubr.bf16.mxu0 %v614_v38  ;;  %3595 = vmatprep.mubr.bf16.mxu1 %v622_v41 }
 0x171   : > { %3608 = vmatpush3.bf16.msra.mxu1 %v4073_v36  ;;  %3656 = vmatpush3.bf16.msra.mxu0 %v4081_v2 }
 0x172   : > { %3609 = vmatprep.subr.bf16.mxu1 %v4074_v40  ;;  %3657 = vmatprep.subr.bf16.mxu0 %v4082_v3 }
 0x175   : > { %3610 = vmatpush3.bf16.msra.mxu1 %v4074_v40  ;;  %3658 = vmatpush3.bf16.msra.mxu0 %v4082_v3 }
 0x176   : > { %3611 = vmatprep.subr.bf16.mxu1 %v4075_v50  ;;  %3659 = vmatprep.subr.bf16.mxu0 %v4083_v4 }
 0x177   : > { %3580 = vmatmul.mubr.bf16.gmra.mrb[8].mxu0 %v615_v51  ;;  %3596 = vmatmul.mubr.bf16.gmra.mrb[8].mxu1 %v623_v53 }
 0x178   : > { %3583 = vmatprep.mubr.bf16.mxu0 %v616_v52  ;;  %3599 = vmatprep.mubr.bf16.mxu1 %v624_v55 }
 0x179   : > { %3612 = vmatpush3.bf16.msra.mxu1 %v4075_v50  ;;  %3660 = vmatpush3.bf16.msra.mxu0 %v4083_v4 }
 0x17a   : > { %3613 = vmatprep.subr.bf16.mxu1 %v4076_v54  ;;  %3661 = vmatprep.subr.bf16.mxu0 %v4084_v5 }
 0x17d   : > { %3614 = vmatpush3.bf16.msra.mxu1 %v4076_v54  ;;  %3662 = vmatpush3.bf16.msra.mxu0 %v4084_v5 }
 0x17e   : > { %3615 = vmatprep.subr.bf16.mxu1 %v4077_v62 }
 0x17f   : > { %3584 = vmatmul.mubr.bf16.gmra.mrb[12].mxu0 %v617_v60  ;;  %3600 = vmatmul.mubr.bf16.gmra.mrb[12].mxu1 %v625_v61 }
 0x181   : > { %3616 = vmatpush3.bf16.msra.mxu1 %v4077_v62 }
 0x182   : > { %3617 = vmatprep.subr.bf16.mxu1 %v4078_v63 }
 0x185   : > { %3618 = vmatpush3.bf16.msra.mxu1 %v4078_v63 }
 0x23a   : > { %v3573_v7 = vpop.f32.mrb[0].mxu0  ;;  %v3589_v10 = vpop.f32.mrb[0].mxu1 }
 0x23b   : > { %v738_v8 = vadd.f32 %v3573_v7, %v5083_v6  ;;  %v729_v9 = vpop.f32.mrb[1].mxu0  ;;  %v802_v13 = vadd.f32 %v3589_v10, %v5083_v6  ;;  %v793_v14 = vpop.f32.mrb[1].mxu1 }
 0x23c   : > { %v730_v11 = vadd.f32 %v5083_v6, %v729_v9  ;;  %v3574_v12 = vpop.f32.mrb[2].mxu0  ;;  %v794_v17 = vadd.f32 %v5083_v6, %v793_v14  ;;  %v3590_v18 = vpop.f32.mrb[2].mxu1 }
 0x23d   : > { %v741_v15 = vadd.f32 %v3574_v12, %v5083_v6  ;;  %v732_v16 = vpop.f32.mrb[3].mxu0  ;;  %v874_v20 = vmax.f32 %v802_v13, 0.0  ;;  %v805_v21 = vadd.f32 %v3590_v18, %v5083_v6  ;;  %v796_v22 = vpop.f32.mrb[3].mxu1  ;;  %v858_v23 = vmax.f32 %v738_v8, 0.0 }
 0x23e   : > { %v733_v19 = vadd.f32 %v5083_v6, %v732_v16  ;;  %v872_v25 = vmax.f32 %v794_v17, 0.0  ;;  %v797_v26 = vadd.f32 %v5083_v6, %v796_v22  ;;  %v856_v27 = vmax.f32 %v730_v11, 0.0 }
 0x23f   : > { %v859_v24 = vmax.f32 %v741_v15, 0.0  ;;  %v875_v29 = vmax.f32 %v805_v21, 0.0 }
 0x240   : > { %v857_v28 = vmax.f32 %v733_v19, 0.0  ;;  %v873_v31 = vmax.f32 %v797_v26, 0.0 }
 0x241   : > { %v889_v30 = vpack.c.bf16 %v859_v24, %v858_v23  ;;  %v5093_v34 = vpack.c.bf16 %v875_v29, %v874_v20 }
 0x242   : > { %v888_v32 = vpack.c.bf16 %v857_v28, %v856_v27  ;;  %v3577_v33 = vpop.f32.mrb[4].mxu0  ;;  %v5096_v37 = vpack.c.bf16 %v873_v31, %v872_v25  ;;  %v3593_v38 = vpop.f32.mrb[4].mxu1 }
 0x243   : > { %v754_v35 = vadd.f32 %v3577_v33, %v5083_v6  ;;  %v745_v36 = vpop.f32.mrb[5].mxu0  ;;  %v818_v41 = vadd.f32 %v3593_v38, %v5083_v6  ;;  %v809_v44 = vpop.f32.mrb[5].mxu1 }
 0x244   : > { %v746_v39 = vadd.f32 %v5083_v6, %v745_v36  ;;  %v3578_v40 = vpop.f32.mrb[6].mxu0  ;;  %3619 = vmatprep.mubr.bf16.mxu1 %v888_v32  ;;  %v810_v48 = vadd.f32 %v5083_v6, %v809_v44  ;;  %v3594_v49 = vpop.f32.mrb[6].mxu1 }
 0x245   : > { %v862_v45 = vmax.f32 %v754_v35, 0.0  ;;  %v757_v46 = vadd.f32 %v3578_v40, %v5083_v6  ;;  %v748_v47 = vpop.f32.mrb[7].mxu0  ;;  %3620 = vmatmul.mubr.bf16.vlgmr.msra.gmra.mrb[16].mxu1 %v889_v30  ;;  %v878_v52 = vmax.f32 %v818_v41, 0.0  ;;  %v821_v53 = vadd.f32 %v3594_v49, %v5083_v6  ;;  %v812_v54 = vpop.f32.mrb[7].mxu1 }
 0x246   : > { %v860_v50 = vmax.f32 %v746_v39, 0.0  ;;  %v749_v51 = vadd.f32 %v5083_v6, %v748_v47  ;;  %v876_v58 = vmax.f32 %v810_v48, 0.0  ;;  %v813_v59 = vadd.f32 %v5083_v6, %v812_v54 }
 0x247   : > { %v863_v55 = vmax.f32 %v757_v46, 0.0  ;;  %v879_v61 = vmax.f32 %v821_v53, 0.0 }
 0x248   : > { %v861_v60 = vmax.f32 %v749_v51, 0.0  ;;  %v877_v63 = vmax.f32 %v813_v59, 0.0 }
 0x249   : > { %v891_v62 = vpack.c.bf16 %v863_v55, %v862_v45  ;;  %v5105_v2 = vpack.c.bf16 %v879_v61, %v878_v52 }
 0x24a   : > { %v890_v0 = vpack.c.bf16 %v861_v60, %v860_v50  ;;  %v3581_v1 = vpop.f32.mrb[8].mxu0  ;;  %v898_v5 = vpack.c.bf16 %v877_v63, %v876_v58  ;;  %v3597_v7 = vpop.f32.mrb[8].mxu1 }
 0x24b   : > { %v770_v3 = vadd.f32 %v3581_v1, %v5083_v6  ;;  %v761_v4 = vpop.f32.mrb[9].mxu0  ;;  %v834_v10 = vadd.f32 %v3597_v7, %v5083_v6  ;;  %v825_v11 = vpop.f32.mrb[9].mxu1  ;;  %v4089_v7 = vld [vmem:[#allocation13 + $0x4] ss:$12 sps:$4 sm:$0xff]  }
 0x24c   : > { %v762_v8 = vadd.f32 %v5083_v6, %v761_v4  ;;  %3623 = vmatprep.mubr.bf16.mxu1 %v890_v0  ;;  %v3582_v9 = vpop.f32.mrb[10].mxu0  ;;  %v826_v15 = vadd.f32 %v5083_v6, %v825_v11  ;;  %v3598_v16 = vpop.f32.mrb[10].mxu1  ;;  %v4087_v4 = vld [vmem:[#allocation13] ss:$12 sps:$4 sm:$0xff]   ;;  %1639 = vmatprep.subr.bf16.mxu1 %v4089_v7  ;;  %v4101_v11 = vld [vmem:[#allocation13 + $0x64] ss:$12 sps:$4 sm:$0xff]  }
 0x24d   : > { %v866_v12 = vmax.f32 %v770_v3, 0.0  ;;  %v773_v13 = vadd.f32 %v3582_v9, %v5083_v6  ;;  %3624 = vmatmul.mubr.bf16.gmra.mrb[20].mxu1 %v891_v62  ;;  %v764_v14 = vpop.f32.mrb[11].mxu0  ;;  %v882_v19 = vmax.f32 %v834_v10, 0.0  ;;  %v837_v20 = vadd.f32 %v3598_v16, %v5083_v6  ;;  %v828_v21 = vpop.f32.mrb[11].mxu1  ;;  %v4086_v3 = vld [vmem:[#allocation8 + $0x38] sm:$0xff]  }
 0x24e   : > { %v864_v17 = vmax.f32 %v762_v8, 0.0  ;;  %v765_v18 = vadd.f32 %v5083_v6, %v764_v14  ;;  %v880_v23 = vmax.f32 %v826_v15, 0.0  ;;  %v829_v24 = vadd.f32 %v5083_v6, %v828_v21  ;;  %v4092_v8 = vld [vmem:[#allocation13 + $0x1c] ss:$12 sps:$4 sm:$0xff]   ;;  %1640 = vmatpush1.bf16.msra.mxu1 %v4087_v4  ;;  %v4098_v9 = vld [vmem:[#allocation13 + $0x4c] ss:$12 sps:$4 sm:$0xff]  }
 0x24f   : > { %v867_v22 = vmax.f32 %v773_v13, 0.0  ;;  %v883_v26 = vmax.f32 %v837_v20, 0.0  ;;  %1641 = vmatprep.subr.bf16.mxu1 %v4092_v8  ;;  %v4096_v10 = vld [vmem:[#allocation13 + $0x48] ss:$12 sps:$4 sm:$0xff]   ;;  %v4104_v14 = vld [vmem:[#allocation13 + $0x78] ss:$12 sps:$4 sm:$0xff]  }
 0x250   : > { %v865_v25 = vmax.f32 %v765_v18, 0.0  ;;  %v881_v28 = vmax.f32 %v829_v24, 0.0  ;;  %v4106_v13 = vld [vmem:[#allocation13 + $0x7c] ss:$12 sps:$4 sm:$0xff]   ;;  %v4111_v15 = vld [vmem:[#allocation13 + $0x94] ss:$12 sps:$4 sm:$0xff]  }
 0x251   : > { %v893_v27 = vpack.c.bf16 %v867_v22, %v866_v12  ;;  %v901_v31 = vpack.c.bf16 %v883_v26, %v882_v19  ;;  %v4099_v12 = vld [vmem:[#allocation13 + $0x60] ss:$12 sps:$4 sm:$0xff]   ;;  %v4109_v16 = vld [vmem:[#allocation13 + $0x90] ss:$12 sps:$4 sm:$0xff]  }
 0x252   : > { %v892_v29 = vpack.c.bf16 %v865_v25, %v864_v17  ;;  %v3585_v30 = vpop.f32.mrb[12].mxu0  ;;  %v900_v35 = vpack.c.bf16 %v881_v28, %v880_v23  ;;  %v3601_v36 = vpop.f32.mrb[12].mxu1  ;;  %v5126_v17 = vld [vmem:[#allocation10 + $0x1] ss:$0 sm:$0xff] }
 0x253   : > { %v786_v32 = vadd.f32 %v3585_v30, %v5083_v6  ;;  %v777_v33 = vpop.f32.mrb[13].mxu0  ;;  %v850_v40 = vadd.f32 %v3601_v36, %v5083_v6  ;;  %v841_v41 = vpop.f32.mrb[13].mxu1  ;;  %v4103_v36 = vld [vmem:[#allocation13 + $0x20] ss:$12 sps:$4 sm:$0xff]  }
 0x254   : > { %3627 = vmatprep.mubr.bf16.mxu1 %v892_v29  ;;  %v778_v38 = vadd.f32 %v5083_v6, %v777_v33  ;;  %v3586_v39 = vpop.f32.mrb[14].mxu0  ;;  %v842_v47 = vadd.f32 %v5083_v6, %v841_v41  ;;  %v3602_v48 = vpop.f32.mrb[14].mxu1 }
 0x255   : > { %3628 = vmatmul.mubr.bf16.gmra.mrb[24].mxu1 %v893_v27  ;;  %v870_v44 = vmax.f32 %v786_v32, 0.0  ;;  %v789_v45 = vadd.f32 %v3586_v39, %v5083_v6  ;;  %v780_v46 = vpop.f32.mrb[15].mxu0  ;;  %v886_v51 = vmax.f32 %v850_v40, 0.0  ;;  %v853_v52 = vadd.f32 %v3602_v48, %v5083_v6  ;;  %v844_v53 = vpop.f32.mrb[15].mxu1  ;;  %v4107_v48 = vld [vmem:[#allocation13 + $0x38] ss:$12 sps:$4 sm:$0xff]  }
 0x256   : > { %v868_v49 = vmax.f32 %v778_v38, 0.0  ;;  %v781_v50 = vadd.f32 %v5083_v6, %v780_v46  ;;  %v884_v55 = vmax.f32 %v842_v47, 0.0  ;;  %v845_v58 = vadd.f32 %v5083_v6, %v844_v53  ;;  %v4085_v6 = vld [vmem:[#allocation8 + $0x30] sm:$0xff]  }
 0x257   : > { %v871_v54 = vmax.f32 %v789_v45, 0.0  ;;  %v887_v60 = vmax.f32 %v853_v52, 0.0  ;;  %3663 = vmatprep.subr.bf16.mxu0 %v4085_v6 }
 0x258   : > { %v869_v59 = vmax.f32 %v781_v50, 0.0  ;;  %v885_v62 = vmax.f32 %v845_v58, 0.0  ;;  %3664 = vmatpush3.bf16.msra.mxu0 %v4085_v6  ;;  %v4112_v6 = vld [vmem:[#allocation13 + $0x68] ss:$12 sps:$4 sm:$0xff]  }
 0x259   : > { %v895_v61 = vpack.c.bf16 %v871_v54, %v870_v44  ;;  %v903_v0 = vpack.c.bf16 %v887_v60, %v886_v51  ;;  %3665 = vmatprep.subr.bf16.mxu0 %v4086_v3 }
 0x25a   : > { %v894_v63 = vpack.c.bf16 %v869_v59, %v868_v49  ;;  %v902_v1 = vpack.c.bf16 %v885_v62, %v884_v55  ;;  %v4108_v55 = vld [vmem:[#allocation13 + $0x50] ss:$12 sps:$4 sm:$0xff]  }
 0x25c   : > { %3631 = vmatprep.mubr.bf16.mxu1 %v894_v63  ;;  %3666 = vmatpush3.bf16.msra.mxu0 %v4086_v3 }
 0x25d   : > { %3632 = vmatmul.mubr.bf16.gmra.mrb[28].mxu1 %v895_v61 }
 0x25e   : > { %3635 = vmatprep.mubr.bf16.mxu1 %v5096_v37  ;;  %v4090_v37 = vld [vmem:[#allocation13 + $0x18] ss:$12 sps:$4 sm:$0xff]  }
 0x25f   : > { %1642 = vmatpush1.bf16.msra.mxu1 %v4090_v37 }
 0x265   : > { %3636 = vmatmul.mubr.bf16.gmra.mrb[32].mxu1 %v5093_v34  ;;  %v4102_v34 = vld [vmem:[#allocation13 + $0x8] ss:$12 sps:$4 sm:$0xff]  }
 0x266   : > { %3639 = vmatprep.mubr.bf16.mxu1 %v898_v5  ;;  %v4095_v5 = vld [vmem:[#allocation13 + $0x34] ss:$12 sps:$4 sm:$0xff]   ;;  %3699 = vmatprep.subr.bf16.mxu0 %v4102_v34 }
 0x267   : > { %1643 = vmatprep.subr.bf16.mxu1 %v4095_v5  ;;  %v4113_v5 = vld [vmem:[#allocation13 + $0x80] ss:$12 sps:$4 sm:$0xff]  }
 0x26d   : > { %3640 = vmatmul.mubr.bf16.gmra.mrb[36].mxu1 %v5105_v2  ;;  %v4093_v2 = vld [vmem:[#allocation13 + $0x30] ss:$12 sps:$4 sm:$0xff]  }
 0x26e   : > { %3643 = vmatprep.mubr.bf16.mxu1 %v900_v35  ;;  %1644 = vmatpush1.bf16.msra.mxu1 %v4093_v2 }
 0x26f   : > { %1645 = vmatprep.subr.bf16.mxu1 %v4098_v9 }
 0x272   : > { %1646 = vmatpush1.bf16.msra.mxu1 %v4096_v10 }
 0x273   : > { %1647 = vmatprep.subr.bf16.mxu1 %v4101_v11 }
 0x275   : > { %3644 = vmatmul.mubr.bf16.gmra.mrb[40].mxu1 %v901_v31 }
 0x276   : > { %3647 = vmatprep.mubr.bf16.mxu1 %v902_v1  ;;  %1648 = vmatpush1.bf16.msra.mxu1 %v4099_v12 }
 0x277   : > { %1649 = vmatprep.subr.bf16.mxu1 %v4106_v13 }
 0x27a   : > { %1650 = vmatpush1.bf16.msra.mxu1 %v4104_v14 }
 0x27b   : > { %1651 = vmatprep.subr.bf16.mxu1 %v4111_v15 }
 0x27d   : > { %3648 = vmatmul.mubr.bf16.gmra.mrb[44].mxu1 %v903_v0 }
 0x27e   : > { %1652 = vmatpush1.bf16.msra.mxu1 %v4109_v16 }
 0x318   : > { %v3621_v18 = vpop.f32.mrb[16].mxu1 }
 0x319   : > { %v1016_v19 = vadd.f32 %v3621_v18, %v5126_v17  ;;  %v1007_v20 = vpop.f32.mrb[17].mxu1 }
 0x31a   : > { %v1008_v21 = vadd.f32 %v5126_v17, %v1007_v20  ;;  %v3622_v22 = vpop.f32.mrb[18].mxu1 }
 0x31b   : > { %v1019_v23 = vadd.f32 %v3622_v22, %v5126_v17  ;;  %v1010_v24 = vpop.f32.mrb[19].mxu1  ;;  %v1136_v26 = vmax.f32 %v1016_v19, 0.0 }
 0x31c   : > { %v1011_v25 = vadd.f32 %v5126_v17, %v1010_v24  ;;  %v1134_v28 = vmax.f32 %v1008_v21, 0.0 }
 0x31d   : > { %v1137_v27 = vmax.f32 %v1019_v23, 0.0 }
 0x31e   : > { %v1135_v29 = vmax.f32 %v1011_v25, 0.0 }
 0x31f   : > { %v1167_v30 = vpack.c.bf16 %v1137_v27, %v1136_v26 }
 0x320   : > { %v1166_v31 = vpack.c.bf16 %v1135_v29, %v1134_v28  ;;  %v3625_v32 = vpop.f32.mrb[20].mxu1 }
 0x321   : > { %v1032_v33 = vadd.f32 %v3625_v32, %v5126_v17  ;;  %v1023_v35 = vpop.f32.mrb[21].mxu1 }
 0x322   : > { %v1024_v38 = vadd.f32 %v5126_v17, %v1023_v35  ;;  %v3626_v39 = vpop.f32.mrb[22].mxu1  ;;  %3667 = vmatprep.mubr.bf16.mxu0 %v1166_v31 }
 0x323   : > { %v1140_v40 = vmax.f32 %v1032_v33, 0.0  ;;  %v1035_v41 = vadd.f32 %v3626_v39, %v5126_v17  ;;  %v1026_v44 = vpop.f32.mrb[23].mxu1  ;;  %3668 = vmatmul.mubr.bf16.vlgmr.msra.gmra.mrb[16].mxu0 %v1167_v30 }
 0x324   : > { %v1138_v45 = vmax.f32 %v1024_v38, 0.0  ;;  %v1027_v46 = vadd.f32 %v5126_v17, %v1026_v44  ;;  %3700 = vmatpush3.bf16.msra.mxu0 %v4102_v34 }
 0x325   : > { %v1141_v47 = vmax.f32 %v1035_v41, 0.0  ;;  %3701 = vmatprep.subr.bf16.mxu0 %v4103_v36 }
 0x326   : > { %v1139_v49 = vmax.f32 %v1027_v46, 0.0 }
 0x327   : > { %v1169_v50 = vpack.c.bf16 %v1141_v47, %v1140_v40 }
 0x328   : > { %v1168_v51 = vpack.c.bf16 %v1139_v49, %v1138_v45  ;;  %v3629_v52 = vpop.f32.mrb[24].mxu1  ;;  %3702 = vmatpush3.bf16.msra.mxu0 %v4103_v36 }
 0x329   : > { %v1048_v53 = vadd.f32 %v3629_v52, %v5126_v17  ;;  %v1039_v54 = vpop.f32.mrb[25].mxu1  ;;  %3703 = vmatprep.subr.bf16.mxu0 %v4107_v48 }
 0x32a   : > { %v1040_v58 = vadd.f32 %v5126_v17, %v1039_v54  ;;  %3671 = vmatprep.mubr.bf16.mxu0 %v1168_v51  ;;  %v3630_v59 = vpop.f32.mrb[26].mxu1 }
 0x32b   : > { %v1144_v60 = vmax.f32 %v1048_v53, 0.0  ;;  %v1051_v61 = vadd.f32 %v3630_v59, %v5126_v17  ;;  %3672 = vmatmul.mubr.bf16.gmra.mrb[20].mxu0 %v1169_v50  ;;  %v1042_v62 = vpop.f32.mrb[27].mxu1 }
 0x32c   : > { %v1142_v63 = vmax.f32 %v1040_v58, 0.0  ;;  %v1043_v0 = vadd.f32 %v5126_v17, %v1042_v62  ;;  %3704 = vmatpush3.bf16.msra.mxu0 %v4107_v48 }
 0x32d   : > { %v1145_v1 = vmax.f32 %v1051_v61, 0.0  ;;  %3705 = vmatprep.subr.bf16.mxu0 %v4108_v55 }
 0x32e   : > { %v1143_v3 = vmax.f32 %v1043_v0, 0.0 }
 0x32f   : > { %v1171_v4 = vpack.c.bf16 %v1145_v1, %v1144_v60 }
 0x330   : > { %v1170_v7 = vpack.c.bf16 %v1143_v3, %v1142_v63  ;;  %v3633_v8 = vpop.f32.mrb[28].mxu1  ;;  %3706 = vmatpush3.bf16.msra.mxu0 %v4108_v55 }
 0x331   : > { %v1064_v37 = vadd.f32 %v3633_v8, %v5126_v17  ;;  %v1055_v34 = vpop.f32.mrb[29].mxu1  ;;  %3707 = vmatprep.subr.bf16.mxu0 %v4112_v6 }
 0x332   : > { %3675 = vmatprep.mubr.bf16.mxu0 %v1170_v7  ;;  %v1056_v2 = vadd.f32 %v5126_v17, %v1055_v34  ;;  %v3634_v9 = vpop.f32.mrb[30].mxu1 }
 0x333   : > { %3676 = vmatmul.mubr.bf16.gmra.mrb[24].mxu0 %v1171_v4  ;;  %v1148_v10 = vmax.f32 %v1064_v37, 0.0  ;;  %v1067_v11 = vadd.f32 %v3634_v9, %v5126_v17  ;;  %v1058_v12 = vpop.f32.mrb[31].mxu1 }
 0x334   : > { %v1146_v13 = vmax.f32 %v1056_v2, 0.0  ;;  %v1059_v14 = vadd.f32 %v5126_v17, %v1058_v12  ;;  %3708 = vmatpush3.bf16.msra.mxu0 %v4112_v6 }
 0x335   : > { %v1149_v15 = vmax.f32 %v1067_v11, 0.0  ;;  %3709 = vmatprep.subr.bf16.mxu0 %v4113_v5 }
 0x336   : > { %v1147_v16 = vmax.f32 %v1059_v14, 0.0 }
 0x337   : > { %v1173_v18 = vpack.c.bf16 %v1149_v15, %v1148_v10 }
 0x338   : > { %v1172_v19 = vpack.c.bf16 %v1147_v16, %v1146_v13  ;;  %v3637_v20 = vpop.f32.mrb[32].mxu1  ;;  %3710 = vmatpush3.bf16.msra.mxu0 %v4113_v5  ;;  %v4117_v16 = vld [vmem:[#allocation13 + $0x98] ss:$12 sps:$4 sm:$0xff]  }
 0x339   : > { %v1080_v21 = vadd.f32 %v3637_v20, %v5126_v17  ;;  %v1071_v22 = vpop.f32.mrb[33].mxu1  ;;  %3711 = vmatprep.subr.bf16.mxu0 %v4117_v16  ;;  %v4118_v20 = vld [vmem:[#allocation13 + $0xb0] ss:$12 sps:$4 sm:$0xff]  }
 0x33a   : > { %3679 = vmatprep.mubr.bf16.mxu0 %v1172_v19  ;;  %v1072_v23 = vadd.f32 %v5126_v17, %v1071_v22  ;;  %v3638_v24 = vpop.f32.mrb[34].mxu1  ;;  %v4116_v19 = vld [vmem:[#allocation13 + $0xac] ss:$12 sps:$4 sm:$0xff]  }
 0x33b   : > { %3680 = vmatmul.mubr.bf16.gmra.mrb[28].mxu0 %v1173_v18  ;;  %v1152_v25 = vmax.f32 %v1080_v21, 0.0  ;;  %v1083_v26 = vadd.f32 %v3638_v24, %v5126_v17  ;;  %v1074_v27 = vpop.f32.mrb[35].mxu1  ;;  %v4114_v18 = vld [vmem:[#allocation13 + $0xa8] ss:$12 sps:$4 sm:$0xff]   ;;  %1653 = vmatprep.subr.bf16.mxu1 %v4116_v19  ;;  %v4617_v21 = vmov 0  }
 0x33c   : > { %v1150_v28 = vmax.f32 %v1072_v23, 0.0  ;;  %v1075_v29 = vadd.f32 %v5126_v17, %v1074_v27  ;;  %3712 = vmatpush3.bf16.msra.mxu0 %v4117_v16  ;;  %1654 = vmatpush1.bf16.msra.mxu1 %v4114_v18  ;;  %v4119_v27 = vld [vmem:[#allocation16] sm:$0xff]  }
 0x33d   : > { %v1153_v30 = vmax.f32 %v1083_v26, 0.0  ;;  %3713 = vmatprep.subr.bf16.mxu0 %v4118_v20  ;;  %1671 = vmatprep.mubr.bf16.mxu1 %v4617_v21  ;;  %v4152_v19 = vld [vmem:[%s5013_s19 + $0x48] sm:$0xff] }
 0x33e   : > { %v1151_v31 = vmax.f32 %v1075_v29, 0.0 }
 0x33f   : > { %v1175_v32 = vpack.c.bf16 %v1153_v30, %v1152_v25 }
 0x340   : > { %v1174_v33 = vpack.c.bf16 %v1151_v31, %v1150_v28  ;;  %v3641_v35 = vpop.f32.mrb[36].mxu1  ;;  %3714 = vmatpush3.bf16.msra.mxu0 %v4118_v20  ;;  %v4120_v28 = vld [vmem:[#allocation16 + $0x40] sm:$0xff]  }
 0x341   : > { %v1096_v36 = vadd.f32 %v3641_v35, %v5126_v17  ;;  %v1087_v38 = vpop.f32.mrb[37].mxu1  ;;  %3747 = vmatprep.subr.bf16.mxu0 %v4119_v27  ;;  %3795 = vmatprep.subr.bf16.mxu1 %v4120_v28  ;;  %v4144_v35 = vld [vmem:[%s5013_s19 + $0x18] sm:$0xff] }
 0x342   : > { %3683 = vmatprep.mubr.bf16.mxu0 %v1174_v33  ;;  %v1088_v39 = vadd.f32 %v5126_v17, %v1087_v38  ;;  %v3642_v40 = vpop.f32.mrb[38].mxu1  ;;  %v4145_v38 = vld [vmem:[%s5013_s19] sm:$0xff] }
 0x343   : > { %3684 = vmatmul.mubr.bf16.gmra.mrb[32].mxu0 %v1175_v32  ;;  %v1156_v41 = vmax.f32 %v1096_v36, 0.0  ;;  %v1099_v44 = vadd.f32 %v3642_v40, %v5126_v17  ;;  %v1090_v45 = vpop.f32.mrb[39].mxu1  ;;  %v4143_v32 = vld [vmem:[%s5013_s19 + $0x10] sm:$0xff]  ;;  %v4146_v40 = vld [vmem:[%s5013_s19 + $0x8] sm:$0xff] }
 0x344   : > { %v1154_v46 = vmax.f32 %v1088_v39, 0.0  ;;  %v1091_v47 = vadd.f32 %v5126_v17, %v1090_v45 }
 0x345   : > { %v1157_v48 = vmax.f32 %v1099_v44, 0.0 }
 0x346   : > { %v1155_v49 = vmax.f32 %v1091_v47, 0.0 }
 0x347   : > { %v1177_v50 = vpack.c.bf16 %v1157_v48, %v1156_v41 }
 0x348   : > { %v1176_v51 = vpack.c.bf16 %v1155_v49, %v1154_v46  ;;  %v3645_v52 = vpop.f32.mrb[40].mxu1  ;;  %v4121_v49 = vld [vmem:[#allocation16 + $0x8] sm:$0xff]  }
 0x349   : > { %v1112_v53 = vadd.f32 %v3645_v52, %v5126_v17  ;;  %v1103_v54 = vpop.f32.mrb[41].mxu1 }
 0x34a   : > { %3687 = vmatprep.mubr.bf16.mxu0 %v1176_v51  ;;  %v1104_v55 = vadd.f32 %v5126_v17, %v1103_v54  ;;  %v3646_v58 = vpop.f32.mrb[42].mxu1 }
 0x34b   : > { %3688 = vmatmul.mubr.bf16.gmra.mrb[36].mxu0 %v1177_v50  ;;  %v1160_v59 = vmax.f32 %v1112_v53, 0.0  ;;  %v1115_v60 = vadd.f32 %v3646_v58, %v5126_v17  ;;  %v1106_v61 = vpop.f32.mrb[43].mxu1  ;;  %v4122_v50 = vld [vmem:[#allocation16 + $0x48] sm:$0xff]  }
 0x34c   : > { %v1158_v62 = vmax.f32 %v1104_v55, 0.0  ;;  %v1107_v63 = vadd.f32 %v5126_v17, %v1106_v61  ;;  %v4147_v58 = vld [vmem:[%s5013_s19 + $0x30] sm:$0xff] }
 0x34d   : > { %v1161_v0 = vmax.f32 %v1115_v60, 0.0  ;;  %v4148_v60 = vld [vmem:[%s5013_s19 + $0x38] sm:$0xff] }
 0x34e   : > { %v1159_v1 = vmax.f32 %v1107_v63, 0.0  ;;  %v4124_v63 = vld [vmem:[#allocation16 + $0x50] sm:$0xff]  }
 0x34f   : > { %v1179_v6 = vpack.c.bf16 %v1161_v0, %v1160_v59  ;;  %v4149_v0 = vld [vmem:[%s5013_s19 + $0x20] sm:$0xff] }
 0x350   : > { %v1178_v3 = vpack.c.bf16 %v1159_v1, %v1158_v62  ;;  %v3649_v4 = vpop.f32.mrb[44].mxu1  ;;  %v4123_v62 = vld [vmem:[#allocation16 + $0x10] sm:$0xff]  }
 0x351   : > { %v1128_v7 = vadd.f32 %v3649_v4, %v5126_v17  ;;  %v1119_v8 = vpop.f32.mrb[45].mxu1 }
 0x352   : > { %3691 = vmatprep.mubr.bf16.mxu0 %v1178_v3  ;;  %v1120_v37 = vadd.f32 %v5126_v17, %v1119_v8  ;;  %v3650_v34 = vpop.f32.mrb[46].mxu1 }
 0x353   : > { %3692 = vmatmul.mubr.bf16.gmra.mrb[40].mxu0 %v1179_v6  ;;  %v1164_v5 = vmax.f32 %v1128_v7, 0.0  ;;  %v1131_v2 = vadd.f32 %v3650_v34, %v5126_v17  ;;  %v1122_v9 = vpop.f32.mrb[47].mxu1  ;;  %v4150_v6 = vld [vmem:[%s5013_s19 + $0x28] sm:$0xff] }
 0x354   : > { %v1162_v10 = vmax.f32 %v1120_v37, 0.0  ;;  %v1123_v11 = vadd.f32 %v5126_v17, %v1122_v9  ;;  %v5161_v17 = vld [vmem:[#allocation11] ss:$0 sm:$0xff] }
 0x355   : > { %v1165_v12 = vmax.f32 %v1131_v2, 0.0  ;;  %v4126_v2 = vld [vmem:[#allocation16 + $0x58] sm:$0xff]  }
 0x356   : > { %v1163_v13 = vmax.f32 %v1123_v11, 0.0 }
 0x357   : > { %v1181_v14 = vpack.c.bf16 %v1165_v12, %v1164_v5  ;;  %v4125_v5 = vld [vmem:[#allocation16 + $0x18] sm:$0xff]  }
 0x358   : > { %v1180_v15 = vpack.c.bf16 %v1163_v13, %v1162_v10 }
 0x35a   : > { %3695 = vmatprep.mubr.bf16.mxu0 %v1180_v15 }
 0x35b   : > { %3696 = vmatmul.mubr.bf16.gmra.mrb[44].mxu0 %v1181_v14  ;;  %v4151_v14 = vld [vmem:[%s5013_s19 + $0x40] sm:$0xff] }
 0x3f6   : > { %v3669_v22 = vpop.f32.mrb[16].mxu0 }
 0x3f7   : > { %v1296_v23 = vadd.f32 %v3669_v22, %v5161_v17  ;;  %v1287_v24 = vpop.f32.mrb[17].mxu0 }
 0x3f8   : > { %v1288_v25 = vadd.f32 %v5161_v17, %v1287_v24  ;;  %v3670_v26 = vpop.f32.mrb[18].mxu0 }
 0x3f9   : > { %v1299_v29 = vadd.f32 %v3670_v26, %v5161_v17  ;;  %v1290_v30 = vpop.f32.mrb[19].mxu0  ;;  %v1416_v33 = vadd.f32 %v4143_v32, %v1296_v23 }
 0x3fa   : > { %v1291_v31 = vadd.f32 %v5161_v17, %v1290_v30  ;;  %v1414_v39 = vadd.f32 %v4145_v38, %v1288_v25  ;;  %v4153_v30 = vld [vmem:[%s5013_s19 + $0x60] sm:$0xff] }
 0x3fb   : > { %v1417_v36 = vadd.f32 %v4144_v35, %v1299_v29  ;;  %v4154_v35 = vld [vmem:[%s5013_s19 + $0x68] sm:$0xff] }
 0x3fc   : > { %v1415_v41 = vadd.f32 %v4146_v40, %v1291_v31 }
 0x3fd   : > { %v1447_v44 = vpack.c.bf16 %v1417_v36, %v1416_v33 }
 0x3fe   : > { %v1446_v45 = vpack.c.bf16 %v1415_v41, %v1414_v39  ;;  %v3673_v46 = vpop.f32.mrb[20].mxu0 }
 0x3ff   : > { %v1312_v47 = vadd.f32 %v3673_v46, %v5161_v17  ;;  %v1303_v48 = vpop.f32.mrb[21].mxu0 }
 0x400   : > { %v1304_v51 = vadd.f32 %v5161_v17, %v1303_v48  ;;  %v3674_v52 = vpop.f32.mrb[22].mxu0  ;;  %1672 = vmatmul.mubr.bf16.vlgmr.msra.gmra.mrb[48].mxu1 %v1446_v45  ;;  %3715 = vmatprep.mubr.bf16.mxu0 %v1446_v45 }
 0x401   : > { %v1315_v53 = vadd.f32 %v3674_v52, %v5161_v17  ;;  %v1306_v54 = vpop.f32.mrb[23].mxu0  ;;  %3716 = vmatmul.mubr.bf16.vlgmr.msra.gmra.mrb[48].mxu0 %v1447_v44  ;;  %1681 = vmatprep.mubr.bf16.mxu1 %v4617_v21  ;;  %v1420_v59 = vadd.f32 %v4147_v58, %v1312_v47  ;;  %v4157_v52 = vld [vmem:[%s5013_s19 + $0x98] sm:$0xff] }
 0x402   : > { %v1307_v55 = vadd.f32 %v5161_v17, %v1306_v54  ;;  %3748 = vmatpush3.bf16.msra.mxu0 %v4119_v27  ;;  %3796 = vmatpush3.bf16.msra.mxu1 %v4120_v28  ;;  %v1418_v1 = vadd.f32 %v4149_v0, %v1304_v51  ;;  %v4158_v54 = vld [vmem:[%s5013_s19 + $0x88] sm:$0xff] }
 0x403   : > { %v1421_v61 = vadd.f32 %v4148_v60, %v1315_v53  ;;  %3749 = vmatprep.subr.bf16.mxu0 %v4121_v49  ;;  %3797 = vmatprep.subr.bf16.mxu1 %v4122_v50 }
 0x404   : > { %v1419_v3 = vadd.f32 %v4150_v6, %v1307_v55 }
 0x405   : > { %v1449_v4 = vpack.c.bf16 %v1421_v61, %v1420_v59 }
 0x406   : > { %v3677_v7 = vpop.f32.mrb[24].mxu0  ;;  %v1448_v8 = vpack.c.bf16 %v1419_v3, %v1418_v1  ;;  %3750 = vmatpush3.bf16.msra.mxu0 %v4121_v49  ;;  %3798 = vmatpush3.bf16.msra.mxu1 %v4122_v50  ;;  %v4156_v49 = vld [vmem:[%s5013_s19 + $0x80] sm:$0xff]  ;;  %v4159_v1 = vld [vmem:[%s5013_s19 + $0xb0] sm:$0xff] }
 0x407   : > { %v1328_v37 = vadd.f32 %v3677_v7, %v5161_v17  ;;  %v1319_v34 = vpop.f32.mrb[25].mxu0  ;;  %3751 = vmatprep.subr.bf16.mxu0 %v4123_v62  ;;  %3799 = vmatprep.subr.bf16.mxu1 %v4124_v63  ;;  %v4160_v7 = vld [vmem:[%s5013_s19 + $0xa0] sm:$0xff] }
 0x408   : > { %v1320_v9 = vadd.f32 %v5161_v17, %v1319_v34  ;;  %1682 = vmatmul.mubr.bf16.gmra.mrb[52].mxu1 %v1447_v44  ;;  %3719 = vmatprep.mubr.bf16.mxu0 %v1448_v8  ;;  %v3678_v10 = vpop.f32.mrb[26].mxu0  ;;  %v4161_v34 = vld [vmem:[%s5013_s19 + $0xb8] sm:$0xff] }
 0x409   : > { %v1424_v11 = vadd.f32 %v1328_v37, %v5060_v42  ;;  %v1331_v12 = vadd.f32 %v3678_v10, %v5161_v17  ;;  %3720 = vmatmul.mubr.bf16.gmra.mrb[52].mxu0 %v1449_v4  ;;  %v1322_v13 = vpop.f32.mrb[27].mxu0  ;;  %1691 = vmatprep.mubr.bf16.mxu1 %v4617_v21 }
 0x40a   : > { %v1422_v15 = vadd.f32 %v4151_v14, %v1320_v9  ;;  %v1323_v16 = vadd.f32 %v5161_v17, %v1322_v13  ;;  %3752 = vmatpush3.bf16.msra.mxu0 %v4123_v62  ;;  %3800 = vmatpush3.bf16.msra.mxu1 %v4124_v63 }
 0x40b   : > { %v1425_v18 = vadd.f32 %v1331_v12, %v5063_v43  ;;  %3753 = vmatprep.subr.bf16.mxu0 %v4125_v5  ;;  %3801 = vmatprep.subr.bf16.mxu1 %v4126_v2 }
 0x40c   : > { %v1423_v20 = vadd.f32 %v4152_v19, %v1323_v16 }
 0x40d   : > { %v5189_v22 = vpack.c.bf16 %v1425_v18, %v1424_v11  ;;  %v4163_v18 = vld [vmem:[%s5013_s19 + $0xd0] sm:$0xff] }
 0x40e   : > { %v1450_v42 = vpack.c.bf16 %v1423_v20, %v1422_v15  ;;  %v3681_v23 = vpop.f32.mrb[28].mxu0  ;;  %3754 = vmatpush3.bf16.msra.mxu0 %v4125_v5  ;;  %3802 = vmatpush3.bf16.msra.mxu1 %v4126_v2  ;;  %v4162_v2 = vld [vmem:[%s5013_s19 + $0xa8] sm:$0xff] }
 0x40f   : > { %v1344_v24 = vadd.f32 %v3681_v23, %v5161_v17  ;;  %v1335_v25 = vpop.f32.mrb[29].mxu0  ;;  %v4164_v23 = vld [vmem:[%s5013_s19 + $0xc0] sm:$0xff] }
 0x410   : > { %1692 = vmatmul.mubr.bf16.gmra.mrb[56].mxu1 %v1448_v8  ;;  %3723 = vmatprep.mubr.bf16.mxu0 %v1450_v42  ;;  %v1336_v26 = vadd.f32 %v5161_v17, %v1335_v25  ;;  %v3682_v43 = vpop.f32.mrb[30].mxu0 }
 0x411   : > { %3724 = vmatmul.mubr.bf16.gmra.mrb[56].mxu0 %v5189_v22  ;;  %v1428_v27 = vadd.f32 %v1344_v24, %v5074_v56  ;;  %1701 = vmatprep.mubr.bf16.mxu1 %v4617_v21  ;;  %v1347_v28 = vadd.f32 %v3682_v43, %v5161_v17  ;;  %v1338_v29 = vpop.f32.mrb[31].mxu0  ;;  %v4166_v43 = vld [vmem:[%s5013_s19 + $0xc8] sm:$0xff] }
 0x412   : > { %v1426_v31 = vadd.f32 %v4153_v30, %v1336_v26  ;;  %v1339_v32 = vadd.f32 %v5161_v17, %v1338_v29  ;;  %v4165_v26 = vld [vmem:[%s5013_s19 + $0xd8] sm:$0xff] }
 0x413   : > { %v1429_v33 = vadd.f32 %v1347_v28, %v5077_v57  ;;  %v4155_v57 = vld [vmem:[%s5013_s19 + $0x90] sm:$0xff] }
 0x414   : > { %v1427_v36 = vadd.f32 %v4154_v35, %v1339_v32 }
 0x415   : > { %v5201_v38 = vpack.c.bf16 %v1429_v33, %v1428_v27 }
 0x416   : > { %v5203_v39 = vpack.c.bf16 %v1427_v36, %v1426_v31  ;;  %v3685_v56 = vpop.f32.mrb[32].mxu0  ;;  %v4167_v36 = vld [vmem:[%s5013_s19 + $0xf0] sm:$0xff] }
 0x417   : > { %v1360_v40 = vadd.f32 %v3685_v56, %v5161_v17  ;;  %v1351_v41 = vpop.f32.mrb[33].mxu0 }
 0x418   : > { %1702 = vmatmul.mubr.bf16.gmra.mrb[60].mxu1 %v1449_v4  ;;  %3727 = vmatprep.mubr.bf16.mxu0 %v5203_v39  ;;  %v1352_v44 = vadd.f32 %v5161_v17, %v1351_v41  ;;  %v3686_v45 = vpop.f32.mrb[34].mxu0 }
 0x419   : > { %1711 = vmatprep.mubr.bf16.mxu1 %v4617_v21  ;;  %3728 = vmatmul.mubr.bf16.gmra.mrb[60].mxu0 %v5201_v38  ;;  %v1432_v46 = vadd.f32 %v4155_v57, %v1360_v40  ;;  %v1363_v47 = vadd.f32 %v3686_v45, %v5161_v17  ;;  %v1354_v48 = vpop.f32.mrb[35].mxu0 }
 0x41a   : > { %v1430_v50 = vadd.f32 %v4156_v49, %v1352_v44  ;;  %v1355_v51 = vadd.f32 %v5161_v17, %v1354_v48  ;;  %v4168_v44 = vld [vmem:[%s5013_s19 + $0xe0] sm:$0xff]  ;;  %v4170_v48 = vld [vmem:[%s5013_s19 + $0xe8] sm:$0xff] }
 0x41b   : > { %v1433_v53 = vadd.f32 %v4157_v52, %v1363_v47  ;;  %v4130_v52 = vld [vmem:[#allocation16 + $0x68] sm:$0xff]  }
 0x41c   : > { %v1431_v55 = vadd.f32 %v4158_v54, %v1355_v51  ;;  %v4128_v51 = vld [vmem:[#allocation16 + $0x60] sm:$0xff]   ;;  %v4132_v54 = vld [vmem:[#allocation16 + $0x70] sm:$0xff]  }
 0x41d   : > { %v5216_v58 = vpack.c.bf16 %v1433_v53, %v1432_v46  ;;  %v4169_v46 = vld [vmem:[%s5013_s19 + $0xf8] sm:$0xff]  ;;  %3803 = vmatprep.subr.bf16.mxu1 %v4128_v51 }
 0x41e   : > { %v5218_v59 = vpack.c.bf16 %v1431_v55, %v1430_v50  ;;  %v3689_v60 = vpop.f32.mrb[36].mxu0  ;;  %3804 = vmatpush3.bf16.msra.mxu1 %v4128_v51  ;;  %v4131_v53 = vld [vmem:[#allocation16 + $0x30] sm:$0xff]   ;;  %v4133_v55 = vld [vmem:[#allocation16 + $0x38] sm:$0xff]  }
 0x41f   : > { %v1376_v61 = vadd.f32 %v3689_v60, %v5161_v17  ;;  %v1367_v62 = vpop.f32.mrb[37].mxu0  ;;  %3805 = vmatprep.subr.bf16.mxu1 %v4130_v52  ;;  %v1496_v60 = vlaneseq }
 0x420   : > { %1712 = vmatmul.mubr.bf16.gmra.mrb[64].mxu1 %v1450_v42  ;;  %3731 = vmatprep.mubr.bf16.mxu0 %v5218_v59  ;;  %v1368_v63 = vadd.f32 %v5161_v17, %v1367_v62  ;;  %v3690_v0 = vpop.f32.mrb[38].mxu0 }
 0x421   : > { %1721 = vmatprep.mubr.bf16.mxu1 %v4617_v21  ;;  %3732 = vmatmul.mubr.bf16.gmra.mrb[64].mxu0 %v5216_v58  ;;  %v1436_v6 = vadd.f32 %v4159_v1, %v1376_v61  ;;  %v1379_v3 = vadd.f32 %v3690_v0, %v5161_v17  ;;  %v1370_v4 = vpop.f32.mrb[39].mxu0  ;;  %v1497_v61 = vshrl.u32 %v1496_v60, 7 }
 0x422   : > { %v1434_v8 = vadd.f32 %v4160_v7, %v1368_v63  ;;  %v1371_v37 = vadd.f32 %v5161_v17, %v1370_v4  ;;  %3806 = vmatpush3.bf16.msra.mxu1 %v4130_v52  ;;  %v1494_v63 = vld [vmem:[#allocation14] sm:$0x7] }
 0x423   : > { %v1437_v5 = vadd.f32 %v4161_v34, %v1379_v3  ;;  %3807 = vmatprep.subr.bf16.mxu1 %v4132_v54  ;;  %v1498_v62 = vsub.s32 0, %v1497_v61  ;;  %v1502_v0 = vsub.s32 1, %v1497_v61  ;;  %v1506_v1 = vsub.s32 2, %v1497_v61 }
 0x424   : > { %v1435_v9 = vadd.f32 %v4162_v2, %v1371_v37 }
 0x425   : > { %v5231_v10 = vpack.c.bf16 %v1437_v5, %v1436_v6  ;;  %v5269_v6 = vrot.slane %v1494_v63, %v1498_v62  ;;  %v5271_v3 = vrot.slane %v1494_v63, %v1502_v0  ;;  %v5273_v4 = vrot.slane %v1494_v63, %v1506_v1 }
 0x426   : > { %v1456_v11 = vpack.c.bf16 %v1435_v9, %v1434_v8  ;;  %v3693_v12 = vpop.f32.mrb[40].mxu0  ;;  %3808 = vmatpush3.bf16.msra.mxu1 %v4132_v54 }
 0x427   : > { %v1392_v13 = vadd.f32 %v3693_v12, %v5161_v17  ;;  %v1383_v14 = vpop.f32.mrb[41].mxu0 }
 0x428   : > { %1722 = vmatmul.mubr.bf16.gmra.mrb[68].mxu1 %v5189_v22  ;;  %3735 = vmatprep.mubr.bf16.mxu0 %v1456_v11  ;;  %v1384_v15 = vadd.f32 %v5161_v17, %v1383_v14  ;;  %v3694_v16 = vpop.f32.mrb[42].mxu0 }
 0x429   : > { %1731 = vmatprep.mubr.bf16.mxu1 %v4617_v21  ;;  %3736 = vmatmul.mubr.bf16.gmra.mrb[68].mxu0 %v5231_v10  ;;  %v1440_v19 = vadd.f32 %v4163_v18, %v1392_v13  ;;  %v1395_v20 = vadd.f32 %v3694_v16, %v5161_v17  ;;  %v1386_v42 = vpop.f32.mrb[43].mxu0 }
 0x42a   : > { %v1438_v24 = vadd.f32 %v4164_v23, %v1384_v15  ;;  %v1387_v25 = vadd.f32 %v5161_v17, %v1386_v42 }
 0x42b   : > { %v1441_v22 = vadd.f32 %v4165_v26, %v1395_v20 }
 0x42c   : > { %v1439_v27 = vadd.f32 %v4166_v43, %v1387_v25 }
 0x42d   : > { %v1459_v28 = vpack.c.bf16 %v1441_v22, %v1440_v19 }
 0x42e   : > { %v1458_v29 = vpack.c.bf16 %v1439_v27, %v1438_v24  ;;  %v3697_v30 = vpop.f32.mrb[44].mxu0 }
 0x42f   : > { %v1408_v31 = vadd.f32 %v3697_v30, %v5161_v17  ;;  %v1399_v32 = vpop.f32.mrb[45].mxu0 }
 0x430   : > { %1732 = vmatmul.mubr.bf16.gmra.mrb[72].mxu1 %v5203_v39  ;;  %3739 = vmatprep.mubr.bf16.mxu0 %v1458_v29  ;;  %v1400_v33 = vadd.f32 %v5161_v17, %v1399_v32  ;;  %v3698_v35 = vpop.f32.mrb[46].mxu0 }
 0x431   : > { %1741 = vmatprep.mubr.bf16.mxu1 %v4617_v21  ;;  %3740 = vmatmul.mubr.bf16.gmra.mrb[72].mxu0 %v1459_v28  ;;  %v1444_v56 = vadd.f32 %v4167_v36, %v1408_v31  ;;  %v1411_v40 = vadd.f32 %v3698_v35, %v5161_v17  ;;  %v1402_v41 = vpop.f32.mrb[47].mxu0 }
 0x432   : > { %v1442_v45 = vadd.f32 %v4168_v44, %v1400_v33  ;;  %v1403_v57 = vadd.f32 %v5161_v17, %v1402_v41  ;;  %v4127_v17 = vld [vmem:[#allocation16 + $0x20] sm:$0xff]  }
 0x433   : > { %v1445_v47 = vadd.f32 %v4169_v46, %v1411_v40  ;;  %3755 = vmatprep.subr.bf16.mxu0 %v4127_v17 }
 0x434   : > { %v1443_v39 = vadd.f32 %v4170_v48, %v1403_v57  ;;  %3756 = vmatpush3.bf16.msra.mxu0 %v4127_v17 }
 0x435   : > { %v1461_v49 = vpack.c.bf16 %v1445_v47, %v1444_v56 }
 0x436   : > { %v1460_v50 = vpack.c.bf16 %v1443_v39, %v1442_v45 }
 0x438   : > { %1742 = vmatmul.mubr.bf16.gmra.mrb[76].mxu1 %v5201_v38  ;;  %3743 = vmatprep.mubr.bf16.mxu0 %v1460_v50  ;;  %v4129_v38 = vld [vmem:[#allocation16 + $0x28] sm:$0xff]  }
 0x439   : > { %1751 = vmatprep.mubr.bf16.mxu1 %v4617_v21  ;;  %3744 = vmatmul.mubr.bf16.gmra.mrb[76].mxu0 %v1461_v49 }
 0x43a   : > { %3757 = vmatprep.subr.bf16.mxu0 %v4129_v38 }
 0x43b   : > { %3758 = vmatpush3.bf16.msra.mxu0 %v4129_v38 }
 0x43c   : > { %3759 = vmatprep.subr.bf16.mxu0 %v4131_v53 }
 0x43f   : > { %3760 = vmatpush3.bf16.msra.mxu0 %v4131_v53 }
 0x440   : > { %1752 = vmatmul.mubr.bf16.gmra.mrb[80].mxu1 %v5218_v59  ;;  %3761 = vmatprep.subr.bf16.mxu0 %v4133_v55  ;;  %v5266_v59 = vld [vmem:[#allocation16 + $0x80] sm:$0xff]  }
 0x441   : > { %1761 = vmatprep.mubr.bf16.mxu1 %v4617_v21 }
 0x443   : > { %3762 = vmatpush3.bf16.msra.mxu0 %v4133_v55 }
 0x444   : > { %3843 = vmatprep.subr.bf16.mxu0 %v5266_v59 }
 0x448   : > { %1762 = vmatmul.mubr.bf16.gmra.mrb[84].mxu1 %v5216_v58  ;;  %v4134_v58 = vld [vmem:[#allocation16 + $0x78] sm:$0xff]  }
 0x449   : > { %1771 = vmatprep.mubr.bf16.mxu1 %v4617_v21  ;;  %3809 = vmatprep.subr.bf16.mxu1 %v4134_v58 }
 0x44a   : > { %3810 = vmatpush3.bf16.msra.mxu1 %v4134_v58  ;;  %v4136_v58 = vld [vmem:[#allocation16 + $0x88] sm:$0xff]  }
 0x450   : > { %1772 = vmatmul.mubr.bf16.gmra.mrb[88].mxu1 %v1456_v11 }
 0x451   : > { %1781 = vmatprep.mubr.bf16.mxu1 %v4617_v21 }
 0x458   : > { %1782 = vmatmul.mubr.bf16.gmra.mrb[92].mxu1 %v5231_v10 }
 0x459   : > { %1791 = vmatprep.mubr.bf16.mxu1 %v4617_v21 }
 0x460   : > { %1792 = vmatmul.mubr.bf16.gmra.mrb[96].mxu1 %v1458_v29 }
 0x461   : > { %1801 = vmatprep.mubr.bf16.mxu1 %v4617_v21 }
 0x468   : > { %1802 = vmatmul.mubr.bf16.gmra.mrb[100].mxu1 %v1459_v28 }
 0x469   : > { %1811 = vmatprep.mubr.bf16.mxu1 %v4617_v21 }
 0x470   : > { %1812 = vmatmul.mubr.bf16.gmra.mrb[104].mxu1 %v1460_v50 }
 0x471   : > { %1821 = vmatprep.mubr.bf16.mxu1 %v4617_v21 }
 0x478   : > { %1822 = vmatmul.mubr.bf16.gmra.mrb[108].mxu1 %v1461_v49 }
 0x4d3   : > { %v1673_v7 = vpop.f32.mrb[48].mxu1 }
 0x4d4   : > { %v1674_v21 = vadd.f32 %v1673_v7, %v5269_v6  ;;  %v1675_v8 = vpop.f32.mrb[49].mxu1  ;;  %v3717_v37 = vpop.f32.mrb[48].mxu0 }
 0x4d5   : > { %v1676_v34 = vadd.f32 %v1675_v8, %v5271_v3  ;;  %v1875_v5 = vadd.f32 %v3717_v37, %v5273_v4  ;;  %v1677_v2 = vpop.f32.mrb[50].mxu1  ;;  %v1866_v9 = vpop.f32.mrb[49].mxu0 }
 0x4d6   : > { %v1678_v10 = vadd.f32 %v1677_v2, %v5269_v6  ;;  %v1867_v11 = vadd.f32 %v1866_v9, %v5273_v4  ;;  %v1679_v12 = vpop.f32.mrb[51].mxu1  ;;  %v3718_v13 = vpop.f32.mrb[50].mxu0  ;;  %v1993_v18 = vmax.f32 %v1674_v21, 0.0 }
 0x4d7   : > { %v1680_v14 = vadd.f32 %v1679_v12, %v5271_v3  ;;  %v1878_v15 = vadd.f32 %v3718_v13, %v5273_v4  ;;  %v1869_v16 = vpop.f32.mrb[51].mxu0  ;;  %v1994_v42 = vmax.f32 %v1676_v34, 0.0  ;;  %v2001_v23 = vmax.f32 %v1875_v5, 0.0 }
 0x4d8   : > { %v1996_v19 = vmax.f32 %v1678_v10, 0.0  ;;  %v1870_v20 = vadd.f32 %v1869_v16, %v5273_v4  ;;  %v1995_v22 = vmax.f32 %v1867_v11, 0.0  ;;  %v4137_v11 = vld [vmem:[#allocation16 + $0x90] sm:$0xff]  }
 0x4d9   : > { %v1997_v24 = vmax.f32 %v1680_v14, 0.0  ;;  %v2004_v25 = vmax.f32 %v1878_v15, 0.0 }
 0x4da   : > { %v2089_v26 = vpack.c.bf16 %v1996_v19, %v1993_v18  ;;  %v1998_v43 = vmax.f32 %v1870_v20, 0.0 }
 0x4db   : > { %v2090_v27 = vpack.c.bf16 %v1997_v24, %v1994_v42  ;;  %v5283_v28 = vpack.c.bf16 %v2004_v25, %v2001_v23  ;;  %v1683_v29 = vpop.f32.mrb[52].mxu1 }
 0x4dc   : > { %v5285_v30 = vpack.c.bf16 %v1998_v43, %v1995_v22  ;;  %v1684_v31 = vadd.f32 %v1683_v29, %v5269_v6  ;;  %v1685_v32 = vpop.f32.mrb[53].mxu1  ;;  %v3721_v33 = vpop.f32.mrb[52].mxu0  ;;  %3763 = vmatprep.mubr.bf16.mxu0 %v2089_v26  ;;  %v4138_v26 = vld [vmem:[#allocation16 + $0x98] sm:$0xff]  }
 0x4dd   : > { %v1686_v35 = vadd.f32 %v1685_v32, %v5271_v3  ;;  %v1891_v36 = vadd.f32 %v3721_v33, %v5273_v4  ;;  %v1687_v56 = vpop.f32.mrb[54].mxu1  ;;  %v1882_v40 = vpop.f32.mrb[53].mxu0  ;;  %3811 = vmatprep.mubr.bf16.mxu1 %v2090_v27 }
 0x4de   : > { %v1688_v41 = vadd.f32 %v1687_v56, %v5269_v6  ;;  %v1883_v44 = vadd.f32 %v1882_v40, %v5273_v4  ;;  %v1689_v45 = vpop.f32.mrb[55].mxu1  ;;  %v3722_v57 = vpop.f32.mrb[54].mxu0  ;;  %v1999_v39 = vmax.f32 %v1684_v31, 0.0 }
 0x4df   : > { %v1690_v46 = vadd.f32 %v1689_v45, %v5271_v3  ;;  %v1894_v47 = vadd.f32 %v3722_v57, %v5273_v4  ;;  %v1885_v48 = vpop.f32.mrb[55].mxu0  ;;  %v2000_v17 = vmax.f32 %v1686_v35, 0.0  ;;  %v2013_v51 = vmax.f32 %v1891_v36, 0.0 }
 0x4e0   : > { %v2002_v49 = vmax.f32 %v1688_v41, 0.0  ;;  %v1886_v50 = vadd.f32 %v1885_v48, %v5273_v4  ;;  %v2007_v54 = vmax.f32 %v1883_v44, 0.0 }
 0x4e1   : > { %v2003_v38 = vmax.f32 %v1690_v46, 0.0  ;;  %v2016_v52 = vmax.f32 %v1894_v47, 0.0  ;;  %v4139_v46 = vld [vmem:[#allocation16 + $0xa0] sm:$0xff]  }
 0x4e2   : > { %v2092_v53 = vpack.c.bf16 %v2002_v49, %v1999_v39  ;;  %v2010_v55 = vmax.f32 %v1886_v50, 0.0 }
 0x4e3   : > { %v2093_v60 = vpack.c.bf16 %v2003_v38, %v2000_v17  ;;  %v5295_v61 = vpack.c.bf16 %v2016_v52, %v2013_v51  ;;  %v1693_v62 = vpop.f32.mrb[56].mxu1 }
 0x4e4   : > { %v5297_v63 = vpack.c.bf16 %v2010_v55, %v2007_v54  ;;  %v1694_v0 = vadd.f32 %v1693_v62, %v5269_v6  ;;  %v1695_v1 = vpop.f32.mrb[57].mxu1  ;;  %3764 = vmatmul.mubr.bf16.vlgmr.msra.gmra.mrb[80].mxu0 %v2092_v53  ;;  %v3725_v7 = vpop.f32.mrb[56].mxu0 }
 0x4e5   : > { %v1696_v21 = vadd.f32 %v1695_v1, %v5271_v3  ;;  %v1697_v8 = vpop.f32.mrb[58].mxu1  ;;  %v1907_v37 = vadd.f32 %v3725_v7, %v5273_v4  ;;  %3812 = vmatmul.mubr.bf16.vlgmr.msra.gmra.mrb[112].mxu1 %v2093_v60  ;;  %v1898_v34 = vpop.f32.mrb[57].mxu0  ;;  %3844 = vmatpush3.bf16.msra.mxu0 %v5266_v59  ;;  %v4140_v60 = vld [vmem:[#allocation16 + $0xa8] sm:$0xff]  }
 0x4e6   : > { %v1698_v5 = vadd.f32 %v1697_v8, %v5269_v6  ;;  %v1699_v2 = vpop.f32.mrb[59].mxu1  ;;  %v1899_v9 = vadd.f32 %v1898_v34, %v5273_v4  ;;  %v3726_v10 = vpop.f32.mrb[58].mxu0  ;;  %3845 = vmatprep.subr.bf16.mxu0 %v4136_v58  ;;  %v2005_v16 = vmax.f32 %v1694_v0, 0.0 }
 0x4e7   : > { %v2025_v12 = vmax.f32 %v1907_v37, 0.0  ;;  %v1700_v13 = vadd.f32 %v1699_v2, %v5271_v3  ;;  %v1910_v14 = vadd.f32 %v3726_v10, %v5273_v4  ;;  %v1901_v15 = vpop.f32.mrb[59].mxu0  ;;  %v2006_v59 = vmax.f32 %v1696_v21, 0.0 }
 0x4e8   : > { %v2008_v18 = vmax.f32 %v1698_v5, 0.0  ;;  %v2019_v19 = vmax.f32 %v1899_v9, 0.0  ;;  %v1902_v20 = vadd.f32 %v1901_v15, %v5273_v4 }
 0x4e9   : > { %v2009_v42 = vmax.f32 %v1700_v13, 0.0  ;;  %v2028_v23 = vmax.f32 %v1910_v14, 0.0  ;;  %3846 = vmatpush3.bf16.msra.mxu0 %v4136_v58  ;;  %v4141_v14 = vld [vmem:[#allocation16 + $0xb0] sm:$0xff]  }
 0x4ea   : > { %v2095_v24 = vpack.c.bf16 %v2008_v18, %v2005_v16  ;;  %v2022_v25 = vmax.f32 %v1902_v20, 0.0  ;;  %3847 = vmatprep.subr.bf16.mxu0 %v4137_v11 }
 0x4eb   : > { %v2096_v22 = vpack.c.bf16 %v2009_v42, %v2006_v59  ;;  %v5308_v43 = vpack.c.bf16 %v2028_v23, %v2025_v12  ;;  %v1703_v27 = vpop.f32.mrb[60].mxu1 }
 0x4ec   : > { %v5310_v29 = vpack.c.bf16 %v2022_v25, %v2019_v19  ;;  %v1704_v31 = vadd.f32 %v1703_v27, %v5269_v6  ;;  %v1705_v32 = vpop.f32.mrb[61].mxu1  ;;  %3767 = vmatprep.mubr.bf16.mxu0 %v2095_v24  ;;  %v3729_v33 = vpop.f32.mrb[60].mxu0 }
 0x4ed   : > { %v1706_v35 = vadd.f32 %v1705_v32, %v5271_v3  ;;  %v1707_v36 = vpop.f32.mrb[62].mxu1  ;;  %3815 = vmatprep.mubr.bf16.mxu1 %v2096_v22  ;;  %v1923_v56 = vadd.f32 %v3729_v33, %v5273_v4  ;;  %v1914_v40 = vpop.f32.mrb[61].mxu0  ;;  %3848 = vmatpush3.bf16.msra.mxu0 %v4137_v11 }
 0x4ee   : > { %v1708_v41 = vadd.f32 %v1707_v36, %v5269_v6  ;;  %v1709_v44 = vpop.f32.mrb[63].mxu1  ;;  %v1915_v45 = vadd.f32 %v1914_v40, %v5273_v4  ;;  %v3730_v57 = vpop.f32.mrb[62].mxu0  ;;  %3849 = vmatprep.subr.bf16.mxu0 %v4138_v26  ;;  %v2011_v50 = vmax.f32 %v1704_v31, 0.0  ;;  %v4142_v31 = vld [vmem:[#allocation16 + $0xb8] sm:$0xff]  }
 0x4ef   : > { %v1710_v47 = vadd.f32 %v1709_v44, %v5271_v3  ;;  %v2037_v48 = vmax.f32 %v1923_v56, 0.0  ;;  %v1926_v39 = vadd.f32 %v3730_v57, %v5273_v4  ;;  %v1917_v49 = vpop.f32.mrb[63].mxu0  ;;  %v2012_v52 = vmax.f32 %v1706_v35, 0.0 }
 0x4f0   : > { %v2014_v17 = vmax.f32 %v1708_v41, 0.0  ;;  %v2031_v51 = vmax.f32 %v1915_v45, 0.0  ;;  %v1918_v38 = vadd.f32 %v1917_v49, %v5273_v4 }
 0x4f1   : > { %v2015_v53 = vmax.f32 %v1710_v47, 0.0  ;;  %v2040_v54 = vmax.f32 %v1926_v39, 0.0  ;;  %3850 = vmatpush3.bf16.msra.mxu0 %v4138_v26 }
 0x4f2   : > { %v2098_v55 = vpack.c.bf16 %v2014_v17, %v2011_v50  ;;  %v2034_v58 = vmax.f32 %v1918_v38, 0.0  ;;  %3851 = vmatprep.subr.bf16.mxu0 %v4139_v46 }
 0x4f3   : > { %v2099_v62 = vpack.c.bf16 %v2015_v53, %v2012_v52  ;;  %v1713_v0 = vpop.f32.mrb[64].mxu1  ;;  %v5320_v1 = vpack.c.bf16 %v2040_v54, %v2037_v48 }
 0x4f4   : > { %v1714_v7 = vadd.f32 %v1713_v0, %v5269_v6  ;;  %v1715_v21 = vpop.f32.mrb[65].mxu1  ;;  %3768 = vmatmul.mubr.bf16.gmra.mrb[84].mxu0 %v2098_v55  ;;  %v5323_v8 = vpack.c.bf16 %v2034_v58, %v2031_v51  ;;  %v3733_v37 = vpop.f32.mrb[64].mxu0 }
 0x4f5   : > { %v1716_v34 = vadd.f32 %v1715_v21, %v5271_v3  ;;  %v1717_v5 = vpop.f32.mrb[66].mxu1  ;;  %3816 = vmatmul.mubr.bf16.gmra.mrb[116].mxu1 %v2099_v62  ;;  %v1939_v2 = vadd.f32 %v3733_v37, %v5273_v4  ;;  %v1930_v9 = vpop.f32.mrb[65].mxu0  ;;  %3852 = vmatpush3.bf16.msra.mxu0 %v4139_v46 }
 0x4f6   : > { %v1718_v10 = vadd.f32 %v1717_v5, %v5269_v6  ;;  %v1719_v11 = vpop.f32.mrb[67].mxu1  ;;  %v1931_v12 = vadd.f32 %v1930_v9, %v5273_v4  ;;  %v3734_v13 = vpop.f32.mrb[66].mxu0  ;;  %3853 = vmatprep.subr.bf16.mxu0 %v4140_v60  ;;  %v2017_v20 = vmax.f32 %v1714_v7, 0.0 }
 0x4f7   : > { %v1720_v15 = vadd.f32 %v1719_v11, %v5271_v3  ;;  %v2049_v16 = vmax.f32 %v1939_v2, 0.0  ;;  %v1942_v18 = vadd.f32 %v3734_v13, %v5273_v4  ;;  %v1933_v19 = vpop.f32.mrb[67].mxu0  ;;  %v2018_v24 = vmax.f32 %v1716_v34, 0.0 }
 0x4f8   : > { %v2020_v59 = vmax.f32 %v1718_v10, 0.0  ;;  %v2043_v42 = vmax.f32 %v1931_v12, 0.0  ;;  %v1934_v23 = vadd.f32 %v1933_v19, %v5273_v4 }
 0x4f9   : > { %v2021_v25 = vmax.f32 %v1720_v15, 0.0  ;;  %v2052_v26 = vmax.f32 %v1942_v18, 0.0  ;;  %3854 = vmatpush3.bf16.msra.mxu0 %v4140_v60 }
 0x4fa   : > { %v2101_v22 = vpack.c.bf16 %v2020_v59, %v2017_v20  ;;  %v2046_v27 = vmax.f32 %v1934_v23, 0.0  ;;  %3855 = vmatprep.subr.bf16.mxu0 %v4141_v14 }
 0x4fb   : > { %v2102_v32 = vpack.c.bf16 %v2021_v25, %v2018_v24  ;;  %v1723_v33 = vpop.f32.mrb[68].mxu1  ;;  %v5332_v35 = vpack.c.bf16 %v2052_v26, %v2049_v16 }
 0x4fc   : > { %v1724_v36 = vadd.f32 %v1723_v33, %v5269_v6  ;;  %v1725_v56 = vpop.f32.mrb[69].mxu1  ;;  %3771 = vmatprep.mubr.bf16.mxu0 %v2101_v22  ;;  %v5335_v40 = vpack.c.bf16 %v2046_v27, %v2043_v42  ;;  %v3737_v41 = vpop.f32.mrb[68].mxu0 }
 0x4fd   : > { %v1726_v44 = vadd.f32 %v1725_v56, %v5271_v3  ;;  %v1727_v45 = vpop.f32.mrb[70].mxu1  ;;  %3819 = vmatprep.mubr.bf16.mxu1 %v2102_v32  ;;  %v1955_v57 = vadd.f32 %v3737_v41, %v5273_v4  ;;  %v1946_v46 = vpop.f32.mrb[69].mxu0  ;;  %3856 = vmatpush3.bf16.msra.mxu0 %v4141_v14 }
 0x4fe   : > { %v1728_v47 = vadd.f32 %v1727_v45, %v5269_v6  ;;  %v1729_v48 = vpop.f32.mrb[71].mxu1  ;;  %v1947_v39 = vadd.f32 %v1946_v46, %v5273_v4  ;;  %v3738_v49 = vpop.f32.mrb[70].mxu0  ;;  %3857 = vmatprep.subr.bf16.mxu0 %v4142_v31  ;;  %v2023_v52 = vmax.f32 %v1724_v36, 0.0 }
 0x4ff   : > { %v1730_v50 = vadd.f32 %v1729_v48, %v5271_v3  ;;  %v2061_v17 = vmax.f32 %v1955_v57, 0.0  ;;  %v1958_v51 = vadd.f32 %v3738_v49, %v5273_v4  ;;  %v1949_v38 = vpop.f32.mrb[71].mxu0  ;;  %v2024_v58 = vmax.f32 %v1726_v44, 0.0 }
 0x500   : > { %v2026_v53 = vmax.f32 %v1728_v47, 0.0  ;;  %v2055_v54 = vmax.f32 %v1947_v39, 0.0  ;;  %v1950_v55 = vadd.f32 %v1949_v38, %v5273_v4 }
 0x501   : > { %v2027_v60 = vmax.f32 %v1730_v50, 0.0  ;;  %v2064_v62 = vmax.f32 %v1958_v51, 0.0  ;;  %3858 = vmatpush3.bf16.msra.mxu0 %v4142_v31 }
 0x502   : > { %v2104_v0 = vpack.c.bf16 %v2026_v53, %v2023_v52  ;;  %v2058_v7 = vmax.f32 %v1950_v55, 0.0 }
 0x503   : > { %v2105_v21 = vpack.c.bf16 %v2027_v60, %v2024_v58  ;;  %v1733_v37 = vpop.f32.mrb[72].mxu1  ;;  %v5344_v34 = vpack.c.bf16 %v2064_v62, %v2061_v17 }
 0x504   : > { %v1734_v5 = vadd.f32 %v1733_v37, %v5269_v6  ;;  %v1735_v2 = vpop.f32.mrb[73].mxu1  ;;  %3772 = vmatmul.mubr.bf16.gmra.mrb[88].mxu0 %v2104_v0  ;;  %v5347_v9 = vpack.c.bf16 %v2058_v7, %v2055_v54  ;;  %v3741_v10 = vpop.f32.mrb[72].mxu0 }
 0x505   : > { %v1736_v11 = vadd.f32 %v1735_v2, %v5271_v3  ;;  %v1737_v12 = vpop.f32.mrb[74].mxu1  ;;  %3820 = vmatmul.mubr.bf16.gmra.mrb[120].mxu1 %v2105_v21  ;;  %v1971_v13 = vadd.f32 %v3741_v10, %v5273_v4  ;;  %v1962_v14 = vpop.f32.mrb[73].mxu0 }
 0x506   : > { %v1738_v15 = vadd.f32 %v1737_v12, %v5269_v6  ;;  %v1739_v16 = vpop.f32.mrb[75].mxu1  ;;  %v1963_v18 = vadd.f32 %v1962_v14, %v5273_v4  ;;  %v3742_v19 = vpop.f32.mrb[74].mxu0  ;;  %v2029_v24 = vmax.f32 %v1734_v5, 0.0 }
 0x507   : > { %v1740_v20 = vadd.f32 %v1739_v16, %v5271_v3  ;;  %v2073_v59 = vmax.f32 %v1971_v13, 0.0  ;;  %v1974_v42 = vadd.f32 %v3742_v19, %v5273_v4  ;;  %v1965_v23 = vpop.f32.mrb[75].mxu0  ;;  %v2030_v27 = vmax.f32 %v1736_v11, 0.0 }
 0x508   : > { %v2032_v25 = vmax.f32 %v1738_v15, 0.0  ;;  %v2067_v26 = vmax.f32 %v1963_v18, 0.0  ;;  %v1966_v22 = vadd.f32 %v1965_v23, %v5273_v4 }
 0x509   : > { %v2033_v31 = vmax.f32 %v1740_v20, 0.0  ;;  %v2076_v32 = vmax.f32 %v1974_v42, 0.0 }
 0x50a   : > { %v2107_v33 = vpack.c.bf16 %v2032_v25, %v2029_v24  ;;  %v2070_v36 = vmax.f32 %v1966_v22, 0.0 }
 0x50b   : > { %v2108_v56 = vpack.c.bf16 %v2033_v31, %v2030_v27  ;;  %v1743_v41 = vpop.f32.mrb[76].mxu1  ;;  %v5356_v44 = vpack.c.bf16 %v2076_v32, %v2073_v59 }
 0x50c   : > { %v1744_v45 = vadd.f32 %v1743_v41, %v5269_v6  ;;  %v1745_v57 = vpop.f32.mrb[77].mxu1  ;;  %3775 = vmatprep.mubr.bf16.mxu0 %v2107_v33  ;;  %v5359_v46 = vpack.c.bf16 %v2070_v36, %v2067_v26  ;;  %v3745_v47 = vpop.f32.mrb[76].mxu0 }
 0x50d   : > { %v1746_v48 = vadd.f32 %v1745_v57, %v5271_v3  ;;  %v1747_v39 = vpop.f32.mrb[78].mxu1  ;;  %3823 = vmatprep.mubr.bf16.mxu1 %v2108_v56  ;;  %v1987_v49 = vadd.f32 %v3745_v47, %v5273_v4  ;;  %v1978_v50 = vpop.f32.mrb[77].mxu0 }
 0x50e   : > { %v1748_v17 = vadd.f32 %v1747_v39, %v5269_v6  ;;  %v1749_v51 = vpop.f32.mrb[79].mxu1  ;;  %v1979_v38 = vadd.f32 %v1978_v50, %v5273_v4  ;;  %v3746_v52 = vpop.f32.mrb[78].mxu0  ;;  %v2035_v60 = vmax.f32 %v1744_v45, 0.0 }
 0x50f   : > { %v1750_v53 = vadd.f32 %v1749_v51, %v5271_v3  ;;  %v2085_v54 = vmax.f32 %v1987_v49, 0.0  ;;  %v1990_v55 = vadd.f32 %v3746_v52, %v5273_v4  ;;  %v1981_v58 = vpop.f32.mrb[79].mxu0  ;;  %v2036_v21 = vmax.f32 %v1746_v48, 0.0 }
 0x510   : > { %v2038_v62 = vmax.f32 %v1748_v17, 0.0  ;;  %v2079_v0 = vmax.f32 %v1979_v38, 0.0  ;;  %v1982_v7 = vadd.f32 %v1981_v58, %v5273_v4 }
 0x511   : > { %v2039_v37 = vmax.f32 %v1750_v53, 0.0  ;;  %v2088_v5 = vmax.f32 %v1990_v55, 0.0 }
 0x512   : > { %v2110_v2 = vpack.c.bf16 %v2038_v62, %v2035_v60  ;;  %v2082_v10 = vmax.f32 %v1982_v7, 0.0 }
 0x513   : > { %v2111_v11 = vpack.c.bf16 %v2039_v37, %v2036_v21  ;;  %v1753_v12 = vpop.f32.mrb[80].mxu1  ;;  %v5368_v13 = vpack.c.bf16 %v2088_v5, %v2085_v54 }
 0x514   : > { %v1754_v14 = vadd.f32 %v1753_v12, %v5269_v6  ;;  %v1755_v15 = vpop.f32.mrb[81].mxu1  ;;  %3776 = vmatmul.mubr.bf16.gmra.mrb[92].mxu0 %v2110_v2  ;;  %v5371_v16 = vpack.c.bf16 %v2082_v10, %v2079_v0 }
 0x515   : > { %v1756_v18 = vadd.f32 %v1755_v15, %v5271_v3  ;;  %v1757_v19 = vpop.f32.mrb[82].mxu1  ;;  %3824 = vmatmul.mubr.bf16.gmra.mrb[124].mxu1 %v2111_v11 }
 0x516   : > { %v1758_v4 = vadd.f32 %v1757_v19, %v5269_v6  ;;  %v1759_v20 = vpop.f32.mrb[83].mxu1  ;;  %v2041_v42 = vmax.f32 %v1754_v14, 0.0 }
 0x517   : > { %v1760_v59 = vadd.f32 %v1759_v20, %v5271_v3  ;;  %v2042_v24 = vmax.f32 %v1756_v18, 0.0 }
 0x518   : > { %v2044_v23 = vmax.f32 %v1758_v4, 0.0 }
 0x519   : > { %v2045_v25 = vmax.f32 %v1760_v59, 0.0 }
 0x51a   : > { %v2113_v26 = vpack.c.bf16 %v2044_v23, %v2041_v42 }
 0x51b   : > { %v2114_v22 = vpack.c.bf16 %v2045_v25, %v2042_v24  ;;  %v1763_v27 = vpop.f32.mrb[84].mxu1 }
 0x51c   : > { %v1764_v31 = vadd.f32 %v1763_v27, %v5269_v6  ;;  %v1765_v32 = vpop.f32.mrb[85].mxu1  ;;  %3779 = vmatprep.mubr.bf16.mxu0 %v2113_v26 }
 0x51d   : > { %v1766_v33 = vadd.f32 %v1765_v32, %v5271_v3  ;;  %v1767_v36 = vpop.f32.mrb[86].mxu1  ;;  %3827 = vmatprep.mubr.bf16.mxu1 %v2114_v22 }
 0x51e   : > { %v1768_v56 = vadd.f32 %v1767_v36, %v5269_v6  ;;  %v1769_v41 = vpop.f32.mrb[87].mxu1  ;;  %v2047_v57 = vmax.f32 %v1764_v31, 0.0 }
 0x51f   : > { %v1770_v45 = vadd.f32 %v1769_v41, %v5271_v3  ;;  %v2048_v48 = vmax.f32 %v1766_v33, 0.0 }
 0x520   : > { %v2050_v47 = vmax.f32 %v1768_v56, 0.0 }
 0x521   : > { %v2051_v39 = vmax.f32 %v1770_v45, 0.0 }
 0x522   : > { %v2116_v49 = vpack.c.bf16 %v2050_v47, %v2047_v57 }
 0x523   : > { %v2117_v50 = vpack.c.bf16 %v2051_v39, %v2048_v48  ;;  %v1773_v17 = vpop.f32.mrb[88].mxu1 }
 0x524   : > { %v1774_v51 = vadd.f32 %v1773_v17, %v5269_v6  ;;  %v1775_v38 = vpop.f32.mrb[89].mxu1  ;;  %3780 = vmatmul.mubr.bf16.gmra.mrb[96].mxu0 %v2116_v49 }
 0x525   : > { %v1776_v52 = vadd.f32 %v1775_v38, %v5271_v3  ;;  %v1777_v53 = vpop.f32.mrb[90].mxu1  ;;  %3828 = vmatmul.mubr.bf16.gmra.mrb[128].mxu1 %v2117_v50 }
 0x526   : > { %v1778_v54 = vadd.f32 %v1777_v53, %v5269_v6  ;;  %v1779_v55 = vpop.f32.mrb[91].mxu1  ;;  %v2053_v60 = vmax.f32 %v1774_v51, 0.0 }
 0x527   : > { %v1780_v58 = vadd.f32 %v1779_v55, %v5271_v3  ;;  %v2054_v0 = vmax.f32 %v1776_v52, 0.0 }
 0x528   : > { %v2056_v62 = vmax.f32 %v1778_v54, 0.0 }
 0x529   : > { %v2057_v7 = vmax.f32 %v1780_v58, 0.0 }
 0x52a   : > { %v2119_v21 = vpack.c.bf16 %v2056_v62, %v2053_v60 }
 0x52b   : > { %v2120_v37 = vpack.c.bf16 %v2057_v7, %v2054_v0  ;;  %v1783_v5 = vpop.f32.mrb[92].mxu1 }
 0x52c   : > { %v1784_v2 = vadd.f32 %v1783_v5, %v5269_v6  ;;  %v1785_v10 = vpop.f32.mrb[93].mxu1  ;;  %3783 = vmatprep.mubr.bf16.mxu0 %v2119_v21 }
 0x52d   : > { %v1786_v11 = vadd.f32 %v1785_v10, %v5271_v3  ;;  %v1787_v12 = vpop.f32.mrb[94].mxu1  ;;  %3831 = vmatprep.mubr.bf16.mxu1 %v2120_v37 }
 0x52e   : > { %v1788_v14 = vadd.f32 %v1787_v12, %v5269_v6  ;;  %v1789_v15 = vpop.f32.mrb[95].mxu1  ;;  %v2059_v19 = vmax.f32 %v1784_v2, 0.0 }
 0x52f   : > { %v1790_v18 = vadd.f32 %v1789_v15, %v5271_v3  ;;  %v2060_v20 = vmax.f32 %v1786_v11, 0.0 }
 0x530   : > { %v2062_v4 = vmax.f32 %v1788_v14, 0.0 }
 0x531   : > { %v2063_v59 = vmax.f32 %v1790_v18, 0.0 }
 0x532   : > { %v2122_v42 = vpack.c.bf16 %v2062_v4, %v2059_v19 }
 0x533   : > { %v2123_v23 = vpack.c.bf16 %v2063_v59, %v2060_v20  ;;  %v1793_v24 = vpop.f32.mrb[96].mxu1 }
 0x534   : > { %v1794_v25 = vadd.f32 %v1793_v24, %v5269_v6  ;;  %v1795_v26 = vpop.f32.mrb[97].mxu1  ;;  %3784 = vmatmul.mubr.bf16.gmra.mrb[100].mxu0 %v2122_v42 }
 0x535   : > { %v1796_v22 = vadd.f32 %v1795_v26, %v5271_v3  ;;  %v1797_v27 = vpop.f32.mrb[98].mxu1  ;;  %3832 = vmatmul.mubr.bf16.gmra.mrb[132].mxu1 %v2123_v23 }
 0x536   : > { %v1798_v31 = vadd.f32 %v1797_v27, %v5269_v6  ;;  %v1799_v32 = vpop.f32.mrb[99].mxu1  ;;  %v2065_v36 = vmax.f32 %v1794_v25, 0.0 }
 0x537   : > { %v1800_v33 = vadd.f32 %v1799_v32, %v5271_v3  ;;  %v2066_v41 = vmax.f32 %v1796_v22, 0.0 }
 0x538   : > { %v2068_v56 = vmax.f32 %v1798_v31, 0.0 }
 0x539   : > { %v2069_v45 = vmax.f32 %v1800_v33, 0.0 }
 0x53a   : > { %v2125_v57 = vpack.c.bf16 %v2068_v56, %v2065_v36 }
 0x53b   : > { %v2126_v47 = vpack.c.bf16 %v2069_v45, %v2066_v41  ;;  %v1803_v48 = vpop.f32.mrb[100].mxu1 }
 0x53c   : > { %v1804_v39 = vadd.f32 %v1803_v48, %v5269_v6  ;;  %v1805_v49 = vpop.f32.mrb[101].mxu1  ;;  %3787 = vmatprep.mubr.bf16.mxu0 %v2125_v57 }
 0x53d   : > { %v1806_v50 = vadd.f32 %v1805_v49, %v5271_v3  ;;  %v1807_v17 = vpop.f32.mrb[102].mxu1  ;;  %3835 = vmatprep.mubr.bf16.mxu1 %v2126_v47 }
 0x53e   : > { %v1808_v51 = vadd.f32 %v1807_v17, %v5269_v6  ;;  %v1809_v38 = vpop.f32.mrb[103].mxu1  ;;  %v2071_v53 = vmax.f32 %v1804_v39, 0.0 }
 0x53f   : > { %v1810_v52 = vadd.f32 %v1809_v38, %v5271_v3  ;;  %v2072_v55 = vmax.f32 %v1806_v50, 0.0 }
 0x540   : > { %v2074_v54 = vmax.f32 %v1808_v51, 0.0 }
 0x541   : > { %v2075_v58 = vmax.f32 %v1810_v52, 0.0 }
 0x542   : > { %v2128_v60 = vpack.c.bf16 %v2074_v54, %v2071_v53 }
 0x543   : > { %v2129_v62 = vpack.c.bf16 %v2075_v58, %v2072_v55  ;;  %v1813_v0 = vpop.f32.mrb[104].mxu1 }
 0x544   : > { %v1814_v7 = vadd.f32 %v1813_v0, %v5269_v6  ;;  %v1815_v21 = vpop.f32.mrb[105].mxu1  ;;  %3788 = vmatmul.mubr.bf16.gmra.mrb[104].mxu0 %v2128_v60 }
 0x545   : > { %v1816_v37 = vadd.f32 %v1815_v21, %v5271_v3  ;;  %v1817_v5 = vpop.f32.mrb[106].mxu1  ;;  %3836 = vmatmul.mubr.bf16.gmra.mrb[136].mxu1 %v2129_v62 }
 0x546   : > { %v1818_v2 = vadd.f32 %v1817_v5, %v5269_v6  ;;  %v1819_v10 = vpop.f32.mrb[107].mxu1  ;;  %v2077_v12 = vmax.f32 %v1814_v7, 0.0 }
 0x547   : > { %v1820_v11 = vadd.f32 %v1819_v10, %v5271_v3  ;;  %v2078_v15 = vmax.f32 %v1816_v37, 0.0 }
 0x548   : > { %v2080_v14 = vmax.f32 %v1818_v2, 0.0 }
 0x549   : > { %v2081_v18 = vmax.f32 %v1820_v11, 0.0 }
 0x54a   : > { %v2131_v19 = vpack.c.bf16 %v2080_v14, %v2077_v12 }
 0x54b   : > { %v2132_v4 = vpack.c.bf16 %v2081_v18, %v2078_v15  ;;  %v1823_v20 = vpop.f32.mrb[108].mxu1 }
 0x54c   : > { %v1824_v59 = vadd.f32 %v1823_v20, %v5269_v6  ;;  %v1825_v42 = vpop.f32.mrb[109].mxu1  ;;  %3791 = vmatprep.mubr.bf16.mxu0 %v2131_v19 }
 0x54d   : > { %v1826_v23 = vadd.f32 %v1825_v42, %v5271_v3  ;;  %v1827_v24 = vpop.f32.mrb[110].mxu1  ;;  %3839 = vmatprep.mubr.bf16.mxu1 %v2132_v4 }
 0x54e   : > { %v1828_v25 = vadd.f32 %v1827_v24, %v5269_v6  ;;  %v1829_v26 = vpop.f32.mrb[111].mxu1  ;;  %v2083_v27 = vmax.f32 %v1824_v59, 0.0  ;;  %v5420_v6 = vld [vmem:[#allocation17] ss:$0 sm:$0xff] }
 0x54f   : > { %v1830_v22 = vadd.f32 %v1829_v26, %v5271_v3  ;;  %v2084_v32 = vmax.f32 %v1826_v23, 0.0  ;;  %v5422_v3 = vld [vmem:[#allocation17 + $0x1] ss:$0 sm:$0xff] }
 0x550   : > { %v2086_v31 = vmax.f32 %v1828_v25, 0.0 }
 0x551   : > { %v2087_v33 = vmax.f32 %v1830_v22, 0.0 }
 0x552   : > { %v2134_v36 = vpack.c.bf16 %v2086_v31, %v2083_v27 }
 0x553   : > { %v2135_v56 = vpack.c.bf16 %v2087_v33, %v2084_v32 }
 0x554   : > { %3792 = vmatmul.mubr.bf16.gmra.mrb[108].mxu0 %v2134_v36 }
 0x555   : > { %3840 = vmatmul.mubr.bf16.gmra.mrb[140].mxu1 %v2135_v56  ;;  %3859 = vmatprep.mubr.bf16.mxu0 %v5285_v30 }
 0x55c   : > { %3860 = vmatmul.mubr.bf16.vlgmr.msra.gmra.mrb[112].mxu0 %v5283_v28 }
 0x55d   : > { %3863 = vmatprep.mubr.bf16.mxu0 %v5297_v63 }
 0x564   : > { %3864 = vmatmul.mubr.bf16.gmra.mrb[116].mxu0 %v5295_v61 }
 0x565   : > { %3867 = vmatprep.mubr.bf16.mxu0 %v5310_v29 }
 0x56c   : > { %3868 = vmatmul.mubr.bf16.gmra.mrb[120].mxu0 %v5308_v43 }
 0x56d   : > { %3871 = vmatprep.mubr.bf16.mxu0 %v5323_v8 }
 0x574   : > { %3872 = vmatmul.mubr.bf16.gmra.mrb[124].mxu0 %v5320_v1 }
 0x575   : > { %3875 = vmatprep.mubr.bf16.mxu0 %v5335_v40 }
 0x57c   : > { %3876 = vmatmul.mubr.bf16.gmra.mrb[128].mxu0 %v5332_v35 }
 0x57d   : > { %3879 = vmatprep.mubr.bf16.mxu0 %v5347_v9 }
 0x584   : > { %3880 = vmatmul.mubr.bf16.gmra.mrb[132].mxu0 %v5344_v34 }
 0x585   : > { %3883 = vmatprep.mubr.bf16.mxu0 %v5359_v46 }
 0x58c   : > { %3884 = vmatmul.mubr.bf16.gmra.mrb[136].mxu0 %v5356_v44 }
 0x58d   : > { %3887 = vmatprep.mubr.bf16.mxu0 %v5371_v16 }
 0x594   : > { %3888 = vmatmul.mubr.bf16.gmra.mrb[140].mxu0 %v5368_v13 }
 0x5b7   : > { %v3765_v28 = vpop.f32.mrb[80].mxu0 }
 0x5b8   : > { %v2249_v30 = vadd.f32 %v3765_v28, %v5420_v6  ;;  %v2240_v61 = vpop.f32.mrb[81].mxu0  ;;  %v3813_v63 = vpop.f32.mrb[112].mxu1 }
 0x5b9   : > { %v2241_v43 = vadd.f32 %v5420_v6, %v2240_v61  ;;  %v2480_v29 = vadd.f32 %v3813_v63, %v5422_v3  ;;  %v3766_v1 = vpop.f32.mrb[82].mxu0  ;;  %v2471_v8 = vpop.f32.mrb[113].mxu1 }
 0x5ba   : > { %2831 = vst [vmem:[%s5428_s18 + $0x10] sm:$0xff] %v2249_v30  ;;  %v2252_v35 = vadd.f32 %v3766_v1, %v5420_v6  ;;  %v2472_v40 = vadd.f32 %v5422_v3, %v2471_v8  ;;  %v2243_v34 = vpop.f32.mrb[83].mxu0  ;;  %v3814_v9 = vpop.f32.mrb[114].mxu1 }
 0x5bb   : > { %2829 = vst [vmem:[%s5428_s18] sm:$0xff] %v2241_v43  ;;  %v2863_v44 = vmax.f32 %v2480_v29, 0.0  ;;  %v2244_v46 = vadd.f32 %v5420_v6, %v2243_v34  ;;  %v2483_v13 = vadd.f32 %v3814_v9, %v5422_v3  ;;  %v2474_v16 = vpop.f32.mrb[115].mxu1 }
 0x5bc   : > { %2832 = vst [vmem:[%s5428_s18 + $0x18] sm:$0xff] %v2252_v35  ;;  %v2861_v41 = vmax.f32 %v2472_v40, 0.0  ;;  %v2475_v45 = vadd.f32 %v5422_v3, %v2474_v16 }
 0x5bd   : > { %2895 = vst [vmem:[%s5439_s1 + $0x10] sm:$0xff] %v2863_v44  ;;  %2830 = vst [vmem:[%s5428_s18 + $0x8] sm:$0xff] %v2244_v46  ;;  %v2864_v57 = vmax.f32 %v2483_v13, 0.0 }
 0x5be   : > { %2893 = vst [vmem:[%s5439_s1] sm:$0xff] %v2861_v41  ;;  %v2862_v47 = vmax.f32 %v2475_v45, 0.0 }
 0x5bf   : > { %2896 = vst [vmem:[%s5439_s1 + $0x18] sm:$0xff] %v2864_v57 }
 0x5c0   : > { %2894 = vst [vmem:[%s5439_s1 + $0x8] sm:$0xff] %v2862_v47 }
 0x5c7   : > { %v3769_v48 = vpop.f32.mrb[84].mxu0 }
 0x5c8   : > { %v2265_v39 = vadd.f32 %v3769_v48, %v5420_v6  ;;  %v2256_v49 = vpop.f32.mrb[85].mxu0  ;;  %v3817_v50 = vpop.f32.mrb[116].mxu1 }
 0x5c9   : > { %v2257_v17 = vadd.f32 %v5420_v6, %v2256_v49  ;;  %v2496_v51 = vadd.f32 %v3817_v50, %v5422_v3  ;;  %v3770_v38 = vpop.f32.mrb[86].mxu0  ;;  %v2487_v52 = vpop.f32.mrb[117].mxu1 }
 0x5ca   : > { %2835 = vst [vmem:[%s5428_s18 + $0x30] sm:$0xff] %v2265_v39  ;;  %v2268_v53 = vadd.f32 %v3770_v38, %v5420_v6  ;;  %v2488_v54 = vadd.f32 %v5422_v3, %v2487_v52  ;;  %v2259_v55 = vpop.f32.mrb[87].mxu0  ;;  %v3818_v58 = vpop.f32.mrb[118].mxu1 }
 0x5cb   : > { %2833 = vst [vmem:[%s5428_s18 + $0x20] sm:$0xff] %v2257_v17  ;;  %v2867_v60 = vmax.f32 %v2496_v51, 0.0  ;;  %v2260_v62 = vadd.f32 %v5420_v6, %v2259_v55  ;;  %v2499_v0 = vadd.f32 %v3818_v58, %v5422_v3  ;;  %v2490_v7 = vpop.f32.mrb[119].mxu1 }
 0x5cc   : > { %2836 = vst [vmem:[%s5428_s18 + $0x38] sm:$0xff] %v2268_v53  ;;  %v2865_v21 = vmax.f32 %v2488_v54, 0.0  ;;  %v2491_v37 = vadd.f32 %v5422_v3, %v2490_v7 }
 0x5cd   : > { %2899 = vst [vmem:[%s5439_s1 + $0x30] sm:$0xff] %v2867_v60  ;;  %2834 = vst [vmem:[%s5428_s18 + $0x28] sm:$0xff] %v2260_v62  ;;  %v2868_v5 = vmax.f32 %v2499_v0, 0.0 }
 0x5ce   : > { %2897 = vst [vmem:[%s5439_s1 + $0x20] sm:$0xff] %v2865_v21  ;;  %v2866_v2 = vmax.f32 %v2491_v37, 0.0 }
 0x5cf   : > { %2900 = vst [vmem:[%s5439_s1 + $0x38] sm:$0xff] %v2868_v5 }
 0x5d0   : > { %2898 = vst [vmem:[%s5439_s1 + $0x28] sm:$0xff] %v2866_v2 }
 0x5d7   : > { %v3773_v10 = vpop.f32.mrb[88].mxu0 }
 0x5d8   : > { %v2281_v11 = vadd.f32 %v3773_v10, %v5420_v6  ;;  %v2272_v12 = vpop.f32.mrb[89].mxu0  ;;  %v3821_v14 = vpop.f32.mrb[120].mxu1 }
 0x5d9   : > { %v2273_v15 = vadd.f32 %v5420_v6, %v2272_v12  ;;  %v2512_v18 = vadd.f32 %v3821_v14, %v5422_v3  ;;  %v3774_v19 = vpop.f32.mrb[90].mxu0  ;;  %v2503_v4 = vpop.f32.mrb[121].mxu1 }
 0x5da   : > { %2839 = vst [vmem:[%s5428_s18 + $0x50] sm:$0xff] %v2281_v11  ;;  %v2284_v20 = vadd.f32 %v3774_v19, %v5420_v6  ;;  %v2504_v59 = vadd.f32 %v5422_v3, %v2503_v4  ;;  %v2275_v42 = vpop.f32.mrb[91].mxu0  ;;  %v3822_v23 = vpop.f32.mrb[122].mxu1 }
 0x5db   : > { %2837 = vst [vmem:[%s5428_s18 + $0x40] sm:$0xff] %v2273_v15  ;;  %v2871_v24 = vmax.f32 %v2512_v18, 0.0  ;;  %v2276_v25 = vadd.f32 %v5420_v6, %v2275_v42  ;;  %v2515_v26 = vadd.f32 %v3822_v23, %v5422_v3  ;;  %v2506_v22 = vpop.f32.mrb[123].mxu1 }
 0x5dc   : > { %2840 = vst [vmem:[%s5428_s18 + $0x58] sm:$0xff] %v2284_v20  ;;  %v2869_v27 = vmax.f32 %v2504_v59, 0.0  ;;  %v2507_v31 = vadd.f32 %v5422_v3, %v2506_v22 }
 0x5dd   : > { %2903 = vst [vmem:[%s5439_s1 + $0x50] sm:$0xff] %v2871_v24  ;;  %2838 = vst [vmem:[%s5428_s18 + $0x48] sm:$0xff] %v2276_v25  ;;  %v2872_v32 = vmax.f32 %v2515_v26, 0.0 }
 0x5de   : > { %2901 = vst [vmem:[%s5439_s1 + $0x40] sm:$0xff] %v2869_v27  ;;  %v2870_v33 = vmax.f32 %v2507_v31, 0.0 }
 0x5df   : > { %2904 = vst [vmem:[%s5439_s1 + $0x58] sm:$0xff] %v2872_v32 }
 0x5e0   : > { %2902 = vst [vmem:[%s5439_s1 + $0x48] sm:$0xff] %v2870_v33 }
 0x5e7   : > { %v3777_v36 = vpop.f32.mrb[92].mxu0 }
 0x5e8   : > { %v2297_v56 = vadd.f32 %v3777_v36, %v5420_v6  ;;  %v2288_v28 = vpop.f32.mrb[93].mxu0  ;;  %v3825_v30 = vpop.f32.mrb[124].mxu1 }
 0x5e9   : > { %v2289_v61 = vadd.f32 %v5420_v6, %v2288_v28  ;;  %v2528_v63 = vadd.f32 %v3825_v30, %v5422_v3  ;;  %v3778_v43 = vpop.f32.mrb[94].mxu0  ;;  %v2519_v29 = vpop.f32.mrb[125].mxu1 }
 0x5ea   : > { %2843 = vst [vmem:[%s5428_s18 + $0x70] sm:$0xff] %v2297_v56  ;;  %v2300_v1 = vadd.f32 %v3778_v43, %v5420_v6  ;;  %v2520_v8 = vadd.f32 %v5422_v3, %v2519_v29  ;;  %v2291_v35 = vpop.f32.mrb[95].mxu0  ;;  %v3826_v40 = vpop.f32.mrb[126].mxu1 }
 0x5eb   : > { %2841 = vst [vmem:[%s5428_s18 + $0x60] sm:$0xff] %v2289_v61  ;;  %v2875_v34 = vmax.f32 %v2528_v63, 0.0  ;;  %v2292_v9 = vadd.f32 %v5420_v6, %v2291_v35  ;;  %v2531_v44 = vadd.f32 %v3826_v40, %v5422_v3  ;;  %v2522_v46 = vpop.f32.mrb[127].mxu1 }
 0x5ec   : > { %2844 = vst [vmem:[%s5428_s18 + $0x78] sm:$0xff] %v2300_v1  ;;  %v2873_v13 = vmax.f32 %v2520_v8, 0.0  ;;  %v2523_v16 = vadd.f32 %v5422_v3, %v2522_v46 }
 0x5ed   : > { %2907 = vst [vmem:[%s5439_s1 + $0x70] sm:$0xff] %v2875_v34  ;;  %2842 = vst [vmem:[%s5428_s18 + $0x68] sm:$0xff] %v2292_v9  ;;  %v2876_v41 = vmax.f32 %v2531_v44, 0.0 }
 0x5ee   : > { %2905 = vst [vmem:[%s5439_s1 + $0x60] sm:$0xff] %v2873_v13  ;;  %v2874_v45 = vmax.f32 %v2523_v16, 0.0 }
 0x5ef   : > { %2908 = vst [vmem:[%s5439_s1 + $0x78] sm:$0xff] %v2876_v41 }
 0x5f0   : > { %2906 = vst [vmem:[%s5439_s1 + $0x68] sm:$0xff] %v2874_v45 }
 0x5f7   : > { %v3781_v57 = vpop.f32.mrb[96].mxu0 }
 0x5f8   : > { %v2313_v47 = vadd.f32 %v3781_v57, %v5420_v6  ;;  %v2304_v48 = vpop.f32.mrb[97].mxu0  ;;  %v3829_v39 = vpop.f32.mrb[128].mxu1 }
 0x5f9   : > { %v2305_v49 = vadd.f32 %v5420_v6, %v2304_v48  ;;  %v2544_v50 = vadd.f32 %v3829_v39, %v5422_v3  ;;  %v3782_v17 = vpop.f32.mrb[98].mxu0  ;;  %v2535_v51 = vpop.f32.mrb[129].mxu1 }
 0x5fa   : > { %2847 = vst [vmem:[%s5428_s18 + $0x90] sm:$0xff] %v2313_v47  ;;  %v2316_v38 = vadd.f32 %v3782_v17, %v5420_v6  ;;  %v2536_v52 = vadd.f32 %v5422_v3, %v2535_v51  ;;  %v2307_v53 = vpop.f32.mrb[99].mxu0  ;;  %v3830_v54 = vpop.f32.mrb[130].mxu1 }
 0x5fb   : > { %2845 = vst [vmem:[%s5428_s18 + $0x80] sm:$0xff] %v2305_v49  ;;  %v2879_v55 = vmax.f32 %v2544_v50, 0.0  ;;  %v2308_v58 = vadd.f32 %v5420_v6, %v2307_v53  ;;  %v2547_v60 = vadd.f32 %v3830_v54, %v5422_v3  ;;  %v2538_v62 = vpop.f32.mrb[131].mxu1 }
 0x5fc   : > { %2848 = vst [vmem:[%s5428_s18 + $0x98] sm:$0xff] %v2316_v38  ;;  %v2877_v0 = vmax.f32 %v2536_v52, 0.0  ;;  %v2539_v7 = vadd.f32 %v5422_v3, %v2538_v62 }
 0x5fd   : > { %2911 = vst [vmem:[%s5439_s1 + $0x90] sm:$0xff] %v2879_v55  ;;  %2846 = vst [vmem:[%s5428_s18 + $0x88] sm:$0xff] %v2308_v58  ;;  %v2880_v21 = vmax.f32 %v2547_v60, 0.0 }
 0x5fe   : > { %2909 = vst [vmem:[%s5439_s1 + $0x80] sm:$0xff] %v2877_v0  ;;  %v2878_v37 = vmax.f32 %v2539_v7, 0.0  ;;  %v5569_v0 = vld [vmem:[#allocation17 + $0x2] ss:$0 sm:$0xff] }
 0x5ff   : > { %2912 = vst [vmem:[%s5439_s1 + $0x98] sm:$0xff] %v2880_v21 }
 0x600   : > { %2910 = vst [vmem:[%s5439_s1 + $0x88] sm:$0xff] %v2878_v37 }
 0x607   : > { %v3785_v5 = vpop.f32.mrb[100].mxu0 }
 0x608   : > { %v2329_v2 = vadd.f32 %v3785_v5, %v5420_v6  ;;  %v2320_v10 = vpop.f32.mrb[101].mxu0  ;;  %v3833_v11 = vpop.f32.mrb[132].mxu1 }
 0x609   : > { %v2321_v12 = vadd.f32 %v5420_v6, %v2320_v10  ;;  %v2560_v14 = vadd.f32 %v3833_v11, %v5422_v3  ;;  %v3786_v15 = vpop.f32.mrb[102].mxu0  ;;  %v2551_v18 = vpop.f32.mrb[133].mxu1 }
 0x60a   : > { %2851 = vst [vmem:[%s5428_s18 + $0xb0] sm:$0xff] %v2329_v2  ;;  %v2332_v19 = vadd.f32 %v3786_v15, %v5420_v6  ;;  %v2552_v4 = vadd.f32 %v5422_v3, %v2551_v18  ;;  %v2323_v20 = vpop.f32.mrb[103].mxu0  ;;  %v3834_v59 = vpop.f32.mrb[134].mxu1 }
 0x60b   : > { %2849 = vst [vmem:[%s5428_s18 + $0xa0] sm:$0xff] %v2321_v12  ;;  %v2883_v42 = vmax.f32 %v2560_v14, 0.0  ;;  %v2324_v23 = vadd.f32 %v5420_v6, %v2323_v20  ;;  %v2563_v24 = vadd.f32 %v3834_v59, %v5422_v3  ;;  %v2554_v25 = vpop.f32.mrb[135].mxu1 }
 0x60c   : > { %2852 = vst [vmem:[%s5428_s18 + $0xb8] sm:$0xff] %v2332_v19  ;;  %v2881_v26 = vmax.f32 %v2552_v4, 0.0  ;;  %v2555_v22 = vadd.f32 %v5422_v3, %v2554_v25 }
 0x60d   : > { %2915 = vst [vmem:[%s5439_s1 + $0xb0] sm:$0xff] %v2883_v42  ;;  %2850 = vst [vmem:[%s5428_s18 + $0xa8] sm:$0xff] %v2324_v23  ;;  %v2884_v27 = vmax.f32 %v2563_v24, 0.0 }
 0x60e   : > { %2913 = vst [vmem:[%s5439_s1 + $0xa0] sm:$0xff] %v2881_v26  ;;  %v2882_v31 = vmax.f32 %v2555_v22, 0.0 }
 0x60f   : > { %2916 = vst [vmem:[%s5439_s1 + $0xb8] sm:$0xff] %v2884_v27 }
 0x610   : > { %2914 = vst [vmem:[%s5439_s1 + $0xa8] sm:$0xff] %v2882_v31 }
 0x617   : > { %v3789_v32 = vpop.f32.mrb[104].mxu0 }
 0x618   : > { %v2345_v33 = vadd.f32 %v3789_v32, %v5420_v6  ;;  %v2336_v36 = vpop.f32.mrb[105].mxu0  ;;  %v3837_v56 = vpop.f32.mrb[136].mxu1 }
 0x619   : > { %v2337_v28 = vadd.f32 %v5420_v6, %v2336_v36  ;;  %v2576_v30 = vadd.f32 %v3837_v56, %v5422_v3  ;;  %v3790_v61 = vpop.f32.mrb[106].mxu0  ;;  %v2567_v63 = vpop.f32.mrb[137].mxu1 }
 0x61a   : > { %2855 = vst [vmem:[%s5428_s18 + $0xd0] sm:$0xff] %v2345_v33  ;;  %v2348_v43 = vadd.f32 %v3790_v61, %v5420_v6  ;;  %v2568_v29 = vadd.f32 %v5422_v3, %v2567_v63  ;;  %v2339_v1 = vpop.f32.mrb[107].mxu0  ;;  %v3838_v8 = vpop.f32.mrb[138].mxu1 }
 0x61b   : > { %2853 = vst [vmem:[%s5428_s18 + $0xc0] sm:$0xff] %v2337_v28  ;;  %v2887_v35 = vmax.f32 %v2576_v30, 0.0  ;;  %v2340_v40 = vadd.f32 %v5420_v6, %v2339_v1  ;;  %v2579_v34 = vadd.f32 %v3838_v8, %v5422_v3  ;;  %v2570_v9 = vpop.f32.mrb[139].mxu1 }
 0x61c   : > { %2856 = vst [vmem:[%s5428_s18 + $0xd8] sm:$0xff] %v2348_v43  ;;  %v2885_v44 = vmax.f32 %v2568_v29, 0.0  ;;  %v2571_v46 = vadd.f32 %v5422_v3, %v2570_v9 }
 0x61d   : > { %2919 = vst [vmem:[%s5439_s1 + $0xd0] sm:$0xff] %v2887_v35  ;;  %2854 = vst [vmem:[%s5428_s18 + $0xc8] sm:$0xff] %v2340_v40  ;;  %v2888_v13 = vmax.f32 %v2579_v34, 0.0 }
 0x61e   : > { %2917 = vst [vmem:[%s5439_s1 + $0xc0] sm:$0xff] %v2885_v44  ;;  %v2886_v16 = vmax.f32 %v2571_v46, 0.0 }
 0x61f   : > { %2920 = vst [vmem:[%s5439_s1 + $0xd8] sm:$0xff] %v2888_v13 }
 0x620   : > { %2918 = vst [vmem:[%s5439_s1 + $0xc8] sm:$0xff] %v2886_v16 }
 0x627   : > { %v3793_v41 = vpop.f32.mrb[108].mxu0 }
 0x628   : > { %v2361_v45 = vadd.f32 %v3793_v41, %v5420_v6  ;;  %v2352_v57 = vpop.f32.mrb[109].mxu0  ;;  %v3841_v47 = vpop.f32.mrb[140].mxu1 }
 0x629   : > { %v2353_v48 = vadd.f32 %v5420_v6, %v2352_v57  ;;  %v2592_v39 = vadd.f32 %v3841_v47, %v5422_v3  ;;  %v3794_v49 = vpop.f32.mrb[110].mxu0  ;;  %v2583_v50 = vpop.f32.mrb[141].mxu1 }
 0x62a   : > { %2859 = vst [vmem:[%s5428_s18 + $0xf0] sm:$0xff] %v2361_v45  ;;  %v2364_v17 = vadd.f32 %v3794_v49, %v5420_v6  ;;  %v2584_v51 = vadd.f32 %v5422_v3, %v2583_v50  ;;  %v2355_v38 = vpop.f32.mrb[111].mxu0  ;;  %v3842_v52 = vpop.f32.mrb[142].mxu1 }
 0x62b   : > { %2857 = vst [vmem:[%s5428_s18 + $0xe0] sm:$0xff] %v2353_v48  ;;  %v2891_v53 = vmax.f32 %v2592_v39, 0.0  ;;  %v2356_v54 = vadd.f32 %v5420_v6, %v2355_v38  ;;  %v2595_v55 = vadd.f32 %v3842_v52, %v5422_v3  ;;  %v2586_v58 = vpop.f32.mrb[143].mxu1 }
 0x62c   : > { %2860 = vst [vmem:[%s5428_s18 + $0xf8] sm:$0xff] %v2364_v17  ;;  %v2889_v60 = vmax.f32 %v2584_v51, 0.0  ;;  %v2587_v62 = vadd.f32 %v5422_v3, %v2586_v58 }
 0x62d   : > { %2923 = vst [vmem:[%s5439_s1 + $0xf0] sm:$0xff] %v2891_v53  ;;  %2858 = vst [vmem:[%s5428_s18 + $0xe8] sm:$0xff] %v2356_v54  ;;  %v2892_v6 = vmax.f32 %v2595_v55, 0.0  ;;  %s4618_s18 = smov [#allocation19]  }
 0x62e   : > { %2921 = vst [vmem:[%s5439_s1 + $0xe0] sm:$0xff] %v2889_v60  ;;  %v2890_v7 = vmax.f32 %v2587_v62, 0.0  ;;  %s4457_s0 = sshll.u32 %s4618_s18, 4  ;;  %s4458_s0 = int_to_ptr.vmem [resolvable:$false] %s4457_s0 }
 0x62f   : > { %s4459_s4 = scalar_lea.vmem %s4458_s0, 8192  ;;  %p4460_p6 = scmp.lt.s32.totalorder %s5563_s28, %s4458_s0 }
 0x630   : > { %p4461_p10 = scmp.lt.s32.totalorder %s4459_s4, %s4453_s26 }
 0x632   : > { %p4462_p11 = por %p4461_p10, %p4460_p6 }
 0x634   : > { %p4463_p0 = pnand %p4462_p11, %p4456_p8 }
 0x636   : > { %4466 = shalt.err (!%p4463_p0)
}
 0x637   : > { %s4467_s2 = scalar_lea.hbm %s5561_s17, 4096  ;;  %s4471_s18 = scalar_lea.hbm %s5821_s11, 8192 }
 0x638   : > { %p4468_p5 = scmp.ne.s32.totalorder %s5561_s17, %s4467_s2  ;;  %p4472_p4 = scmp.lt.u32.totalorder %s5561_s17, %s5821_s11 }
 0x639   : > { %p4473_p12 = scmp.lt.u32.totalorder %s4471_s18, %s4467_s2  ;;  %p4475_p1 = scmp.lt.u32.totalorder %s4467_s2, %s5561_s17 }
 0x63a   : > { %p4469_p9 = pnand %p4468_p5, %p5823_p3 }
 0x63b   : > { %p4474_p13 = por %p4473_p12, %p4472_p4 }
 0x63c   : > { %p4470_p7 = pneg %p4469_p9 }
 0x63d   : > { %p4476_p2 = por %p4475_p1, %p4474_p13 }
 0x63f   : > { %p4477_p8 = pnand %p4476_p2, %p4470_p7 }
 0x641   : > { %4480 = shalt.err (!%p4477_p8)
}
 0x642   : > { %s4619_s4 = smov 128   ;;  %s4620_s13 = smov 8   ;;  %2924 = vst [vmem:[%s5439_s1 + $0xf8] sm:$0xff] %v2892_v6  ;;  %v3861_v3 = vpop.f32.mrb[112].mxu0  ;;  %2922 = vst [vmem:[%s5439_s1 + $0xe8] sm:$0xff] %v2890_v7 }
 0x643   : > { %s5824_s5 = scalar_lea.sflag [#allocation4], %s5006_s20  ;;  %v2711_v21 = vadd.f32 %v3861_v3, %v5569_v0  ;;  %v2702_v37 = vpop.f32.mrb[113].mxu0  ;;  %s5825_s26 = sand.u32 1, %s4709_s27  }
 0x644   : > { %3945 = dma.vmem_to_hbm [thread:$0]  (%p5823_p3), %s5563_s28, 4096, %s5561_s17, %s5824_s5, %s4619_s4, %s4619_s4, %s4620_s13   ;;  %v2703_v5 = vadd.f32 %v5569_v0, %v2702_v37  ;;  %v3862_v2 = vpop.f32.mrb[114].mxu0 }
 0x645   : > { %s5613_s2 = scalar_lea.sflag [#allocation21], %s5825_s26  ;;  %s4481_s19 = scalar_lea.vmem %s5577_s16, 4096 }
 0x646   : > { %p4482_p6 = scmp.ne.s32.totalorder %s5577_s16, %s4481_s19  ;;  %s4621_s20 = smov [#allocation20]  }
 0x647   : > { %s4485_s28 = sshll.u32 %s4621_s20, 4  ;;  %s4486_s28 = int_to_ptr.vmem [resolvable:$false] %s4485_s28 }
 0x648   : > { %p4483_p10 = pnand %p4482_p6, %p5823_p3  ;;  %s4487_s17 = scalar_lea.vmem %s4486_s28, 8192 }
 0x649   : > { %p4488_p0 = scmp.lt.s32.totalorder %s5577_s16, %s4486_s28  ;;  %p4489_p5 = scmp.lt.s32.totalorder %s4487_s17, %s4481_s19 }
 0x64a   : > { %p4484_p11 = pneg %p4483_p10 }
 0x64b   : > { %p4490_p9 = por %p4489_p5, %p4488_p0 }
 0x64d   : > { %p4491_p7 = pnand %p4490_p9, %p4484_p11 }
 0x64f   : > { %4494 = shalt.err (!%p4491_p7)
}
 0x650   : > { %s4495_s27 = scalar_lea.hbm %s5575_s29, 4096  ;;  %s4499_s0 = scalar_lea.hbm %s5822_s15, 8192 }
 0x651   : > { %p4496_p4 = scmp.ne.s32.totalorder %s5575_s29, %s4495_s27  ;;  %p4500_p1 = scmp.lt.u32.totalorder %s5575_s29, %s5822_s15 }
 0x652   : > { %p4501_p2 = scmp.lt.u32.totalorder %s4499_s0, %s4495_s27  ;;  %p4503_p6 = scmp.lt.u32.totalorder %s4495_s27, %s5575_s29 }
 0x653   : > { %p4497_p12 = pnand %p4496_p4, %p5823_p3 }
 0x654   : > { %p4502_p8 = por %p4501_p2, %p4500_p1 }
 0x655   : > { %p4498_p13 = pneg %p4497_p12 }
 0x656   : > { %p4504_p10 = por %p4503_p6, %p4502_p8 }
 0x658   : > { %p4505_p11 = pnand %p4504_p10, %p4498_p13 }
 0x65a   : > { %4508 = shalt.err (!%p4505_p11)
}
 0x65b   : > { %3946 = dma.vmem_to_hbm [thread:$0]  (%p5823_p3), %s5577_s16, 4096, %s5575_s29, %s5613_s2, %s4619_s4, %s4619_s4, %s4620_s13   ;;  %v2927_v10 = vmax.f32 %v2711_v21, 0.0  ;;  %v2714_v11 = vadd.f32 %v3862_v2, %v5569_v0  ;;  %v2705_v12 = vpop.f32.mrb[115].mxu0  ;;  %v2925_v14 = vmax.f32 %v2703_v5, 0.0 }
 0x65c   : > { %v2706_v15 = vadd.f32 %v5569_v0, %v2705_v12  ;;  %s5643_s19 = scalar_lea.vmem [#allocation22], %s5009_s12  ;;  %v3865_v4 = vpop.f32.mrb[116].mxu0  ;;  %s5826_s20 = sld [smem:[#allocation40_spill]] }
 0x65d   : > { %2959 = vst [vmem:[%s5643_s19 + $0x10] sm:$0xff] %v2927_v10  ;;  %v2928_v18 = vmax.f32 %v2714_v11, 0.0  ;;  %2957 = vst [vmem:[%s5643_s19] sm:$0xff] %v2925_v14  ;;  %v2727_v20 = vadd.f32 %v3865_v4, %v5569_v0  ;;  %v2718_v59 = vpop.f32.mrb[117].mxu0  ;;  %s3045_s12 = sshll.u32 %s5643_s19, 4  ;;  %s4622_s27 = smov [#allocation22]   ;;  %s5710_s12 = int_to_ptr.vmem [resolvable:$true] %s3045_s12 }
 0x65e   : > { %v2926_v19 = vmax.f32 %v2706_v15, 0.0  ;;  %v2719_v42 = vadd.f32 %v5569_v0, %v2718_v59  ;;  %v3866_v23 = vpop.f32.mrb[118].mxu0  ;;  %s4509_s17 = scalar_lea.vmem %s5710_s12, 4096  ;;  %s4513_s1 = sshll.u32 %s4622_s27, 4  ;;  %s4514_s1 = int_to_ptr.vmem [resolvable:$false] %s4513_s1 }
 0x65f   : > { %2960 = vst [vmem:[%s5643_s19 + $0x18] sm:$0xff] %v2928_v18  ;;  %v2931_v24 = vmax.f32 %v2727_v20, 0.0  ;;  %v2730_v25 = vadd.f32 %v3866_v23, %v5569_v0  ;;  %v2721_v26 = vpop.f32.mrb[119].mxu0  ;;  %p4510_p0 = scmp.ne.s32.totalorder %s5710_s12, %s4509_s17  ;;  %s4515_s18 = scalar_lea.vmem %s4514_s1, 8192 }
 0x660   : > { %2958 = vst [vmem:[%s5643_s19 + $0x8] sm:$0xff] %v2926_v19  ;;  %v2929_v22 = vmax.f32 %v2719_v42, 0.0  ;;  %v2722_v27 = vadd.f32 %v5569_v0, %v2721_v26  ;;  %v3869_v33 = vpop.f32.mrb[120].mxu0  ;;  %p4516_p7 = scmp.lt.s32.totalorder %s5710_s12, %s4514_s1  ;;  %p4517_p4 = scmp.lt.s32.totalorder %s4515_s18, %s4509_s17 }
 0x661   : > { %2963 = vst [vmem:[%s5643_s19 + $0x30] sm:$0xff] %v2931_v24  ;;  %v2932_v31 = vmax.f32 %v2730_v25, 0.0  ;;  %v2743_v36 = vadd.f32 %v3869_v33, %v5569_v0  ;;  %v2734_v56 = vpop.f32.mrb[121].mxu0  ;;  %p4511_p5 = pnand %p4510_p0, %p5823_p3 }
 0x662   : > { %2961 = vst [vmem:[%s5643_s19 + $0x20] sm:$0xff] %v2929_v22  ;;  %v2930_v32 = vmax.f32 %v2722_v27, 0.0  ;;  %v2735_v28 = vadd.f32 %v5569_v0, %v2734_v56  ;;  %v3870_v30 = vpop.f32.mrb[122].mxu0  ;;  %s5708_s28 = scalar_lea.hbm %s5826_s20, %s5545_s10  ;;  %p4518_p12 = por %p4517_p4, %p4516_p7 }
 0x663   : > { %2964 = vst [vmem:[%s5643_s19 + $0x38] sm:$0xff] %v2932_v31  ;;  %v2935_v61 = vmax.f32 %v2743_v36, 0.0  ;;  %v2746_v63 = vadd.f32 %v3870_v30, %v5569_v0  ;;  %v2737_v43 = vpop.f32.mrb[123].mxu0  ;;  %p4512_p9 = pneg %p4511_p5 }
 0x664   : > { %2962 = vst [vmem:[%s5643_s19 + $0x28] sm:$0xff] %v2930_v32  ;;  %v2933_v29 = vmax.f32 %v2735_v28, 0.0  ;;  %v2738_v1 = vadd.f32 %v5569_v0, %v2737_v43  ;;  %v3873_v40 = vpop.f32.mrb[124].mxu0 }
 0x665   : > { %2967 = vst [vmem:[%s5643_s19 + $0x50] sm:$0xff] %v2935_v61  ;;  %v2936_v8 = vmax.f32 %v2746_v63, 0.0  ;;  %v2759_v34 = vadd.f32 %v3873_v40, %v5569_v0  ;;  %v2750_v9 = vpop.f32.mrb[125].mxu0  ;;  %p4519_p13 = pnand %p4518_p12, %p4512_p9 }
 0x666   : > { %2965 = vst [vmem:[%s5643_s19 + $0x40] sm:$0xff] %v2933_v29  ;;  %v2934_v35 = vmax.f32 %v2738_v1, 0.0  ;;  %v2751_v44 = vadd.f32 %v5569_v0, %v2750_v9  ;;  %v3874_v46 = vpop.f32.mrb[126].mxu0 }
 0x667   : > { %2968 = vst [vmem:[%s5643_s19 + $0x58] sm:$0xff] %v2936_v8  ;;  %v2939_v13 = vmax.f32 %v2759_v34, 0.0  ;;  %v2762_v16 = vadd.f32 %v3874_v46, %v5569_v0  ;;  %v2753_v41 = vpop.f32.mrb[127].mxu0 }
 0x668   : > { %2966 = vst [vmem:[%s5643_s19 + $0x48] sm:$0xff] %v2934_v35  ;;  %v2937_v45 = vmax.f32 %v2751_v44, 0.0  ;;  %v2754_v57 = vadd.f32 %v5569_v0, %v2753_v41  ;;  %v3877_v39 = vpop.f32.mrb[128].mxu0 }
 0x669   : > { %2971 = vst [vmem:[%s5643_s19 + $0x70] sm:$0xff] %v2939_v13  ;;  %v2940_v47 = vmax.f32 %v2762_v16, 0.0  ;;  %v2775_v49 = vadd.f32 %v3877_v39, %v5569_v0  ;;  %v2766_v50 = vpop.f32.mrb[129].mxu0 }
 0x66a   : > { %2969 = vst [vmem:[%s5643_s19 + $0x60] sm:$0xff] %v2937_v45  ;;  %v2938_v48 = vmax.f32 %v2754_v57, 0.0  ;;  %v2767_v17 = vadd.f32 %v5569_v0, %v2766_v50  ;;  %v3878_v51 = vpop.f32.mrb[130].mxu0 }
 0x66b   : > { %2972 = vst [vmem:[%s5643_s19 + $0x78] sm:$0xff] %v2940_v47  ;;  %v2943_v38 = vmax.f32 %v2775_v49, 0.0  ;;  %v2778_v52 = vadd.f32 %v3878_v51, %v5569_v0  ;;  %v2769_v53 = vpop.f32.mrb[131].mxu0 }
 0x66c   : > { %2970 = vst [vmem:[%s5643_s19 + $0x68] sm:$0xff] %v2938_v48  ;;  %v2941_v54 = vmax.f32 %v2767_v17, 0.0  ;;  %v2770_v55 = vadd.f32 %v5569_v0, %v2769_v53  ;;  %v3881_v62 = vpop.f32.mrb[132].mxu0 }
 0x66d   : > { %2975 = vst [vmem:[%s5643_s19 + $0x90] sm:$0xff] %v2943_v38  ;;  %v2944_v58 = vmax.f32 %v2778_v52, 0.0  ;;  %v2791_v6 = vadd.f32 %v3881_v62, %v5569_v0  ;;  %v2782_v7 = vpop.f32.mrb[133].mxu0 }
 0x66e   : > { %2973 = vst [vmem:[%s5643_s19 + $0x80] sm:$0xff] %v2941_v54  ;;  %v2942_v60 = vmax.f32 %v2770_v55, 0.0  ;;  %v2783_v3 = vadd.f32 %v5569_v0, %v2782_v7  ;;  %v3882_v21 = vpop.f32.mrb[134].mxu0 }
 0x66f   : > { %2976 = vst [vmem:[%s5643_s19 + $0x98] sm:$0xff] %v2944_v58  ;;  %v2947_v37 = vmax.f32 %v2791_v6, 0.0  ;;  %v2794_v5 = vadd.f32 %v3882_v21, %v5569_v0  ;;  %v2785_v2 = vpop.f32.mrb[135].mxu0 }
 0x670   : > { %2974 = vst [vmem:[%s5643_s19 + $0x88] sm:$0xff] %v2942_v60  ;;  %v2945_v10 = vmax.f32 %v2783_v3, 0.0  ;;  %v2786_v11 = vadd.f32 %v5569_v0, %v2785_v2  ;;  %v3885_v15 = vpop.f32.mrb[136].mxu0 }
 0x671   : > { %2979 = vst [vmem:[%s5643_s19 + $0xb0] sm:$0xff] %v2947_v37  ;;  %v2948_v12 = vmax.f32 %v2794_v5, 0.0  ;;  %v2807_v18 = vadd.f32 %v3885_v15, %v5569_v0  ;;  %v2798_v19 = vpop.f32.mrb[137].mxu0 }
 0x672   : > { %2977 = vst [vmem:[%s5643_s19 + $0xa0] sm:$0xff] %v2945_v10  ;;  %v2946_v14 = vmax.f32 %v2786_v11, 0.0  ;;  %v2799_v4 = vadd.f32 %v5569_v0, %v2798_v19  ;;  %v3886_v20 = vpop.f32.mrb[138].mxu0 }
 0x673   : > { %2980 = vst [vmem:[%s5643_s19 + $0xb8] sm:$0xff] %v2948_v12  ;;  %v2951_v59 = vmax.f32 %v2807_v18, 0.0  ;;  %v2810_v42 = vadd.f32 %v3886_v20, %v5569_v0  ;;  %v2801_v23 = vpop.f32.mrb[139].mxu0 }
 0x674   : > { %2978 = vst [vmem:[%s5643_s19 + $0xa8] sm:$0xff] %v2946_v14  ;;  %v2949_v24 = vmax.f32 %v2799_v4, 0.0  ;;  %v2802_v25 = vadd.f32 %v5569_v0, %v2801_v23  ;;  %v3889_v27 = vpop.f32.mrb[140].mxu0 }
 0x675   : > { %2983 = vst [vmem:[%s5643_s19 + $0xd0] sm:$0xff] %v2951_v59  ;;  %v2952_v26 = vmax.f32 %v2810_v42, 0.0  ;;  %v2823_v31 = vadd.f32 %v3889_v27, %v5569_v0  ;;  %v2814_v32 = vpop.f32.mrb[141].mxu0 }
 0x676   : > { %2981 = vst [vmem:[%s5643_s19 + $0xc0] sm:$0xff] %v2949_v24  ;;  %v2950_v22 = vmax.f32 %v2802_v25, 0.0  ;;  %v2815_v33 = vadd.f32 %v5569_v0, %v2814_v32  ;;  %v3890_v36 = vpop.f32.mrb[142].mxu0 }
 0x677   : > { %2984 = vst [vmem:[%s5643_s19 + $0xd8] sm:$0xff] %v2952_v26  ;;  %v2955_v56 = vmax.f32 %v2823_v31, 0.0  ;;  %v2826_v28 = vadd.f32 %v3890_v36, %v5569_v0  ;;  %v2817_v30 = vpop.f32.mrb[143].mxu0 }
 0x678   : > { %2982 = vst [vmem:[%s5643_s19 + $0xc8] sm:$0xff] %v2950_v22  ;;  %v2953_v61 = vmax.f32 %v2815_v33, 0.0  ;;  %v2818_v63 = vadd.f32 %v5569_v0, %v2817_v30 }
 0x679   : > { %2987 = vst [vmem:[%s5643_s19 + $0xf0] sm:$0xff] %v2955_v56  ;;  %v2956_v43 = vmax.f32 %v2826_v28, 0.0 }
 0x67a   : > { %2985 = vst [vmem:[%s5643_s19 + $0xe0] sm:$0xff] %v2953_v61  ;;  %v2954_v29 = vmax.f32 %v2818_v63, 0.0 }
 0x67b   : > { %2988 = vst [vmem:[%s5643_s19 + $0xf8] sm:$0xff] %v2956_v43 }
 0x67c   : > { %2986 = vst [vmem:[%s5643_s19 + $0xe8] sm:$0xff] %v2954_v29 }
 0x67d   : > { %4522 = shalt.err (!%p4519_p13)
}
 0x67e   : > { %s4523_s10 = scalar_lea.hbm %s5708_s28, 4096  ;;  %s4527_s26 = scalar_lea.hbm %s5826_s20, 8192 }
 0x67f   : > { %p4524_p1 = scmp.ne.s32.totalorder %s5708_s28, %s4523_s10  ;;  %p4528_p6 = scmp.lt.u32.totalorder %s5708_s28, %s5826_s20 }
 0x680   : > { %p4529_p10 = scmp.lt.u32.totalorder %s4527_s26, %s4523_s10  ;;  %p4531_p0 = scmp.lt.u32.totalorder %s4523_s10, %s5708_s28 }
 0x681   : > { %p4525_p2 = pnand %p4524_p1, %p5823_p3 }
 0x682   : > { %p4530_p11 = por %p4529_p10, %p4528_p6 }
 0x683   : > { %p4526_p8 = pneg %p4525_p2 }
 0x684   : > { %p4532_p5 = por %p4531_p0, %p4530_p11 }
 0x686   : > { %p4533_p9 = pnand %p4532_p5, %p4526_p8 }
 0x688   : > { %4536 = shalt.err (!%p4533_p9)
}
 0x689   : > { %3947 = dma.vmem_to_hbm [thread:$0]  (%p5823_p3), %s5710_s12, 4096, %s5708_s28, %s5613_s2, %s4619_s4, %s4619_s4, %s4620_s13  }
 0x68a PF: > { %s3060_s29 = sand.u32 1, %s4587_s21   ;;  %p5827_p7 = scmp.ne.s32.totalorder %s5806_s3, 0 }
 0x68b   : > { %p5828_p4 = scmp.ge.s32.totalorder %s4599_s24, 2  ;;  %s3061_s17 = scalar_lea.sflag [#allocation4], %s3060_s29 }
 0x68d   : > { %p3984_p12 = pnand %p5828_p4, %p5827_p7 }
 0x68f   : > { %4578 = dma.done.wait (!%p3984_p12), %s3061_s17, 4096  }
 0x690   : > { %4580 = vsyncadd (!%p3984_p12), %s3061_s17, 4294963200  ;;  %s5829_s30 = sadd.s32 4294967294, %s4599_s24  }
 0x691   : > { %s3069_s27 = sand.u32 1, %s5829_s30  }
 0x692   : > { %s3070_s1 = scalar_lea.sflag [#allocation21], %s3069_s27 }
 0x693   : > { %4582 = dma.done.wait (!%p3984_p12), %s3070_s1, 8192  }
 0x694   : > { %4584 = vsyncadd (!%p3984_p12), %s3070_s1, 4294959104  ;;  %p34_p3 = scmp.ge.s32.totalorder %s4931_s25, 4   ;;  %s5830_s21 = smov %s4591_s22 }
 0x695   : > { %s5831_s22 = smov %s4595_s23  ;;  %s5832_s23 = smov %s4943_s14 }
 0x696   : > { %s5833_s24 = smov %s4931_s25  ;;  %36 = sbr.rel (!%p34_p3) target bundleno = 22 (0x16), region = 175 }
 0x69d   :  { %3084 = vsyncpa [#allocation3], 1 }
 0x69e   :  { %3086 = vsyncpa [#allocation3 + $0x1], 1 }
 0x69f   :  { %3087 = vsyncpa [#allocation6], 1 }
 0x6a0   :  { %3088 = vsyncpa [#allocation9], 1 }
 0x6a1   :  { %3089 = vsyncpa [#allocation12], 1 }
 0x6a2   :  { %3090 = vsyncpa [#allocation15], 1 }
 0x6a3   :  { %3091 = vsyncpa [#allocation18], 1 }
 0x6a4   :  { %3092 = vsyncpa [#allocation4], 1 }
 0x6a5   :  { %3094 = vsyncpa [#allocation4 + $0x1], 1 }
 0x6a6   :  { %3095 = vsyncpa [#allocation21], 1 }
 0x6a7   :  { %3097 = vsyncpa [#allocation21 + $0x1], 1 }

</bundles_post_ra>
